<compile_context>
chip_gen: v5e
topology: v5e:2x2
jax: 0.10.0
libtpu: 0.0.40
codegen_flags: <defaults>
</compile_context>

<pallas_src>
import functools

import jax
import jax.numpy as jnp
from jax import lax
from jax.experimental import pallas as pl
from jax.experimental.pallas import tpu as pltpu


_N_FILTERS = (32, 96, 128, 128, 128)     # np.intc([128, 384, 512, 512, 512] / 4)
_C = 128                                 # lane-padded channel width
_HALO = 48                               # max dilated pad = 3 * 2**4


def _discriminator_kernel(x0_ref, w0_ref, wmid_ref, shift_ref, o_ref, pad_ref, *, l):
    """Fused 5-layer forward for ONE batch element (grid axis = batch).

    x0_ref:    (l, 8)            layer-0 im2col taps (7 taps + 1 zero lane), f32
    w0_ref:    (8, 128)          layer-0 weight, channel-padded, f32
    wmid_ref:  (4, 7, 128, 128)  layers 1..4 per-tap weights (BN scale folded), bf16
    shift_ref: (5, 1, 128)       fused per-channel shift (bias / BN folded), f32
    o_ref:     (1, l//32, 128)   final sigmoid activations (channel-padded), f32
    pad_ref:   (l + 96, 128)     bf16 VMEM scratch: zero halo + current activation
    """
    c = _C
    lo = l // 32

    # Zero the halos (the centre is fully overwritten every layer, halos stay zero).
    pad_ref[0:_HALO, :] = jnp.zeros((_HALO, c), jnp.bfloat16)
    pad_ref[_HALO + l:_HALO + l + _HALO, :] = jnp.zeros((_HALO, c), jnp.bfloat16)

    # ---- layer 0: Conv1d(1 -> 32, lane-padded) + bias + LeakyReLU(0.2), f32 MXU ----
    acc = jnp.dot(x0_ref[...], w0_ref[...], preferred_element_type=jnp.float32)
    y = acc + shift_ref[0]
    pad_ref[_HALO:_HALO + l, :] = jnp.where(y > 0, y, 0.2 * y).astype(jnp.bfloat16)

    # ---- layers 1..3: dilated ("a trous") convs, 7 accumulating per-tap matmuls ----
    for j in range(1, 4):
        d = 1 << j                       # dilation 2^j carries the stride-2 chain
        base = _HALO - 3 * d
        acc = jnp.zeros((l, c), jnp.float32)
        for k in range(7):
            lhs = pad_ref[base + d * k: base + d * k + l, :]   # static bf16 slice
            acc = acc + jnp.dot(lhs, wmid_ref[j - 1, k],
                                preferred_element_type=jnp.float32)
        y = acc + shift_ref[j]
        pad_ref[_HALO:_HALO + l, :] = jnp.where(y > 0, y, 0.2 * y).astype(jnp.bfloat16)

    # ---- layer 4: only the l//32 rows that survive the cumulative stride 32 --------
    # Needed input rows (scratch coords) for output t, tap k are 32*t + 16*k.
    acc = jnp.zeros((lo, c), jnp.float32)
    for k in range(7):
        rows = [pad_ref[16 * k + 32 * t: 16 * k + 32 * t + 1, :] for t in range(lo)]
        lhs = jnp.concatenate(rows, axis=0)                    # (lo, 128) bf16
        acc = acc + jnp.dot(lhs, wmid_ref[3, k], preferred_element_type=jnp.float32)
    y = acc + shift_ref[4]
    o_ref[...] = pl.reciprocal(1.0 + jnp.exp(-y), approx=False).reshape(1, lo, c)


def pack_discriminator_params(params, eps=1e-5):
    """One-time (per param update) packing: pad, transpose, fold bias/BN scale."""
    C = _C
    # layer 0: (c_out, 1, 7) -> (8, 128): K padded 7 -> 8, channels padded to 128.
    w0t = jnp.transpose(params[0]["w"][:, 0, :], (1, 0))            # (7, c_out0)
    c0 = w0t.shape[1]
    w0 = jnp.zeros((8, C), jnp.float32).at[:7, :c0].set(w0t)

    shifts = jnp.zeros((5, 1, C), jnp.float32).at[0, 0, :c0].set(params[0]["b"])
    wmid = jnp.zeros((4, 7, C, C), jnp.float32)
    for i, p in enumerate(params[1:], start=1):
        c_out, c_in, _ = p["w"].shape
        if "gamma" in p:                 # Conv + BatchNorm (inference fold) + LeakyReLU
            s = p["gamma"] / jnp.sqrt(p["var"] + eps)
            shift_i = p["beta"] + (p["b"] - p["mean"]) * s
        else:                            # Conv + bias (+ Sigmoid)
            s = jnp.ones((c_out,), jnp.float32)
            shift_i = p["b"]
        shifts = shifts.at[i, 0, :c_out].set(shift_i)
        wt = jnp.transpose(p["w"], (2, 1, 0)) * s[None, None, :]    # BN scale folded
        wmid = wmid.at[i - 1, :, :c_in, :c_out].set(wt)
    return {"w0": w0, "wmid": wmid.astype(jnp.bfloat16), "shifts": shifts}


def discriminator_forward(packed, x_ncw):
    """x_ncw: (N, 1, L) in PyTorch NCW layout; returns (N, 128, L // 32)."""
    n, c_in0, l = x_ncw.shape
    assert c_in0 == 1 and l % 32 == 0 and l >= 32
    C = _C
    l_out = l // 32

    # layer-0 im2col tap matrix (x-dependent boundary glue, tiny): (N*L, 8)
    xs = x_ncw[:, 0, :].astype(jnp.float32)
    xp = jnp.pad(xs, ((0, 0), (3, 3)))                              # k=7, pad=3
    taps = [xp[:, k:k + l] for k in range(7)] + [jnp.zeros((n, l), jnp.float32)]
    x0 = jnp.stack(taps, axis=-1).reshape(n * l, 8)

    kernel = functools.partial(_discriminator_kernel, l=l)
    out_nlc = pl.pallas_call(
        kernel,
        out_shape=jax.ShapeDtypeStruct((n, l_out, C), jnp.float32),
        grid=(n,),                               # one batch element per grid step
        in_specs=[
            pl.BlockSpec((l, 8), lambda i: (i, 0)),
            pl.BlockSpec((8, C), lambda i: (0, 0)),
            pl.BlockSpec((4, 7, C, C), lambda i: (0, 0, 0, 0)),
            pl.BlockSpec((5, 1, C), lambda i: (0, 0, 0)),
        ],
        out_specs=pl.BlockSpec((1, l_out, C), lambda i: (i, 0, 0)),
        scratch_shapes=[pltpu.VMEM((l + 2 * _HALO, C), jnp.bfloat16)],
        compiler_params=pltpu.CompilerParams(dimension_semantics=("parallel",)),
    )(x0, packed["w0"], packed["wmid"], packed["shifts"])

    c_last = _N_FILTERS[-1]                      # 128 -> the slice is a no-op
    return jnp.transpose(out_nlc[:, :, :c_last], (0, 2, 1))         # NLC -> NCW


def init_discriminator_params(key):
    # n_filters = intc([128, 384, 512, 512, 512] / 4) = [32, 96, 128, 128, 128]
    n_filters = list(_N_FILTERS)
    k_size = 7
    params = []
    c_in = 1
    for i, c_out in enumerate(n_filters):
        key, kw, kb, kg, kbt, km, kv = jax.random.split(key, 7)
        fan_in = c_in * k_size
        bound = 1.0 / float(fan_in) ** 0.5
        layer = {
            # PyTorch Conv1d weight layout (C_out, C_in, K), uniform(-1/sqrt(fan_in), ..)
            "w": jax.random.uniform(kw, (c_out, c_in, k_size), jnp.float32, -bound, bound),
            "b": jax.random.uniform(kb, (c_out,), jnp.float32, -bound, bound),
        }
        if i in (1, 2, 3):  # layers followed by BatchNorm1d
            layer["gamma"] = 1.0 + 0.1 * jax.random.normal(kg, (c_out,), jnp.float32)
            layer["beta"] = 0.1 * jax.random.normal(kbt, (c_out,), jnp.float32)
            layer["mean"] = 0.1 * jax.random.normal(km, (c_out,), jnp.float32)
            layer["var"] = 1.0 + 0.1 * jnp.abs(jax.random.normal(kv, (c_out,), jnp.float32))
        params.append(layer)
        c_in = c_out
    return params


def discriminator_reference(params, x_ncw):
    """Pure-JAX f32 reference (lax.conv) with identical semantics."""
    eps = 1e-5
    x = x_ncw
    for i, p in enumerate(params):
        y = lax.conv_general_dilated(
            x, p["w"], window_strides=(2,), padding=[(3, 3)],
            dimension_numbers=("NCH", "OIH", "NCH"))
        y = y + p["b"][None, :, None]
        if "gamma" in p:
            s = p["gamma"] / jnp.sqrt(p["var"] + eps)
            y = (y - p["mean"][None, :, None]) * s[None, :, None] + p["beta"][None, :, None]
            y = jnp.where(y > 0, y, 0.2 * y)
        elif i == 0:
            y = jnp.where(y > 0, y, 0.2 * y)
        else:
            y = 1.0 / (1.0 + jnp.exp(-y))
        x = y
    return x


if __name__ == "__main__":
    key = jax.random.PRNGKey(0)
    kp, kx = jax.random.split(key)
    params = init_discriminator_params(kp)

    # Small input consistent with the module: (batch=2, channels=1, length=128)
    x = jax.random.normal(kx, (2, 1, 128), jnp.float32)

    packed = pack_discriminator_params(params)          # once per param update
    out = jax.jit(discriminator_forward)(packed, x)
    out = jax.block_until_ready(out)

    ref = discriminator_reference(params, x)
    assert out.shape == ref.shape == (2, 128, 4), out.shape
    max_err = float(jnp.max(jnp.abs(out - ref)))
    # bf16 matmul inputs (f32 accumulation) for layers 1..4 -> relaxed tolerance vs f32.
    assert jnp.allclose(out, ref, rtol=2e-2, atol=2e-2), max_err

    print("KERNEL_OK")
</pallas_src>

<mosaic_0001>
module attributes {stable_mosaic.version = 11 : i64} {
  func.func @_discriminator_kernel(%arg0: i32, %arg1: memref<128x8xf32, #tpu.memory_space<vmem>>, %arg2: memref<8x128xf32, #tpu.memory_space<vmem>>, %arg3: memref<4x7x128x128xbf16, #tpu.memory_space<vmem>>, %arg4: memref<5x1x128xf32, #tpu.memory_space<vmem>>, %arg5: memref<1x4x128xf32, #tpu.memory_space<vmem>>, %arg6: memref<224x128xbf16, #tpu.memory_space<vmem>>) attributes {dimension_semantics = [#tpu.dimension_semantics<parallel>], iteration_bounds = array<i64: 2>, scalar_prefetch = 0 : i64, scratch_operands = 1 : i64, tpu.core_type = #tpu.core_type<tc>, window_params = [{transform_indices = @transform_0, window_bounds = array<i64: 128, 8>}, {pipeline_mode = #tpu.pipeline_mode<synchronous>, transform_indices = @transform_1, window_bounds = array<i64: 8, 128>}, {pipeline_mode = #tpu.pipeline_mode<synchronous>, transform_indices = @transform_2, window_bounds = array<i64: 4, 7, 128, 128>}, {pipeline_mode = #tpu.pipeline_mode<synchronous>, transform_indices = @transform_3, window_bounds = array<i64: 5, 1, 128>}, {transform_indices = @transform_4, window_bounds = array<i64: 1, 4, 128>}]} {
    %cst = arith.constant 0.000000e+00 : bf16
    %0 = vector.broadcast %cst : bf16 to vector<48x128xbf16>
    %c0 = arith.constant 0 : index
    %c0_0 = arith.constant 0 : index
    %1 = vector.load %arg6[%c0, %c0_0] : memref<224x128xbf16, #tpu.memory_space<vmem>>, vector<48x128xbf16>
    tpu.vector_store %arg6[%c0, %c0_0], %0 {strides = array<i32>} : memref<224x128xbf16, #tpu.memory_space<vmem>>, vector<48x128xbf16>,
    %cst_1 = arith.constant 0.000000e+00 : bf16
    %2 = vector.broadcast %cst_1 : bf16 to vector<48x128xbf16>
    %c176 = arith.constant 176 : index
    %c0_2 = arith.constant 0 : index
    %3 = vector.load %arg6[%c176, %c0_2] : memref<224x128xbf16, #tpu.memory_space<vmem>>, vector<48x128xbf16>
    tpu.vector_store %arg6[%c176, %c0_2], %2 {strides = array<i32>} : memref<224x128xbf16, #tpu.memory_space<vmem>>, vector<48x128xbf16>,
    %c0_3 = arith.constant 0 : index
    %c0_4 = arith.constant 0 : index
    %4 = vector.load %arg1[%c0_3, %c0_4] : memref<128x8xf32, #tpu.memory_space<vmem>>, vector<128x8xf32>
    %c0_5 = arith.constant 0 : index
    %c0_6 = arith.constant 0 : index
    %5 = vector.load %arg2[%c0_5, %c0_6] : memref<8x128xf32, #tpu.memory_space<vmem>>, vector<8x128xf32>
    %cst_7 = arith.constant dense<0.000000e+00> : vector<128x128xf32>
    %6 = tpu.matmul %4, %5, %cst_7 {dimension_numbers = #tpu.dot_dimension_numbers<[1], [0], [0], [1], [0, 0, 1, 1], [], []>} : vector<128x8xf32>, vector<8x128xf32>, vector<128x128xf32> -> vector<128x128xf32>
    %c0_8 = arith.constant 0 : index
    %c0_9 = arith.constant 0 : index
    %c0_10 = arith.constant 0 : index
    %7 = vector.load %arg4[%c0_8, %c0_9, %c0_10] : memref<5x1x128xf32, #tpu.memory_space<vmem>>, vector<1x1x128xf32>
    %8 = vector.shape_cast %7 : vector<1x1x128xf32> to vector<1x128xf32>
    %9 = vector.broadcast %8 : vector<1x128xf32> to vector<128x128xf32>
    %10 = arith.addf %6, %9 : vector<128x128xf32>
    %cst_11 = arith.constant 0.000000e+00 : f32
    %11 = vector.broadcast %cst_11 : f32 to vector<128x128xf32>
    %12 = arith.cmpf ogt, %10, %11 : vector<128x128xf32>
    %cst_12 = arith.constant 2.000000e-01 : f32
    %13 = vector.broadcast %cst_12 : f32 to vector<128x128xf32>
    %14 = arith.mulf %13, %10 : vector<128x128xf32>
    %15 = arith.select %12, %10, %14 : vector<128x128xi1>, vector<128x128xf32>
    %16 = arith.truncf %15 : vector<128x128xf32> to vector<128x128xbf16>
    %c48 = arith.constant 48 : index
    %c0_13 = arith.constant 0 : index
    %17 = vector.load %arg6[%c48, %c0_13] : memref<224x128xbf16, #tpu.memory_space<vmem>>, vector<128x128xbf16>
    tpu.vector_store %arg6[%c48, %c0_13], %16 {strides = array<i32>} : memref<224x128xbf16, #tpu.memory_space<vmem>>, vector<128x128xbf16>,
    %cst_14 = arith.constant 0.000000e+00 : f32
    %18 = vector.broadcast %cst_14 : f32 to vector<128x128xf32>
    %c42 = arith.constant 42 : index
    %c0_15 = arith.constant 0 : index
    %19 = vector.load %arg6[%c42, %c0_15] : memref<224x128xbf16, #tpu.memory_space<vmem>>, vector<128x128xbf16>
    %c0_16 = arith.constant 0 : index
    %c0_17 = arith.constant 0 : index
    %c0_18 = arith.constant 0 : index
    %c0_19 = arith.constant 0 : index
    %20 = vector.load %arg3[%c0_16, %c0_17, %c0_18, %c0_19] : memref<4x7x128x128xbf16, #tpu.memory_space<vmem>>, vector<1x1x128x128xbf16>
    %21 = vector.shape_cast %20 : vector<1x1x128x128xbf16> to vector<128x128xbf16>
    %cst_20 = arith.constant dense<0.000000e+00> : vector<128x128xf32>
    %22 = tpu.matmul %19, %21, %cst_20 {dimension_numbers = #tpu.dot_dimension_numbers<[1], [0], [0], [1], [0, 0, 1, 1], [], []>} : vector<128x128xbf16>, vector<128x128xbf16>, vector<128x128xf32> -> vector<128x128xf32>
    %23 = arith.addf %18, %22 : vector<128x128xf32>
    %c44 = arith.constant 44 : index
    %c0_21 = arith.constant 0 : index
    %24 = vector.load %arg6[%c44, %c0_21] : memref<224x128xbf16, #tpu.memory_space<vmem>>, vector<128x128xbf16>
    %c0_22 = arith.constant 0 : index
    %c1 = arith.constant 1 : index
    %c0_23 = arith.constant 0 : index
    %c0_24 = arith.constant 0 : index
    %25 = vector.load %arg3[%c0_22, %c1, %c0_23, %c0_24] : memref<4x7x128x128xbf16, #tpu.memory_space<vmem>>, vector<1x1x128x128xbf16>
    %26 = vector.shape_cast %25 : vector<1x1x128x128xbf16> to vector<128x128xbf16>
    %cst_25 = arith.constant dense<0.000000e+00> : vector<128x128xf32>
    %27 = tpu.matmul %24, %26, %cst_25 {dimension_numbers = #tpu.dot_dimension_numbers<[1], [0], [0], [1], [0, 0, 1, 1], [], []>} : vector<128x128xbf16>, vector<128x128xbf16>, vector<128x128xf32> -> vector<128x128xf32>
    %28 = arith.addf %23, %27 : vector<128x128xf32>
    %c46 = arith.constant 46 : index
    %c0_26 = arith.constant 0 : index
    %29 = vector.load %arg6[%c46, %c0_26] : memref<224x128xbf16, #tpu.memory_space<vmem>>, vector<128x128xbf16>
    %c0_27 = arith.constant 0 : index
    %c2 = arith.constant 2 : index
    %c0_28 = arith.constant 0 : index
    %c0_29 = arith.constant 0 : index
    %30 = vector.load %arg3[%c0_27, %c2, %c0_28, %c0_29] : memref<4x7x128x128xbf16, #tpu.memory_space<vmem>>, vector<1x1x128x128xbf16>
    %31 = vector.shape_cast %30 : vector<1x1x128x128xbf16> to vector<128x128xbf16>
    %cst_30 = arith.constant dense<0.000000e+00> : vector<128x128xf32>
    %32 = tpu.matmul %29, %31, %cst_30 {dimension_numbers = #tpu.dot_dimension_numbers<[1], [0], [0], [1], [0, 0, 1, 1], [], []>} : vector<128x128xbf16>, vector<128x128xbf16>, vector<128x128xf32> -> vector<128x128xf32>
    %33 = arith.addf %28, %32 : vector<128x128xf32>
    %c48_31 = arith.constant 48 : index
    %c0_32 = arith.constant 0 : index
    %34 = vector.load %arg6[%c48_31, %c0_32] : memref<224x128xbf16, #tpu.memory_space<vmem>>, vector<128x128xbf16>
    %c0_33 = arith.constant 0 : index
    %c3 = arith.constant 3 : index
    %c0_34 = arith.constant 0 : index
    %c0_35 = arith.constant 0 : index
    %35 = vector.load %arg3[%c0_33, %c3, %c0_34, %c0_35] : memref<4x7x128x128xbf16, #tpu.memory_space<vmem>>, vector<1x1x128x128xbf16>
    %36 = vector.shape_cast %35 : vector<1x1x128x128xbf16> to vector<128x128xbf16>
    %cst_36 = arith.constant dense<0.000000e+00> : vector<128x128xf32>
    %37 = tpu.matmul %34, %36, %cst_36 {dimension_numbers = #tpu.dot_dimension_numbers<[1], [0], [0], [1], [0, 0, 1, 1], [], []>} : vector<128x128xbf16>, vector<128x128xbf16>, vector<128x128xf32> -> vector<128x128xf32>
    %38 = arith.addf %33, %37 : vector<128x128xf32>
    %c50 = arith.constant 50 : index
    %c0_37 = arith.constant 0 : index
    %39 = vector.load %arg6[%c50, %c0_37] : memref<224x128xbf16, #tpu.memory_space<vmem>>, vector<128x128xbf16>
    %c0_38 = arith.constant 0 : index
    %c4 = arith.constant 4 : index
    %c0_39 = arith.constant 0 : index
    %c0_40 = arith.constant 0 : index
    %40 = vector.load %arg3[%c0_38, %c4, %c0_39, %c0_40] : memref<4x7x128x128xbf16, #tpu.memory_space<vmem>>, vector<1x1x128x128xbf16>
    %41 = vector.shape_cast %40 : vector<1x1x128x128xbf16> to vector<128x128xbf16>
    %cst_41 = arith.constant dense<0.000000e+00> : vector<128x128xf32>
    %42 = tpu.matmul %39, %41, %cst_41 {dimension_numbers = #tpu.dot_dimension_numbers<[1], [0], [0], [1], [0, 0, 1, 1], [], []>} : vector<128x128xbf16>, vector<128x128xbf16>, vector<128x128xf32> -> vector<128x128xf32>
    %43 = arith.addf %38, %42 : vector<128x128xf32>
    %c52 = arith.constant 52 : index
    %c0_42 = arith.constant 0 : index
    %44 = vector.load %arg6[%c52, %c0_42] : memref<224x128xbf16, #tpu.memory_space<vmem>>, vector<128x128xbf16>
    %c0_43 = arith.constant 0 : index
    %c5 = arith.constant 5 : index
    %c0_44 = arith.constant 0 : index
    %c0_45 = arith.constant 0 : index
    %45 = vector.load %arg3[%c0_43, %c5, %c0_44, %c0_45] : memref<4x7x128x128xbf16, #tpu.memory_space<vmem>>, vector<1x1x128x128xbf16>
    %46 = vector.shape_cast %45 : vector<1x1x128x128xbf16> to vector<128x128xbf16>
    %cst_46 = arith.constant dense<0.000000e+00> : vector<128x128xf32>
    %47 = tpu.matmul %44, %46, %cst_46 {dimension_numbers = #tpu.dot_dimension_numbers<[1], [0], [0], [1], [0, 0, 1, 1], [], []>} : vector<128x128xbf16>, vector<128x128xbf16>, vector<128x128xf32> -> vector<128x128xf32>
    %48 = arith.addf %43, %47 : vector<128x128xf32>
    %c54 = arith.constant 54 : index
    %c0_47 = arith.constant 0 : index
    %49 = vector.load %arg6[%c54, %c0_47] : memref<224x128xbf16, #tpu.memory_space<vmem>>, vector<128x128xbf16>
    %c0_48 = arith.constant 0 : index
    %c6 = arith.constant 6 : index
    %c0_49 = arith.constant 0 : index
    %c0_50 = arith.constant 0 : index
    %50 = vector.load %arg3[%c0_48, %c6, %c0_49, %c0_50] : memref<4x7x128x128xbf16, #tpu.memory_space<vmem>>, vector<1x1x128x128xbf16>
    %51 = vector.shape_cast %50 : vector<1x1x128x128xbf16> to vector<128x128xbf16>
    %cst_51 = arith.constant dense<0.000000e+00> : vector<128x128xf32>
    %52 = tpu.matmul %49, %51, %cst_51 {dimension_numbers = #tpu.dot_dimension_numbers<[1], [0], [0], [1], [0, 0, 1, 1], [], []>} : vector<128x128xbf16>, vector<128x128xbf16>, vector<128x128xf32> -> vector<128x128xf32>
    %53 = arith.addf %48, %52 : vector<128x128xf32>
    %c1_52 = arith.constant 1 : index
    %c0_53 = arith.constant 0 : index
    %c0_54 = arith.constant 0 : index
    %54 = vector.load %arg4[%c1_52, %c0_53, %c0_54] : memref<5x1x128xf32, #tpu.memory_space<vmem>>, vector<1x1x128xf32>
    %55 = vector.shape_cast %54 : vector<1x1x128xf32> to vector<1x128xf32>
    %56 = vector.broadcast %55 : vector<1x128xf32> to vector<128x128xf32>
    %57 = arith.addf %53, %56 : vector<128x128xf32>
    %cst_55 = arith.constant 0.000000e+00 : f32
    %58 = vector.broadcast %cst_55 : f32 to vector<128x128xf32>
    %59 = arith.cmpf ogt, %57, %58 : vector<128x128xf32>
    %cst_56 = arith.constant 2.000000e-01 : f32
    %60 = vector.broadcast %cst_56 : f32 to vector<128x128xf32>
    %61 = arith.mulf %60, %57 : vector<128x128xf32>
    %62 = arith.select %59, %57, %61 : vector<128x128xi1>, vector<128x128xf32>
    %63 = arith.truncf %62 : vector<128x128xf32> to vector<128x128xbf16>
    %c48_57 = arith.constant 48 : index
    %c0_58 = arith.constant 0 : index
    %64 = vector.load %arg6[%c48_57, %c0_58] : memref<224x128xbf16, #tpu.memory_space<vmem>>, vector<128x128xbf16>
    tpu.vector_store %arg6[%c48_57, %c0_58], %63 {strides = array<i32>} : memref<224x128xbf16, #tpu.memory_space<vmem>>, vector<128x128xbf16>,
    %cst_59 = arith.constant 0.000000e+00 : f32
    %65 = vector.broadcast %cst_59 : f32 to vector<128x128xf32>
    %c36 = arith.constant 36 : index
    %c0_60 = arith.constant 0 : index
    %66 = vector.load %arg6[%c36, %c0_60] : memref<224x128xbf16, #tpu.memory_space<vmem>>, vector<128x128xbf16>
    %c1_61 = arith.constant 1 : index
    %c0_62 = arith.constant 0 : index
    %c0_63 = arith.constant 0 : index
    %c0_64 = arith.constant 0 : index
    %67 = vector.load %arg3[%c1_61, %c0_62, %c0_63, %c0_64] : memref<4x7x128x128xbf16, #tpu.memory_space<vmem>>, vector<1x1x128x128xbf16>
    %68 = vector.shape_cast %67 : vector<1x1x128x128xbf16> to vector<128x128xbf16>
    %cst_65 = arith.constant dense<0.000000e+00> : vector<128x128xf32>
    %69 = tpu.matmul %66, %68, %cst_65 {dimension_numbers = #tpu.dot_dimension_numbers<[1], [0], [0], [1], [0, 0, 1, 1], [], []>} : vector<128x128xbf16>, vector<128x128xbf16>, vector<128x128xf32> -> vector<128x128xf32>
    %70 = arith.addf %65, %69 : vector<128x128xf32>
    %c40 = arith.constant 40 : index
    %c0_66 = arith.constant 0 : index
    %71 = vector.load %arg6[%c40, %c0_66] : memref<224x128xbf16, #tpu.memory_space<vmem>>, vector<128x128xbf16>
    %c1_67 = arith.constant 1 : index
    %c1_68 = arith.constant 1 : index
    %c0_69 = arith.constant 0 : index
    %c0_70 = arith.constant 0 : index
    %72 = vector.load %arg3[%c1_67, %c1_68, %c0_69, %c0_70] : memref<4x7x128x128xbf16, #tpu.memory_space<vmem>>, vector<1x1x128x128xbf16>
    %73 = vector.shape_cast %72 : vector<1x1x128x128xbf16> to vector<128x128xbf16>
    %cst_71 = arith.constant dense<0.000000e+00> : vector<128x128xf32>
    %74 = tpu.matmul %71, %73, %cst_71 {dimension_numbers = #tpu.dot_dimension_numbers<[1], [0], [0], [1], [0, 0, 1, 1], [], []>} : vector<128x128xbf16>, vector<128x128xbf16>, vector<128x128xf32> -> vector<128x128xf32>
    %75 = arith.addf %70, %74 : vector<128x128xf32>
    %c44_72 = arith.constant 44 : index
    %c0_73 = arith.constant 0 : index
    %76 = vector.load %arg6[%c44_72, %c0_73] : memref<224x128xbf16, #tpu.memory_space<vmem>>, vector<128x128xbf16>
    %c1_74 = arith.constant 1 : index
    %c2_75 = arith.constant 2 : index
    %c0_76 = arith.constant 0 : index
    %c0_77 = arith.constant 0 : index
    %77 = vector.load %arg3[%c1_74, %c2_75, %c0_76, %c0_77] : memref<4x7x128x128xbf16, #tpu.memory_space<vmem>>, vector<1x1x128x128xbf16>
    %78 = vector.shape_cast %77 : vector<1x1x128x128xbf16> to vector<128x128xbf16>
    %cst_78 = arith.constant dense<0.000000e+00> : vector<128x128xf32>
    %79 = tpu.matmul %76, %78, %cst_78 {dimension_numbers = #tpu.dot_dimension_numbers<[1], [0], [0], [1], [0, 0, 1, 1], [], []>} : vector<128x128xbf16>, vector<128x128xbf16>, vector<128x128xf32> -> vector<128x128xf32>
    %80 = arith.addf %75, %79 : vector<128x128xf32>
    %c48_79 = arith.constant 48 : index
    %c0_80 = arith.constant 0 : index
    %81 = vector.load %arg6[%c48_79, %c0_80] : memref<224x128xbf16, #tpu.memory_space<vmem>>, vector<128x128xbf16>
    %c1_81 = arith.constant 1 : index
    %c3_82 = arith.constant 3 : index
    %c0_83 = arith.constant 0 : index
    %c0_84 = arith.constant 0 : index
    %82 = vector.load %arg3[%c1_81, %c3_82, %c0_83, %c0_84] : memref<4x7x128x128xbf16, #tpu.memory_space<vmem>>, vector<1x1x128x128xbf16>
    %83 = vector.shape_cast %82 : vector<1x1x128x128xbf16> to vector<128x128xbf16>
    %cst_85 = arith.constant dense<0.000000e+00> : vector<128x128xf32>
    %84 = tpu.matmul %81, %83, %cst_85 {dimension_numbers = #tpu.dot_dimension_numbers<[1], [0], [0], [1], [0, 0, 1, 1], [], []>} : vector<128x128xbf16>, vector<128x128xbf16>, vector<128x128xf32> -> vector<128x128xf32>
    %85 = arith.addf %80, %84 : vector<128x128xf32>
    %c52_86 = arith.constant 52 : index
    %c0_87 = arith.constant 0 : index
    %86 = vector.load %arg6[%c52_86, %c0_87] : memref<224x128xbf16, #tpu.memory_space<vmem>>, vector<128x128xbf16>
    %c1_88 = arith.constant 1 : index
    %c4_89 = arith.constant 4 : index
    %c0_90 = arith.constant 0 : index
    %c0_91 = arith.constant 0 : index
    %87 = vector.load %arg3[%c1_88, %c4_89, %c0_90, %c0_91] : memref<4x7x128x128xbf16, #tpu.memory_space<vmem>>, vector<1x1x128x128xbf16>
    %88 = vector.shape_cast %87 : vector<1x1x128x128xbf16> to vector<128x128xbf16>
    %cst_92 = arith.constant dense<0.000000e+00> : vector<128x128xf32>
    %89 = tpu.matmul %86, %88, %cst_92 {dimension_numbers = #tpu.dot_dimension_numbers<[1], [0], [0], [1], [0, 0, 1, 1], [], []>} : vector<128x128xbf16>, vector<128x128xbf16>, vector<128x128xf32> -> vector<128x128xf32>
    %90 = arith.addf %85, %89 : vector<128x128xf32>
    %c56 = arith.constant 56 : index
    %c0_93 = arith.constant 0 : index
    %91 = vector.load %arg6[%c56, %c0_93] : memref<224x128xbf16, #tpu.memory_space<vmem>>, vector<128x128xbf16>
    %c1_94 = arith.constant 1 : index
    %c5_95 = arith.constant 5 : index
    %c0_96 = arith.constant 0 : index
    %c0_97 = arith.constant 0 : index
    %92 = vector.load %arg3[%c1_94, %c5_95, %c0_96, %c0_97] : memref<4x7x128x128xbf16, #tpu.memory_space<vmem>>, vector<1x1x128x128xbf16>
    %93 = vector.shape_cast %92 : vector<1x1x128x128xbf16> to vector<128x128xbf16>
    %cst_98 = arith.constant dense<0.000000e+00> : vector<128x128xf32>
    %94 = tpu.matmul %91, %93, %cst_98 {dimension_numbers = #tpu.dot_dimension_numbers<[1], [0], [0], [1], [0, 0, 1, 1], [], []>} : vector<128x128xbf16>, vector<128x128xbf16>, vector<128x128xf32> -> vector<128x128xf32>
    %95 = arith.addf %90, %94 : vector<128x128xf32>
    %c60 = arith.constant 60 : index
    %c0_99 = arith.constant 0 : index
    %96 = vector.load %arg6[%c60, %c0_99] : memref<224x128xbf16, #tpu.memory_space<vmem>>, vector<128x128xbf16>
    %c1_100 = arith.constant 1 : index
    %c6_101 = arith.constant 6 : index
    %c0_102 = arith.constant 0 : index
    %c0_103 = arith.constant 0 : index
    %97 = vector.load %arg3[%c1_100, %c6_101, %c0_102, %c0_103] : memref<4x7x128x128xbf16, #tpu.memory_space<vmem>>, vector<1x1x128x128xbf16>
    %98 = vector.shape_cast %97 : vector<1x1x128x128xbf16> to vector<128x128xbf16>
    %cst_104 = arith.constant dense<0.000000e+00> : vector<128x128xf32>
    %99 = tpu.matmul %96, %98, %cst_104 {dimension_numbers = #tpu.dot_dimension_numbers<[1], [0], [0], [1], [0, 0, 1, 1], [], []>} : vector<128x128xbf16>, vector<128x128xbf16>, vector<128x128xf32> -> vector<128x128xf32>
    %100 = arith.addf %95, %99 : vector<128x128xf32>
    %c2_105 = arith.constant 2 : index
    %c0_106 = arith.constant 0 : index
    %c0_107 = arith.constant 0 : index
    %101 = vector.load %arg4[%c2_105, %c0_106, %c0_107] : memref<5x1x128xf32, #tpu.memory_space<vmem>>, vector<1x1x128xf32>
    %102 = vector.shape_cast %101 : vector<1x1x128xf32> to vector<1x128xf32>
    %103 = vector.broadcast %102 : vector<1x128xf32> to vector<128x128xf32>
    %104 = arith.addf %100, %103 : vector<128x128xf32>
    %cst_108 = arith.constant 0.000000e+00 : f32
    %105 = vector.broadcast %cst_108 : f32 to vector<128x128xf32>
    %106 = arith.cmpf ogt, %104, %105 : vector<128x128xf32>
    %cst_109 = arith.constant 2.000000e-01 : f32
    %107 = vector.broadcast %cst_109 : f32 to vector<128x128xf32>
    %108 = arith.mulf %107, %104 : vector<128x128xf32>
    %109 = arith.select %106, %104, %108 : vector<128x128xi1>, vector<128x128xf32>
    %110 = arith.truncf %109 : vector<128x128xf32> to vector<128x128xbf16>
    %c48_110 = arith.constant 48 : index
    %c0_111 = arith.constant 0 : index
    %111 = vector.load %arg6[%c48_110, %c0_111] : memref<224x128xbf16, #tpu.memory_space<vmem>>, vector<128x128xbf16>
    tpu.vector_store %arg6[%c48_110, %c0_111], %110 {strides = array<i32>} : memref<224x128xbf16, #tpu.memory_space<vmem>>, vector<128x128xbf16>,
    %cst_112 = arith.constant 0.000000e+00 : f32
    %112 = vector.broadcast %cst_112 : f32 to vector<128x128xf32>
    %c24 = arith.constant 24 : index
    %c0_113 = arith.constant 0 : index
    %113 = vector.load %arg6[%c24, %c0_113] : memref<224x128xbf16, #tpu.memory_space<vmem>>, vector<128x128xbf16>
    %c2_114 = arith.constant 2 : index
    %c0_115 = arith.constant 0 : index
    %c0_116 = arith.constant 0 : index
    %c0_117 = arith.constant 0 : index
    %114 = vector.load %arg3[%c2_114, %c0_115, %c0_116, %c0_117] : memref<4x7x128x128xbf16, #tpu.memory_space<vmem>>, vector<1x1x128x128xbf16>
    %115 = vector.shape_cast %114 : vector<1x1x128x128xbf16> to vector<128x128xbf16>
    %cst_118 = arith.constant dense<0.000000e+00> : vector<128x128xf32>
    %116 = tpu.matmul %113, %115, %cst_118 {dimension_numbers = #tpu.dot_dimension_numbers<[1], [0], [0], [1], [0, 0, 1, 1], [], []>} : vector<128x128xbf16>, vector<128x128xbf16>, vector<128x128xf32> -> vector<128x128xf32>
    %117 = arith.addf %112, %116 : vector<128x128xf32>
    %c32 = arith.constant 32 : index
    %c0_119 = arith.constant 0 : index
    %118 = vector.load %arg6[%c32, %c0_119] : memref<224x128xbf16, #tpu.memory_space<vmem>>, vector<128x128xbf16>
    %c2_120 = arith.constant 2 : index
    %c1_121 = arith.constant 1 : index
    %c0_122 = arith.constant 0 : index
    %c0_123 = arith.constant 0 : index
    %119 = vector.load %arg3[%c2_120, %c1_121, %c0_122, %c0_123] : memref<4x7x128x128xbf16, #tpu.memory_space<vmem>>, vector<1x1x128x128xbf16>
    %120 = vector.shape_cast %119 : vector<1x1x128x128xbf16> to vector<128x128xbf16>
    %cst_124 = arith.constant dense<0.000000e+00> : vector<128x128xf32>
    %121 = tpu.matmul %118, %120, %cst_124 {dimension_numbers = #tpu.dot_dimension_numbers<[1], [0], [0], [1], [0, 0, 1, 1], [], []>} : vector<128x128xbf16>, vector<128x128xbf16>, vector<128x128xf32> -> vector<128x128xf32>
    %122 = arith.addf %117, %121 : vector<128x128xf32>
    %c40_125 = arith.constant 40 : index
    %c0_126 = arith.constant 0 : index
    %123 = vector.load %arg6[%c40_125, %c0_126] : memref<224x128xbf16, #tpu.memory_space<vmem>>, vector<128x128xbf16>
    %c2_127 = arith.constant 2 : index
    %c2_128 = arith.constant 2 : index
    %c0_129 = arith.constant 0 : index
    %c0_130 = arith.constant 0 : index
    %124 = vector.load %arg3[%c2_127, %c2_128, %c0_129, %c0_130] : memref<4x7x128x128xbf16, #tpu.memory_space<vmem>>, vector<1x1x128x128xbf16>
    %125 = vector.shape_cast %124 : vector<1x1x128x128xbf16> to vector<128x128xbf16>
    %cst_131 = arith.constant dense<0.000000e+00> : vector<128x128xf32>
    %126 = tpu.matmul %123, %125, %cst_131 {dimension_numbers = #tpu.dot_dimension_numbers<[1], [0], [0], [1], [0, 0, 1, 1], [], []>} : vector<128x128xbf16>, vector<128x128xbf16>, vector<128x128xf32> -> vector<128x128xf32>
    %127 = arith.addf %122, %126 : vector<128x128xf32>
    %c48_132 = arith.constant 48 : index
    %c0_133 = arith.constant 0 : index
    %128 = vector.load %arg6[%c48_132, %c0_133] : memref<224x128xbf16, #tpu.memory_space<vmem>>, vector<128x128xbf16>
    %c2_134 = arith.constant 2 : index
    %c3_135 = arith.constant 3 : index
    %c0_136 = arith.constant 0 : index
    %c0_137 = arith.constant 0 : index
    %129 = vector.load %arg3[%c2_134, %c3_135, %c0_136, %c0_137] : memref<4x7x128x128xbf16, #tpu.memory_space<vmem>>, vector<1x1x128x128xbf16>
    %130 = vector.shape_cast %129 : vector<1x1x128x128xbf16> to vector<128x128xbf16>
    %cst_138 = arith.constant dense<0.000000e+00> : vector<128x128xf32>
    %131 = tpu.matmul %128, %130, %cst_138 {dimension_numbers = #tpu.dot_dimension_numbers<[1], [0], [0], [1], [0, 0, 1, 1], [], []>} : vector<128x128xbf16>, vector<128x128xbf16>, vector<128x128xf32> -> vector<128x128xf32>
    %132 = arith.addf %127, %131 : vector<128x128xf32>
    %c56_139 = arith.constant 56 : index
    %c0_140 = arith.constant 0 : index
    %133 = vector.load %arg6[%c56_139, %c0_140] : memref<224x128xbf16, #tpu.memory_space<vmem>>, vector<128x128xbf16>
    %c2_141 = arith.constant 2 : index
    %c4_142 = arith.constant 4 : index
    %c0_143 = arith.constant 0 : index
    %c0_144 = arith.constant 0 : index
    %134 = vector.load %arg3[%c2_141, %c4_142, %c0_143, %c0_144] : memref<4x7x128x128xbf16, #tpu.memory_space<vmem>>, vector<1x1x128x128xbf16>
    %135 = vector.shape_cast %134 : vector<1x1x128x128xbf16> to vector<128x128xbf16>
    %cst_145 = arith.constant dense<0.000000e+00> : vector<128x128xf32>
    %136 = tpu.matmul %133, %135, %cst_145 {dimension_numbers = #tpu.dot_dimension_numbers<[1], [0], [0], [1], [0, 0, 1, 1], [], []>} : vector<128x128xbf16>, vector<128x128xbf16>, vector<128x128xf32> -> vector<128x128xf32>
    %137 = arith.addf %132, %136 : vector<128x128xf32>
    %c64 = arith.constant 64 : index
    %c0_146 = arith.constant 0 : index
    %138 = vector.load %arg6[%c64, %c0_146] : memref<224x128xbf16, #tpu.memory_space<vmem>>, vector<128x128xbf16>
    %c2_147 = arith.constant 2 : index
    %c5_148 = arith.constant 5 : index
    %c0_149 = arith.constant 0 : index
    %c0_150 = arith.constant 0 : index
    %139 = vector.load %arg3[%c2_147, %c5_148, %c0_149, %c0_150] : memref<4x7x128x128xbf16, #tpu.memory_space<vmem>>, vector<1x1x128x128xbf16>
    %140 = vector.shape_cast %139 : vector<1x1x128x128xbf16> to vector<128x128xbf16>
    %cst_151 = arith.constant dense<0.000000e+00> : vector<128x128xf32>
    %141 = tpu.matmul %138, %140, %cst_151 {dimension_numbers = #tpu.dot_dimension_numbers<[1], [0], [0], [1], [0, 0, 1, 1], [], []>} : vector<128x128xbf16>, vector<128x128xbf16>, vector<128x128xf32> -> vector<128x128xf32>
    %142 = arith.addf %137, %141 : vector<128x128xf32>
    %c72 = arith.constant 72 : index
    %c0_152 = arith.constant 0 : index
    %143 = vector.load %arg6[%c72, %c0_152] : memref<224x128xbf16, #tpu.memory_space<vmem>>, vector<128x128xbf16>
    %c2_153 = arith.constant 2 : index
    %c6_154 = arith.constant 6 : index
    %c0_155 = arith.constant 0 : index
    %c0_156 = arith.constant 0 : index
    %144 = vector.load %arg3[%c2_153, %c6_154, %c0_155, %c0_156] : memref<4x7x128x128xbf16, #tpu.memory_space<vmem>>, vector<1x1x128x128xbf16>
    %145 = vector.shape_cast %144 : vector<1x1x128x128xbf16> to vector<128x128xbf16>
    %cst_157 = arith.constant dense<0.000000e+00> : vector<128x128xf32>
    %146 = tpu.matmul %143, %145, %cst_157 {dimension_numbers = #tpu.dot_dimension_numbers<[1], [0], [0], [1], [0, 0, 1, 1], [], []>} : vector<128x128xbf16>, vector<128x128xbf16>, vector<128x128xf32> -> vector<128x128xf32>
    %147 = arith.addf %142, %146 : vector<128x128xf32>
    %c3_158 = arith.constant 3 : index
    %c0_159 = arith.constant 0 : index
    %c0_160 = arith.constant 0 : index
    %148 = vector.load %arg4[%c3_158, %c0_159, %c0_160] : memref<5x1x128xf32, #tpu.memory_space<vmem>>, vector<1x1x128xf32>
    %149 = vector.shape_cast %148 : vector<1x1x128xf32> to vector<1x128xf32>
    %150 = vector.broadcast %149 : vector<1x128xf32> to vector<128x128xf32>
    %151 = arith.addf %147, %150 : vector<128x128xf32>
    %cst_161 = arith.constant 0.000000e+00 : f32
    %152 = vector.broadcast %cst_161 : f32 to vector<128x128xf32>
    %153 = arith.cmpf ogt, %151, %152 : vector<128x128xf32>
    %cst_162 = arith.constant 2.000000e-01 : f32
    %154 = vector.broadcast %cst_162 : f32 to vector<128x128xf32>
    %155 = arith.mulf %154, %151 : vector<128x128xf32>
    %156 = arith.select %153, %151, %155 : vector<128x128xi1>, vector<128x128xf32>
    %157 = arith.truncf %156 : vector<128x128xf32> to vector<128x128xbf16>
    %c48_163 = arith.constant 48 : index
    %c0_164 = arith.constant 0 : index
    %158 = vector.load %arg6[%c48_163, %c0_164] : memref<224x128xbf16, #tpu.memory_space<vmem>>, vector<128x128xbf16>
    tpu.vector_store %arg6[%c48_163, %c0_164], %157 {strides = array<i32>} : memref<224x128xbf16, #tpu.memory_space<vmem>>, vector<128x128xbf16>,
    %cst_165 = arith.constant 0.000000e+00 : f32
    %159 = vector.broadcast %cst_165 : f32 to vector<4x128xf32>
    %c0_166 = arith.constant 0 : index
    %c0_167 = arith.constant 0 : index
    %160 = vector.load %arg6[%c0_166, %c0_167] : memref<224x128xbf16, #tpu.memory_space<vmem>>, vector<1x128xbf16>
    %c32_168 = arith.constant 32 : index
    %c0_169 = arith.constant 0 : index
    %161 = vector.load %arg6[%c32_168, %c0_169] : memref<224x128xbf16, #tpu.memory_space<vmem>>, vector<1x128xbf16>
    %c64_170 = arith.constant 64 : index
    %c0_171 = arith.constant 0 : index
    %162 = vector.load %arg6[%c64_170, %c0_171] : memref<224x128xbf16, #tpu.memory_space<vmem>>, vector<1x128xbf16>
    %c96 = arith.constant 96 : index
    %c0_172 = arith.constant 0 : index
    %163 = vector.load %arg6[%c96, %c0_172] : memref<224x128xbf16, #tpu.memory_space<vmem>>, vector<1x128xbf16>
    %164 = tpu.concatenate %160, %161, %162, %163 in 0 : vector<1x128xbf16>, vector<1x128xbf16>, vector<1x128xbf16>, vector<1x128xbf16> -> vector<4x128xbf16>
    %c3_173 = arith.constant 3 : index
    %c0_174 = arith.constant 0 : index
    %c0_175 = arith.constant 0 : index
    %c0_176 = arith.constant 0 : index
    %165 = vector.load %arg3[%c3_173, %c0_174, %c0_175, %c0_176] : memref<4x7x128x128xbf16, #tpu.memory_space<vmem>>, vector<1x1x128x128xbf16>
    %166 = vector.shape_cast %165 : vector<1x1x128x128xbf16> to vector<128x128xbf16>
    %cst_177 = arith.constant dense<0.000000e+00> : vector<4x128xf32>
    %167 = tpu.matmul %164, %166, %cst_177 {dimension_numbers = #tpu.dot_dimension_numbers<[1], [0], [0], [1], [0, 0, 1, 1], [], []>} : vector<4x128xbf16>, vector<128x128xbf16>, vector<4x128xf32> -> vector<4x128xf32>
    %168 = arith.addf %159, %167 : vector<4x128xf32>
    %c16 = arith.constant 16 : index
    %c0_178 = arith.constant 0 : index
    %169 = vector.load %arg6[%c16, %c0_178] : memref<224x128xbf16, #tpu.memory_space<vmem>>, vector<1x128xbf16>
    %c48_179 = arith.constant 48 : index
    %c0_180 = arith.constant 0 : index
    %170 = vector.load %arg6[%c48_179, %c0_180] : memref<224x128xbf16, #tpu.memory_space<vmem>>, vector<1x128xbf16>
    %c80 = arith.constant 80 : index
    %c0_181 = arith.constant 0 : index
    %171 = vector.load %arg6[%c80, %c0_181] : memref<224x128xbf16, #tpu.memory_space<vmem>>, vector<1x128xbf16>
    %c112 = arith.constant 112 : index
    %c0_182 = arith.constant 0 : index
    %172 = vector.load %arg6[%c112, %c0_182] : memref<224x128xbf16, #tpu.memory_space<vmem>>, vector<1x128xbf16>
    %173 = tpu.concatenate %169, %170, %171, %172 in 0 : vector<1x128xbf16>, vector<1x128xbf16>, vector<1x128xbf16>, vector<1x128xbf16> -> vector<4x128xbf16>
    %c3_183 = arith.constant 3 : index
    %c1_184 = arith.constant 1 : index
    %c0_185 = arith.constant 0 : index
    %c0_186 = arith.constant 0 : index
    %174 = vector.load %arg3[%c3_183, %c1_184, %c0_185, %c0_186] : memref<4x7x128x128xbf16, #tpu.memory_space<vmem>>, vector<1x1x128x128xbf16>
    %175 = vector.shape_cast %174 : vector<1x1x128x128xbf16> to vector<128x128xbf16>
    %cst_187 = arith.constant dense<0.000000e+00> : vector<4x128xf32>
    %176 = tpu.matmul %173, %175, %cst_187 {dimension_numbers = #tpu.dot_dimension_numbers<[1], [0], [0], [1], [0, 0, 1, 1], [], []>} : vector<4x128xbf16>, vector<128x128xbf16>, vector<4x128xf32> -> vector<4x128xf32>
    %177 = arith.addf %168, %176 : vector<4x128xf32>
    %c32_188 = arith.constant 32 : index
    %c0_189 = arith.constant 0 : index
    %178 = vector.load %arg6[%c32_188, %c0_189] : memref<224x128xbf16, #tpu.memory_space<vmem>>, vector<1x128xbf16>
    %c64_190 = arith.constant 64 : index
    %c0_191 = arith.constant 0 : index
    %179 = vector.load %arg6[%c64_190, %c0_191] : memref<224x128xbf16, #tpu.memory_space<vmem>>, vector<1x128xbf16>
    %c96_192 = arith.constant 96 : index
    %c0_193 = arith.constant 0 : index
    %180 = vector.load %arg6[%c96_192, %c0_193] : memref<224x128xbf16, #tpu.memory_space<vmem>>, vector<1x128xbf16>
    %c128 = arith.constant 128 : index
    %c0_194 = arith.constant 0 : index
    %181 = vector.load %arg6[%c128, %c0_194] : memref<224x128xbf16, #tpu.memory_space<vmem>>, vector<1x128xbf16>
    %182 = tpu.concatenate %178, %179, %180, %181 in 0 : vector<1x128xbf16>, vector<1x128xbf16>, vector<1x128xbf16>, vector<1x128xbf16> -> vector<4x128xbf16>
    %c3_195 = arith.constant 3 : index
    %c2_196 = arith.constant 2 : index
    %c0_197 = arith.constant 0 : index
    %c0_198 = arith.constant 0 : index
    %183 = vector.load %arg3[%c3_195, %c2_196, %c0_197, %c0_198] : memref<4x7x128x128xbf16, #tpu.memory_space<vmem>>, vector<1x1x128x128xbf16>
    %184 = vector.shape_cast %183 : vector<1x1x128x128xbf16> to vector<128x128xbf16>
    %cst_199 = arith.constant dense<0.000000e+00> : vector<4x128xf32>
    %185 = tpu.matmul %182, %184, %cst_199 {dimension_numbers = #tpu.dot_dimension_numbers<[1], [0], [0], [1], [0, 0, 1, 1], [], []>} : vector<4x128xbf16>, vector<128x128xbf16>, vector<4x128xf32> -> vector<4x128xf32>
    %186 = arith.addf %177, %185 : vector<4x128xf32>
    %c48_200 = arith.constant 48 : index
    %c0_201 = arith.constant 0 : index
    %187 = vector.load %arg6[%c48_200, %c0_201] : memref<224x128xbf16, #tpu.memory_space<vmem>>, vector<1x128xbf16>
    %c80_202 = arith.constant 80 : index
    %c0_203 = arith.constant 0 : index
    %188 = vector.load %arg6[%c80_202, %c0_203] : memref<224x128xbf16, #tpu.memory_space<vmem>>, vector<1x128xbf16>
    %c112_204 = arith.constant 112 : index
    %c0_205 = arith.constant 0 : index
    %189 = vector.load %arg6[%c112_204, %c0_205] : memref<224x128xbf16, #tpu.memory_space<vmem>>, vector<1x128xbf16>
    %c144 = arith.constant 144 : index
    %c0_206 = arith.constant 0 : index
    %190 = vector.load %arg6[%c144, %c0_206] : memref<224x128xbf16, #tpu.memory_space<vmem>>, vector<1x128xbf16>
    %191 = tpu.concatenate %187, %188, %189, %190 in 0 : vector<1x128xbf16>, vector<1x128xbf16>, vector<1x128xbf16>, vector<1x128xbf16> -> vector<4x128xbf16>
    %c3_207 = arith.constant 3 : index
    %c3_208 = arith.constant 3 : index
    %c0_209 = arith.constant 0 : index
    %c0_210 = arith.constant 0 : index
    %192 = vector.load %arg3[%c3_207, %c3_208, %c0_209, %c0_210] : memref<4x7x128x128xbf16, #tpu.memory_space<vmem>>, vector<1x1x128x128xbf16>
    %193 = vector.shape_cast %192 : vector<1x1x128x128xbf16> to vector<128x128xbf16>
    %cst_211 = arith.constant dense<0.000000e+00> : vector<4x128xf32>
    %194 = tpu.matmul %191, %193, %cst_211 {dimension_numbers = #tpu.dot_dimension_numbers<[1], [0], [0], [1], [0, 0, 1, 1], [], []>} : vector<4x128xbf16>, vector<128x128xbf16>, vector<4x128xf32> -> vector<4x128xf32>
    %195 = arith.addf %186, %194 : vector<4x128xf32>
    %c64_212 = arith.constant 64 : index
    %c0_213 = arith.constant 0 : index
    %196 = vector.load %arg6[%c64_212, %c0_213] : memref<224x128xbf16, #tpu.memory_space<vmem>>, vector<1x128xbf16>
    %c96_214 = arith.constant 96 : index
    %c0_215 = arith.constant 0 : index
    %197 = vector.load %arg6[%c96_214, %c0_215] : memref<224x128xbf16, #tpu.memory_space<vmem>>, vector<1x128xbf16>
    %c128_216 = arith.constant 128 : index
    %c0_217 = arith.constant 0 : index
    %198 = vector.load %arg6[%c128_216, %c0_217] : memref<224x128xbf16, #tpu.memory_space<vmem>>, vector<1x128xbf16>
    %c160 = arith.constant 160 : index
    %c0_218 = arith.constant 0 : index
    %199 = vector.load %arg6[%c160, %c0_218] : memref<224x128xbf16, #tpu.memory_space<vmem>>, vector<1x128xbf16>
    %200 = tpu.concatenate %196, %197, %198, %199 in 0 : vector<1x128xbf16>, vector<1x128xbf16>, vector<1x128xbf16>, vector<1x128xbf16> -> vector<4x128xbf16>
    %c3_219 = arith.constant 3 : index
    %c4_220 = arith.constant 4 : index
    %c0_221 = arith.constant 0 : index
    %c0_222 = arith.constant 0 : index
    %201 = vector.load %arg3[%c3_219, %c4_220, %c0_221, %c0_222] : memref<4x7x128x128xbf16, #tpu.memory_space<vmem>>, vector<1x1x128x128xbf16>
    %202 = vector.shape_cast %201 : vector<1x1x128x128xbf16> to vector<128x128xbf16>
    %cst_223 = arith.constant dense<0.000000e+00> : vector<4x128xf32>
    %203 = tpu.matmul %200, %202, %cst_223 {dimension_numbers = #tpu.dot_dimension_numbers<[1], [0], [0], [1], [0, 0, 1, 1], [], []>} : vector<4x128xbf16>, vector<128x128xbf16>, vector<4x128xf32> -> vector<4x128xf32>
    %204 = arith.addf %195, %203 : vector<4x128xf32>
    %c80_224 = arith.constant 80 : index
    %c0_225 = arith.constant 0 : index
    %205 = vector.load %arg6[%c80_224, %c0_225] : memref<224x128xbf16, #tpu.memory_space<vmem>>, vector<1x128xbf16>
    %c112_226 = arith.constant 112 : index
    %c0_227 = arith.constant 0 : index
    %206 = vector.load %arg6[%c112_226, %c0_227] : memref<224x128xbf16, #tpu.memory_space<vmem>>, vector<1x128xbf16>
    %c144_228 = arith.constant 144 : index
    %c0_229 = arith.constant 0 : index
    %207 = vector.load %arg6[%c144_228, %c0_229] : memref<224x128xbf16, #tpu.memory_space<vmem>>, vector<1x128xbf16>
    %c176_230 = arith.constant 176 : index
    %c0_231 = arith.constant 0 : index
    %208 = vector.load %arg6[%c176_230, %c0_231] : memref<224x128xbf16, #tpu.memory_space<vmem>>, vector<1x128xbf16>
    %209 = tpu.concatenate %205, %206, %207, %208 in 0 : vector<1x128xbf16>, vector<1x128xbf16>, vector<1x128xbf16>, vector<1x128xbf16> -> vector<4x128xbf16>
    %c3_232 = arith.constant 3 : index
    %c5_233 = arith.constant 5 : index
    %c0_234 = arith.constant 0 : index
    %c0_235 = arith.constant 0 : index
    %210 = vector.load %arg3[%c3_232, %c5_233, %c0_234, %c0_235] : memref<4x7x128x128xbf16, #tpu.memory_space<vmem>>, vector<1x1x128x128xbf16>
    %211 = vector.shape_cast %210 : vector<1x1x128x128xbf16> to vector<128x128xbf16>
    %cst_236 = arith.constant dense<0.000000e+00> : vector<4x128xf32>
    %212 = tpu.matmul %209, %211, %cst_236 {dimension_numbers = #tpu.dot_dimension_numbers<[1], [0], [0], [1], [0, 0, 1, 1], [], []>} : vector<4x128xbf16>, vector<128x128xbf16>, vector<4x128xf32> -> vector<4x128xf32>
    %213 = arith.addf %204, %212 : vector<4x128xf32>
    %c96_237 = arith.constant 96 : index
    %c0_238 = arith.constant 0 : index
    %214 = vector.load %arg6[%c96_237, %c0_238] : memref<224x128xbf16, #tpu.memory_space<vmem>>, vector<1x128xbf16>
    %c128_239 = arith.constant 128 : index
    %c0_240 = arith.constant 0 : index
    %215 = vector.load %arg6[%c128_239, %c0_240] : memref<224x128xbf16, #tpu.memory_space<vmem>>, vector<1x128xbf16>
    %c160_241 = arith.constant 160 : index
    %c0_242 = arith.constant 0 : index
    %216 = vector.load %arg6[%c160_241, %c0_242] : memref<224x128xbf16, #tpu.memory_space<vmem>>, vector<1x128xbf16>
    %c192 = arith.constant 192 : index
    %c0_243 = arith.constant 0 : index
    %217 = vector.load %arg6[%c192, %c0_243] : memref<224x128xbf16, #tpu.memory_space<vmem>>, vector<1x128xbf16>
    %218 = tpu.concatenate %214, %215, %216, %217 in 0 : vector<1x128xbf16>, vector<1x128xbf16>, vector<1x128xbf16>, vector<1x128xbf16> -> vector<4x128xbf16>
    %c3_244 = arith.constant 3 : index
    %c6_245 = arith.constant 6 : index
    %c0_246 = arith.constant 0 : index
    %c0_247 = arith.constant 0 : index
    %219 = vector.load %arg3[%c3_244, %c6_245, %c0_246, %c0_247] : memref<4x7x128x128xbf16, #tpu.memory_space<vmem>>, vector<1x1x128x128xbf16>
    %220 = vector.shape_cast %219 : vector<1x1x128x128xbf16> to vector<128x128xbf16>
    %cst_248 = arith.constant dense<0.000000e+00> : vector<4x128xf32>
    %221 = tpu.matmul %218, %220, %cst_248 {dimension_numbers = #tpu.dot_dimension_numbers<[1], [0], [0], [1], [0, 0, 1, 1], [], []>} : vector<4x128xbf16>, vector<128x128xbf16>, vector<4x128xf32> -> vector<4x128xf32>
    %222 = arith.addf %213, %221 : vector<4x128xf32>
    %c4_249 = arith.constant 4 : index
    %c0_250 = arith.constant 0 : index
    %c0_251 = arith.constant 0 : index
    %223 = vector.load %arg4[%c4_249, %c0_250, %c0_251] : memref<5x1x128xf32, #tpu.memory_space<vmem>>, vector<1x1x128xf32>
    %224 = vector.shape_cast %223 : vector<1x1x128xf32> to vector<1x128xf32>
    %225 = vector.broadcast %224 : vector<1x128xf32> to vector<4x128xf32>
    %226 = arith.addf %222, %225 : vector<4x128xf32>
    %cst_252 = arith.constant 0.000000e+00 : f32
    %227 = vector.broadcast %cst_252 : f32 to vector<4x128xf32>
    %228 = arith.subf %227, %226 : vector<4x128xf32>
    %229 = math.exp %228 : vector<4x128xf32>
    %cst_253 = arith.constant 1.000000e+00 : f32
    %230 = vector.broadcast %cst_253 : f32 to vector<4x128xf32>
    %231 = arith.addf %230, %229 : vector<4x128xf32>
    %232 = tpu.reciprocal %231 : vector<4x128xf32> -> vector<4x128xf32>
    %233 = vector.shape_cast %232 : vector<4x128xf32> to vector<1x4x128xf32>
    %c0_254 = arith.constant 0 : index
    %c0_255 = arith.constant 0 : index
    %c0_256 = arith.constant 0 : index
    %234 = vector.load %arg5[%c0_254, %c0_255, %c0_256] : memref<1x4x128xf32, #tpu.memory_space<vmem>>, vector<1x4x128xf32>
    tpu.vector_store %arg5[%c0_254, %c0_255, %c0_256], %233 {strides = array<i32>} : memref<1x4x128xf32, #tpu.memory_space<vmem>>, vector<1x4x128xf32>,
    return
  }
  func.func @transform_0(%arg0: i32) -> (i32, i32) {
    %c0_i32 = arith.constant 0 : i32
    %c0_i32_0 = arith.constant 0 : i32
    return %arg0, %c0_i32 : i32, i32
  }
  func.func @transform_1(%arg0: i32) -> (i32, i32) {
    %c0_i32 = arith.constant 0 : i32
    %c0_i32_0 = arith.constant 0 : i32
    %c0_i32_1 = arith.constant 0 : i32
    return %c0_i32, %c0_i32_0 : i32, i32
  }
  func.func @transform_2(%arg0: i32) -> (i32, i32, i32, i32) {
    %c0_i32 = arith.constant 0 : i32
    %c0_i32_0 = arith.constant 0 : i32
    %c0_i32_1 = arith.constant 0 : i32
    %c0_i32_2 = arith.constant 0 : i32
    %c0_i32_3 = arith.constant 0 : i32
    return %c0_i32, %c0_i32_0, %c0_i32_1, %c0_i32_2 : i32, i32, i32, i32
  }
  func.func @transform_3(%arg0: i32) -> (i32, i32, i32) {
    %c0_i32 = arith.constant 0 : i32
    %c0_i32_0 = arith.constant 0 : i32
    %c0_i32_1 = arith.constant 0 : i32
    %c0_i32_2 = arith.constant 0 : i32
    return %c0_i32, %c0_i32_0, %c0_i32_1 : i32, i32, i32
  }
  func.func @transform_4(%arg0: i32) -> (i32, i32, i32) {
    %c0_i32 = arith.constant 0 : i32
    %c0_i32_0 = arith.constant 0 : i32
    %c0_i32_1 = arith.constant 0 : i32
    return %arg0, %c0_i32, %c0_i32_0 : i32, i32, i32
  }
}

</mosaic_0001>

<bundles_post_ra>
// kernel: discriminator_forward.1
= control target key start
LH: loop header
LB: loop body
LE: loop exit
PB: predicated region body
PF: predicated region fallthrough
CT: control target
= control target key end

     0   :  { %9 = vsyncpa [#allocation4], 0  ;;  %s8209_s0 = inlined_call_operand.vmem [shape: f32[256,8], index: 0, kind: input, shape index: {}]   ;;  %s8210_s1 = inlined_call_operand.vmem [shape: f32[8,128], index: 1, kind: input, shape index: {}]   ;;  %s8211_s2 = inlined_call_operand.hbm [shape: bf16[4,7,128,128], index: 2, kind: input, shape index: {}]   ;;  %s8212_s3 = inlined_call_operand.vmem [shape: f32[5,1,128], index: 3, kind: input, shape index: {}]   ;;  %s8213_s4 = inlined_call_operand.hbm [shape: f32[2,4,128], index: 4, kind: output, shape index: {}]  }
   0x1   :  { %10 = vsyncpa [#allocation5], 0 }
   0x2   :  { %12 = vsyncpa [#allocation5 + $0x1], 0  ;;  %s7540_s15 = smov 0   ;;  %s7542_s16 = smov 0  }
   0x3   :  { %s7544_s17 = smov 0   ;;  %s7546_s18 = smov 0  }
   0x4 LB: > { %s7561_s19 = sadd.s32 4294967295, %s7509_s18   ;;  %s5322_s20 = sadd.s32 4294967294, %s7509_s18   ;;  %s7509_s18 = sphi %s7546_s18, %s8223_s18   ;;  %s7505_s17 = sphi %s7544_s17, %s8222_s17   ;;  %s7501_s16 = sphi %s7542_s16, %s8221_s16   ;;  %s7497_s15 = sphi %s7540_s15, %s8220_s15  }
   0x5   : > { %s7565_s21 = sadd.s32 1, %s7509_s18   ;;  %s114_s22 = sadd.s32 1, %s7505_s17 }
   0x6   : > { %s111_s23 = ssub.s32 %s7509_s18, %s7565_s21  ;;  %p124_p0 = scmp.ne.s32.totalorder %s7505_s17, %s7501_s16 }
   0x7   : > { %p112_p1 = scmp.eq.s32.totalorder %s111_s23, 0  ;;  %p125_p2 = scmp.eq.s32.totalorder %s7561_s19, 1 }
   0x8   : > { %p130_p3 = scmp.ne.s32.totalorder %s7501_s16, %s7497_s15  ;;  %p131_p4 = scmp.eq.s32.totalorder %s5322_s20, 1 }
   0x9   : > { %s7576_s24 = scalar_select %p112_p1, %s7505_s17, %s114_s22  }
   0xa   : > { %p7578_p5 = por %p125_p2, %p124_p0  ;;  %p7582_p6 = por %p131_p4, %p130_p3 }
   0xb   : > { %p5323_p7 = scmp.ge.s32.totalorder %s7509_s18, 1  ;;  %p138_p8 = scmp.lt.s32.totalorder %s7509_s18, 3 }
   0xc   : > { %p7365_p9 = scmp.eq.s32.totalorder %s7561_s19, 0  ;;  %s152_s29 = sshll.u32 %s8211_s2, 4  ;;  %s153_s29 = int_to_ptr.hbm [resolvable:$true] %s152_s29 }
   0xd   : > { %p139_p10 = pnand %p5323_p7, %p138_p8  ;;  %s7511_s30 = smov [#allocation3]  }
   0xe   : > { %s154_s5 = sshll.u32 %s7511_s30, 4  ;;  %s7512_s6 = smov 64   ;;  %s155_s5 = int_to_ptr.vmem [resolvable:$true] %s154_s5 }
   0xf   : > { %p7357_p11 = pneg %p139_p10  ;;  %s7513_s7 = smov 4  }
  0x10   : > { %182 = sbr.rel (%p139_p10) target bundleno = 1382 (0x566), region = 36 }
  0x11   : > { %p7358_p12 = pnand %p7365_p9, %p7357_p11 }
  0x13   : > { %7360 = dma.hbm_to_vmem [thread:$0]  (!%p7358_p12), %s153_s29, 28672, %s155_s5, [#allocation4], %s7512_s6, %s7512_s6, %s7513_s7  }
  0x15   : > { %7488 = dma.done.wait (%p7365_p9), [#allocation4], 28672  }
  0x16   : > { %7490 = vsyncadd (%p7365_p9), [#allocation4], 4294938624  ;;  %s5329_s8 = sshll.u32 %s7561_s19, 4  ;;  %vm249_vm0 = vcmask 64512   ;;  %v244_v0 = vld [vmem:[%s8210_s1] sm:$0xff]  ;;  %v6502_v11 = vld [vmem:[#allocation3 + $0xf8] sm:$0xff] }
  0x17   : > { %p210_p13 = scmp.lt.s32.totalorder %s5329_s8, 31  ;;  %313 = vmatpush.msra.mxu0 %v244_v0  ;;  %v6501_v13 = vld [vmem:[#allocation3 + $0xf0] sm:$0xff]  ;;  %v6500_v14 = vld [vmem:[#allocation3 + $0xe8] sm:$0xff]  ;;  %v6499_v16 = vld [vmem:[#allocation3 + $0xe0] sm:$0xff]  ;;  %v7514_v22 = vmov 0   ;;  %vm538_vm5 = vcmask 1045504  }
  0x18   : > { %v6498_v17 = vld [vmem:[#allocation3 + $0xd8] sm:$0xff]  ;;  %v6497_v19 = vld [vmem:[#allocation3 + $0xd0] sm:$0xff]  ;;  %v6496_v20 = vld [vmem:[#allocation3 + $0xc8] sm:$0xff]  ;;  %221 = vst [vmem:[#allocation2 + $0x14] sm:$0xf] %v7514_v22  ;;  %vm667_vm6 = vcmask 1046528  }
  0x19   : > { %s8225_s8 = smov (!%p210_p13, %s5329_s8), 31  ;;  %1038 = vmatpush.bf16.msrb.mxu0 %v6502_v11  ;;  %v6486_v23 = vld [vmem:[#allocation3 + $0x78] sm:$0xff]  ;;  %v6495_v26 = vld [vmem:[#allocation3 + $0xc0] sm:$0xff]  ;;  %216 = vst [vmem:[#allocation2] sm:$0xf] %v7514_v22  ;;  %v6485_v27 = vld [vmem:[#allocation3 + $0x70] sm:$0xff] }
  0x1a   : > { %s5330_s9 = sshll.u32 %s8225_s8, 3  ;;  %v6478_v24 = vld [vmem:[#allocation3 + $0x38] sm:$0xff]  ;;  %612 = vmatpush.bf16.msra.mxu1 %v6486_v23  ;;  %218 = vst [vmem:[#allocation2 + $0x8] sm:$0xf] %v7514_v22  ;;  %v6477_v28 = vld [vmem:[#allocation3 + $0x30] sm:$0xff]  ;;  %v6484_v31 = vld [vmem:[#allocation3 + $0x68] sm:$0xff] }
  0x1b   : > { %s7602_s12 = scalar_lea.vmem %s8209_s0, %s5330_s9  ;;  %v6494_v25 = vld [vmem:[#allocation3 + $0xb8] sm:$0xff]  ;;  %741 = vmatpush.bf16.msra.mxu2 %v6478_v24  ;;  %v6493_v29 = vld [vmem:[#allocation3 + $0xb0] sm:$0xff]  ;;  %219 = vst [vmem:[#allocation2 + $0xc] sm:$0xf] %v7514_v22  ;;  %v6476_v32 = vld [vmem:[#allocation3 + $0x28] sm:$0xff]  ;;  %vm815_vm7 = vcmask 1044480  }
  0x1c   : > { %v228_v1 = vld [vmem:[%s7602_s12] sm:$0xff]  ;;  %v229_v2 = vld [vmem:[%s7602_s12 + $0x8] sm:$0xff]  ;;  %v230_v3 = vld [vmem:[%s7602_s12 + $0x10] sm:$0xff]  ;;  %889 = vmatpush.bf16.msra.mxu3 %v6494_v25  ;;  %220 = vst [vmem:[#allocation2 + $0x10] sm:$0xf] %v7514_v22  ;;  %s206_s8 = sand.u32 1, %s7501_s16  }
  0x1d   : > { %5331 = vmatmul.msk.f32.vlgmr.msra.gmra.mxu0 %vm249_vm0, %v228_v1  ;;  %v231_v4 = vld [vmem:[%s7602_s12 + $0x18] sm:$0xff]  ;;  %v232_v5 = vld [vmem:[%s7602_s12 + $0x20] sm:$0xff]  ;;  %v233_v6 = vld [vmem:[%s7602_s12 + $0x28] sm:$0xff]  ;;  %222 = vst [vmem:[#allocation2 + $0x58] sm:$0xf] %v7514_v22  ;;  %s5328_s9 = sshll.u32 %s206_s8, 2 }
  0x1e   : > { %v234_v7 = vld [vmem:[%s7602_s12 + $0x30] sm:$0xff]  ;;  %v235_v8 = vld [vmem:[%s7602_s12 + $0x38] sm:$0xff]  ;;  %v236_v9 = vld [vmem:[%s7602_s12 + $0x40] sm:$0xff]  ;;  %1039 = vmatpush.bf16.msrb.mxu0 %v6501_v13  ;;  %613 = vmatpush.bf16.msra.mxu1 %v6485_v27  ;;  %223 = vst [vmem:[#allocation2 + $0x5c] sm:$0xf] %v7514_v22  ;;  %s6468_s10 = sshll.u32 %s7561_s19, 2 }
  0x1f   : > { %v237_v10 = vld [vmem:[%s7602_s12 + $0x48] sm:$0xff]  ;;  %v238_v12 = vld [vmem:[%s7602_s12 + $0x50] sm:$0xff]  ;;  %v239_v15 = vld [vmem:[%s7602_s12 + $0x58] sm:$0xff]  ;;  %742 = vmatpush.bf16.msra.mxu2 %v6477_v28  ;;  %224 = vst [vmem:[#allocation2 + $0x60] sm:$0xf] %v7514_v22  ;;  %s5246_s13 = scalar_lea.hbm %s8213_s4, %s6468_s10  ;;  %s208_s14 = scalar_lea.vmem [#allocation6], %s5328_s9 }
  0x20   : > { %v240_v18 = vld [vmem:[%s7602_s12 + $0x60] sm:$0xff]  ;;  %v241_v21 = vld [vmem:[%s7602_s12 + $0x68] sm:$0xff]  ;;  %v242_v30 = vld [vmem:[%s7602_s12 + $0x70] sm:$0xff]  ;;  %890 = vmatpush.bf16.msra.mxu3 %v6493_v29  ;;  %s5248_s20 = sshll.u32 %s208_s14, 4  ;;  %s5250_s22 = sshll.u32 %s5246_s13, 4  ;;  %s5249_s20 = int_to_ptr.vmem [resolvable:$true] %s5248_s20  ;;  %s5251_s22 = int_to_ptr.hbm [resolvable:$true] %s5250_s22 }
  0x21   : > { %v6492_v33 = vld [vmem:[#allocation3 + $0xa8] sm:$0xff]  ;;  %v6483_v34 = vld [vmem:[#allocation3 + $0x60] sm:$0xff]  ;;  %v6482_v38 = vld [vmem:[#allocation3 + $0x58] sm:$0xff]  ;;  %s5236_s19 = scalar_lea.sflag [#allocation5], %s206_s8  ;;  %s7457_s23 = sshra.s32 %s5251_s22, 4  ;;  %s7458_s23 = int_to_ptr.hbm [resolvable:$true] %s7457_s23 }
  0x22   : > { %1040 = vmatpush.bf16.msrb.mxu0 %v6500_v14  ;;  %614 = vmatpush.bf16.msra.mxu1 %v6484_v31  ;;  %v6475_v35 = vld [vmem:[#allocation3 + $0x20] sm:$0xff]  ;;  %v243_v37 = vld [vmem:[%s7602_s12 + $0x78] sm:$0xff]  ;;  %v6474_v39 = vld [vmem:[#allocation3 + $0x18] sm:$0xff]  ;;  %s7459_s27 = scalar_lea.hbm %s7458_s23, 4  ;;  %s7463_s30 = scalar_lea.hbm %s8213_s4, 8 }
  0x23   : > { %743 = vmatpush.bf16.msra.mxu2 %v6476_v32  ;;  %v6491_v36 = vld [vmem:[#allocation3 + $0xa0] sm:$0xff]  ;;  %v6490_v40 = vld [vmem:[#allocation3 + $0x98] sm:$0xff]  ;;  %v6481_v41 = vld [vmem:[#allocation3 + $0x50] sm:$0xff]  ;;  %p7460_p0 = scmp.ne.s32.totalorder %s7458_s23, %s7459_s27  ;;  %p7464_p3 = scmp.lt.s32.totalorder %s7458_s23, %s8213_s4 }
  0x24   : > { %891 = vmatpush.bf16.msra.mxu3 %v6492_v33  ;;  %v6473_v42 = vld [vmem:[#allocation3 + $0x10] sm:$0xff]  ;;  %v6480_v46 = vld [vmem:[#allocation3 + $0x48] sm:$0xff]  ;;  %v6479_v50 = vld [vmem:[#allocation3 + $0x40] sm:$0xff]  ;;  %p7465_p4 = scmp.lt.s32.totalorder %s7463_s30, %s7459_s27 }
  0x25   : > { %5332 = vmatmul.msk.f32.gmra.mxu0 %vm249_vm0, %v229_v2  ;;  %v6489_v43 = vld [vmem:[#allocation3 + $0x90] sm:$0xff]  ;;  %v6472_v47 = vld [vmem:[#allocation3 + $0x8] sm:$0xff]  ;;  %v6471_v51 = vld [vmem:[#allocation3] sm:$0xff]  ;;  %p7461_p1 = pnand %p7460_p0, %p7578_p5 }
  0x26   : > { %1041 = vmatpush.bf16.msrb.mxu0 %v6499_v16  ;;  %615 = vmatpush.bf16.msra.mxu1 %v6483_v34  ;;  %v7642_v45 = vld [vmem:[%s8212_s3] ss:$0 sm:$0xff]  ;;  %v6488_v48 = vld [vmem:[#allocation3 + $0x88] sm:$0xff]  ;;  %v6487_v52 = vld [vmem:[#allocation3 + $0x80] sm:$0xff]  ;;  %p7466_p7 = por %p7465_p4, %p7464_p3 }
  0x27   : > { %744 = vmatpush.bf16.msra.mxu2 %v6475_v35  ;;  %v6525_v61 = vld [vmem:[#allocation3 + $0x178] sm:$0xff]  ;;  %p7462_p2 = pneg %p7461_p1 }
  0x28   : > { %892 = vmatpush.bf16.msra.mxu3 %v6491_v36  ;;  %v6533_v63 = vld [vmem:[#allocation3 + $0x1b8] sm:$0xff] }
  0x29   : > { %v6517_v0 = vld [vmem:[#allocation3 + $0x138] sm:$0xff]  ;;  %p7467_p8 = pnand %p7466_p7, %p7462_p2 }
  0x2a   : > { %1042 = vmatpush.bf16.msrb.mxu0 %v6498_v17  ;;  %616 = vmatpush.bf16.msra.mxu1 %v6482_v38 }
  0x2b   : > { %745 = vmatpush.bf16.msra.mxu2 %v6474_v39 }
  0x2c   : > { %893 = vmatpush.bf16.msra.mxu3 %v6490_v40 }
  0x2d   : > { %5333 = vmatmul.msk.f32.gmra.mxu0 %vm249_vm0, %v230_v3 }
  0x2e   : > { %1043 = vmatpush.bf16.msrb.mxu0 %v6497_v19  ;;  %617 = vmatpush.bf16.msra.mxu1 %v6481_v41  ;;  %v6523_v41 = vld [vmem:[#allocation3 + $0x168] sm:$0xff] }
  0x2f   : > { %746 = vmatpush.bf16.msra.mxu2 %v6473_v42 }
  0x30   : > { %894 = vmatpush.bf16.msra.mxu3 %v6489_v43  ;;  %v6531_v43 = vld [vmem:[#allocation3 + $0x1a8] sm:$0xff] }
  0x32   : > { %1044 = vmatpush.bf16.msrb.mxu0 %v6496_v20  ;;  %618 = vmatpush.bf16.msra.mxu1 %v6480_v46  ;;  %v6532_v20 = vld [vmem:[#allocation3 + $0x1b0] sm:$0xff] }
  0x33   : > { %747 = vmatpush.bf16.msra.mxu2 %v6472_v47 }
  0x34   : > { %895 = vmatpush.bf16.msra.mxu3 %v6488_v48 }
  0x35   : > { %5334 = vmatmul.msk.f32.gmra.mxu0 %vm249_vm0, %v231_v4 }
  0x36   : > { %1045 = vmatpush.bf16.msrb.mxu0 %v6495_v26  ;;  %619 = vmatpush.bf16.msra.mxu1 %v6479_v50 }
  0x37   : > { %748 = vmatpush.bf16.msra.mxu2 %v6471_v51 }
  0x38   : > { %896 = vmatpush.bf16.msra.mxu3 %v6487_v52 }
  0x3a   : > { %1253 = vmatpush.bf16.msrb.mxu1 %v6517_v0  ;;  %v6514_v0 = vld [vmem:[#allocation3 + $0x120] sm:$0xff] }
  0x3b   : > { %1416 = vmatpush.bf16.msrb.mxu2 %v6525_v61  ;;  %v6522_v61 = vld [vmem:[#allocation3 + $0x160] sm:$0xff] }
  0x3c   : > { %1579 = vmatpush.bf16.msrb.mxu3 %v6533_v63  ;;  %v6530_v63 = vld [vmem:[#allocation3 + $0x1a0] sm:$0xff] }
  0x3d   : > { %5335 = vmatmul.msk.f32.gmra.mxu0 %vm249_vm0, %v232_v5 }
  0x40   : > { %1580 = vmatpush.bf16.msrb.mxu3 %v6532_v20 }
  0x44   : > { %1581 = vmatpush.bf16.msrb.mxu3 %v6531_v43  ;;  %v6520_v43 = vld [vmem:[#allocation3 + $0x150] sm:$0xff] }
  0x45   : > { %5336 = vmatmul.msk.f32.gmra.mxu0 %vm249_vm0, %v233_v6 }
  0x48   : > { %1582 = vmatpush.bf16.msrb.mxu3 %v6530_v63 }
  0x4d   : > { %5337 = vmatmul.msk.f32.gmra.mxu0 %vm249_vm0, %v234_v7  ;;  %v476_v7 = vld [vmem:[#allocation2 + $0x14] sm:$0xc] }
  0x4e   : > { %v512_v13 = vunpack.c.l.b16 %v476_v7 }
  0x55   : > { %5338 = vmatmul.msk.f32.gmra.mxu0 %vm249_vm0, %v235_v8  ;;  %v443_v8 = vld [vmem:[#allocation2 + $0x14] sm:$0xe] }
  0x56   : > { %v663_v14 = vunpack.c.l.b16 %v443_v8 }
  0x5d   : > { %5339 = vmatmul.msk.f32.gmra.mxu0 %vm249_vm0, %v236_v9 }
  0x65   : > { %5340 = vmatmul.msk.f32.gmra.mxu0 %vm249_vm0, %v237_v10  ;;  %v790_v10 = vld [vmem:[#allocation2 + $0x14] sm:$0x8] }
  0x66   : > { %v811_v16 = vunpack.c.l.b16 %v790_v10 }
  0x6d   : > { %5341 = vmatmul.msk.f32.gmra.mxu0 %vm249_vm0, %v238_v12 }
  0x75   : > { %5342 = vmatmul.msk.f32.gmra.mxu0 %vm249_vm0, %v239_v15  ;;  %v6524_v15 = vld [vmem:[#allocation3 + $0x170] sm:$0xff] }
  0x76   : > { %1417 = vmatpush.bf16.msrb.mxu2 %v6524_v15 }
  0x7a   : > { %1418 = vmatpush.bf16.msrb.mxu2 %v6523_v41 }
  0x7d   : > { %5343 = vmatmul.msk.f32.gmra.mxu0 %vm249_vm0, %v240_v18 }
  0x7e   : > { %1419 = vmatpush.bf16.msrb.mxu2 %v6522_v61 }
  0x85   : > { %5344 = vmatmul.msk.f32.gmra.mxu0 %vm249_vm0, %v241_v21  ;;  %v6516_v21 = vld [vmem:[#allocation3 + $0x130] sm:$0xff] }
  0x86   : > { %1254 = vmatpush.bf16.msrb.mxu1 %v6516_v21 }
  0x8d   : > { %5345 = vmatmul.msk.f32.gmra.mxu0 %vm249_vm0, %v242_v30 }
  0x95   : > { %5346 = vmatmul.msk.f32.gmra.mxu0 %vm249_vm0, %v243_v37 }
  0x9a   : > { %v315_v44 = vpop.f32.mrf.mxu0 }
  0x9b   : > { %v316_v49 = vadd.f32 %v7642_v45, %v315_v44  ;;  %v6515_v44 = vld [vmem:[#allocation3 + $0x128] sm:$0xff] }
  0x9c   : > { %1255 = vmatpush.bf16.msrb.mxu1 %v6515_v44  ;;  %v6528_v44 = vld [vmem:[#allocation3 + $0x190] sm:$0xff] }
  0x9d   : > { %v379_v54 = vmul.f32 0.2, %v316_v49  ;;  %vm363_vm1 = vcmp.gt.f32.partialorder %v316_v49, 0.0 }
  0x9f   : > { %v395_v57 = vsel %vm363_vm1, %v316_v49, %v379_v54 }
  0xa0   : > { %1256 = vmatpush.bf16.msrb.mxu1 %v6514_v0 }
  0xa2   : > { %v318_v53 = vpop.f32.mrf.mxu0 }
  0xa3   : > { %v319_v55 = vadd.f32 %v7642_v45, %v318_v53 }
  0xa5   : > { %vm364_vm2 = vcmp.gt.f32.partialorder %v319_v55, 0.0  ;;  %v380_v56 = vmul.f32 0.2, %v319_v55 }
  0xa7   : > { %v396_v58 = vsel %vm364_vm2, %v319_v55, %v380_v56 }
  0xa8   : > { %v6753_v59 = vpack.c.bf16 %v396_v58, %v395_v57 }
  0xaa   : > { %7050 = vst [vmem:[#allocation2 + $0x18] sm:$0xff] %v6753_v59   ;;  %v321_v60 = vpop.f32.mrf.mxu0  ;;  %1046 = vmatmul.bf16.vlgmr.msrb.gmra.mxu0 %v6753_v59  ;;  %v6792_v11 = vunpack.c.l.b16 %v6753_v59 }
  0xab   : > { %v322_v62 = vadd.f32 %v7642_v45, %v321_v60 }
  0xac   : > { %v529_v18 = vpack.c.b16 %v6792_v11, %v512_v13  ;;  %v665_v19 = vpack.c.b16 %v6792_v11, %v663_v14  ;;  %v813_v22 = vpack.c.b16 %v6792_v11, %v811_v16  ;;  %v6521_v16 = vld [vmem:[#allocation3 + $0x158] sm:$0xff] }
  0xad   : > { %v381_v2 = vmul.f32 0.2, %v322_v62  ;;  %vm365_vm3 = vcmp.gt.f32.partialorder %v322_v62, 0.0  ;;  %1420 = vmatpush.bf16.msrb.mxu2 %v6521_v16 }
  0xae   : > { %v539_v26 = vrot.slane %v529_v18, 2  ;;  %v668_v27 = vrot.slane %v665_v19, 1  ;;  %v816_v32 = vrot.slane %v813_v22, 3  ;;  %v6529_v18 = vld [vmem:[#allocation3 + $0x198] sm:$0xff] }
  0xaf   : > { %v397_v5 = vsel %vm365_vm3, %v322_v62, %v381_v2  ;;  %v6513_v19 = vld [vmem:[#allocation3 + $0x118] sm:$0xff]  ;;  %1583 = vmatpush.bf16.msrb.mxu3 %v6529_v18 }
  0xb0   : > { %1257 = vmatpush.bf16.msrb.mxu1 %v6513_v19 }
  0xb1   : > { %1421 = vmatpush.bf16.msrb.mxu2 %v6520_v43 }
  0xb2   : > { %v324_v1 = vpop.f32.mrf.mxu0 }
  0xb3   : > { %v325_v3 = vadd.f32 %v7642_v45, %v324_v1  ;;  %1584 = vmatpush.bf16.msrb.mxu3 %v6528_v44 }
  0xb5   : > { %vm366_vm4 = vcmp.gt.f32.partialorder %v325_v3, 0.0  ;;  %v382_v4 = vmul.f32 0.2, %v325_v3 }
  0xb7   : > { %v398_v6 = vsel %vm366_vm4, %v325_v3, %v382_v4 }
  0xb8   : > { %v6758_v9 = vpack.c.bf16 %v398_v6, %v397_v5 }
  0xba   : > { %7051 = vst [vmem:[#allocation2 + $0x20] sm:$0xff] %v6758_v9   ;;  %v327_v12 = vpop.f32.mrf.mxu0  ;;  %1051 = vmatmul.bf16.gmra.mxu0 %v6758_v9 }
  0xbb   : > { %v328_v17 = vadd.f32 %v7642_v45, %v327_v12 }
  0xbd   : > { %v383_v24 = vmul.f32 0.2, %v328_v17  ;;  %vm367_vm8 = vcmp.gt.f32.partialorder %v328_v17, 0.0 }
  0xbf   : > { %v399_v37 = vsel %vm367_vm8, %v328_v17, %v383_v24 }
  0xc1   : > { %v7314_v23 = vld [vmem:[#allocation2 + $0x1c] sm:$0xff]  }
  0xc2   : > { %v330_v25 = vpop.f32.mrf.mxu0  ;;  %v540_v29 = vrot.slane %v7314_v23, 2  ;;  %v669_v30 = vrot.slane %v7314_v23, 1  ;;  %v817_v31 = vrot.slane %v7314_v23, 3  ;;  %v6503_v44 = vld [vmem:[#allocation2 + $0x20] sm:$0xff] }
  0xc3   : > { %v331_v28 = vadd.f32 %v7642_v45, %v330_v25 }
  0xc4   : > { %v541_v34 = vsel %vm538_vm5, %v539_v26, %v540_v29  ;;  %v670_v35 = vsel %vm667_vm6, %v668_v27, %v669_v30  ;;  %v818_v36 = vsel %vm815_vm7, %v816_v32, %v817_v31 }
  0xc5   : > { %vm368_vm9 = vcmp.gt.f32.partialorder %v331_v28, 0.0  ;;  %v384_v33 = vmul.f32 0.2, %v331_v28  ;;  %620 = vmatmul.bf16.vlgmr.msra.gmra.mxu1 %v541_v34  ;;  %749 = vmatmul.bf16.vlgmr.msra.gmra.mxu2 %v670_v35 }
  0xc6   : > { %897 = vmatmul.bf16.vlgmr.msra.gmra.mxu3 %v818_v36 }
  0xc7   : > { %v400_v38 = vsel %vm368_vm9, %v331_v28, %v384_v33 }
  0xc8   : > { %v6763_v39 = vpack.c.bf16 %v400_v38, %v399_v37 }
  0xca   : > { %7052 = vst [vmem:[#allocation2 + $0x28] sm:$0xff] %v6763_v39   ;;  %v333_v40 = vpop.f32.mrf.mxu0  ;;  %1056 = vmatmul.bf16.gmra.mxu0 %v6763_v39 }
  0xcb   : > { %v334_v42 = vadd.f32 %v7642_v45, %v333_v40 }
  0xcd   : > { %v385_v47 = vmul.f32 0.2, %v334_v42  ;;  %vm369_vm10 = vcmp.gt.f32.partialorder %v334_v42, 0.0 }
  0xcf   : > { %v401_v57 = vsel %vm369_vm10, %v334_v42, %v385_v47 }
  0xd1   : > { %v7316_v46 = vld [vmem:[#allocation2 + $0x24] sm:$0xff]  }
  0xd2   : > { %v336_v48 = vpop.f32.mrf.mxu0  ;;  %v542_v50 = vrot.slane %v7316_v46, 2  ;;  %v671_v51 = vrot.slane %v7316_v46, 1  ;;  %v819_v52 = vrot.slane %v7316_v46, 3  ;;  %v6512_v46 = vld [vmem:[#allocation3 + $0x110] sm:$0xff] }
  0xd3   : > { %v337_v49 = vadd.f32 %v7642_v45, %v336_v48  ;;  %1258 = vmatpush.bf16.msrb.mxu1 %v6512_v46 }
  0xd4   : > { %v543_v54 = vsel %vm538_vm5, %v540_v29, %v542_v50  ;;  %v672_v55 = vsel %vm667_vm6, %v669_v30, %v671_v51  ;;  %v820_v56 = vsel %vm815_vm7, %v817_v31, %v819_v52 }
  0xd5   : > { %vm370_vm11 = vcmp.gt.f32.partialorder %v337_v49, 0.0  ;;  %v386_v53 = vmul.f32 0.2, %v337_v49  ;;  %625 = vmatmul.bf16.gmra.mxu1 %v543_v54  ;;  %754 = vmatmul.bf16.gmra.mxu2 %v672_v55  ;;  %v6519_v55 = vld [vmem:[#allocation3 + $0x148] sm:$0xff] }
  0xd6   : > { %902 = vmatmul.bf16.gmra.mxu3 %v820_v56  ;;  %v6527_v56 = vld [vmem:[#allocation3 + $0x188] sm:$0xff]  ;;  %1422 = vmatpush.bf16.msrb.mxu2 %v6519_v55 }
  0xd7   : > { %v402_v58 = vsel %vm370_vm11, %v337_v49, %v386_v53  ;;  %1585 = vmatpush.bf16.msrb.mxu3 %v6527_v56 }
  0xd8   : > { %v6768_v59 = vpack.c.bf16 %v402_v58, %v401_v57  ;;  %v6511_v57 = vld [vmem:[#allocation3 + $0x108] sm:$0xff] }
  0xd9   : > { %1259 = vmatpush.bf16.msrb.mxu1 %v6511_v57 }
  0xda   : > { %7053 = vst [vmem:[#allocation2 + $0x30] sm:$0xff] %v6768_v59   ;;  %v339_v60 = vpop.f32.mrf.mxu0  ;;  %1061 = vmatmul.bf16.gmra.mxu0 %v6768_v59 }
  0xdb   : > { %v340_v62 = vadd.f32 %v7642_v45, %v339_v60 }
  0xdd   : > { %v387_v2 = vmul.f32 0.2, %v340_v62  ;;  %vm371_vm12 = vcmp.gt.f32.partialorder %v340_v62, 0.0 }
  0xdf   : > { %v403_v12 = vsel %vm371_vm12, %v340_v62, %v387_v2 }
  0xe1   : > { %v7318_v1 = vld [vmem:[#allocation2 + $0x2c] sm:$0xff]  }
  0xe2   : > { %v342_v3 = vpop.f32.mrf.mxu0  ;;  %v544_v5 = vrot.slane %v7318_v1, 2  ;;  %v673_v6 = vrot.slane %v7318_v1, 1  ;;  %v821_v7 = vrot.slane %v7318_v1, 3 }
  0xe3   : > { %v343_v4 = vadd.f32 %v7642_v45, %v342_v3 }
  0xe4   : > { %v545_v9 = vsel %vm538_vm5, %v542_v50, %v544_v5  ;;  %v674_v10 = vsel %vm667_vm6, %v671_v51, %v673_v6  ;;  %v822_v11 = vsel %vm815_vm7, %v819_v52, %v821_v7 }
  0xe5   : > { %vm372_vm13 = vcmp.gt.f32.partialorder %v343_v4, 0.0  ;;  %v388_v8 = vmul.f32 0.2, %v343_v4  ;;  %630 = vmatmul.bf16.gmra.mxu1 %v545_v9  ;;  %759 = vmatmul.bf16.gmra.mxu2 %v674_v10  ;;  %v6526_v9 = vld [vmem:[#allocation3 + $0x180] sm:$0xff] }
  0xe6   : > { %907 = vmatmul.bf16.gmra.mxu3 %v822_v11  ;;  %v6510_v10 = vld [vmem:[#allocation3 + $0x100] sm:$0xff] }
  0xe7   : > { %v404_v13 = vsel %vm372_vm13, %v343_v4, %v388_v8  ;;  %1586 = vmatpush.bf16.msrb.mxu3 %v6526_v9  ;;  %1260 = vmatpush.bf16.msrb.mxu1 %v6510_v10 }
  0xe8   : > { %v6773_v14 = vpack.c.bf16 %v404_v13, %v403_v12 }
  0xea   : > { %7054 = vst [vmem:[#allocation2 + $0x38] sm:$0xff] %v6773_v14   ;;  %v345_v15 = vpop.f32.mrf.mxu0  ;;  %1066 = vmatmul.bf16.gmra.mxu0 %v6773_v14 }
  0xeb   : > { %v346_v17 = vadd.f32 %v7642_v45, %v345_v15 }
  0xed   : > { %v389_v21 = vmul.f32 0.2, %v346_v17  ;;  %vm373_vm14 = vcmp.gt.f32.partialorder %v346_v17, 0.0 }
  0xef   : > { %v405_v31 = vsel %vm373_vm14, %v346_v17, %v389_v21 }
  0xf1   : > { %v7320_v20 = vld [vmem:[#allocation2 + $0x34] sm:$0xff]  }
  0xf2   : > { %v348_v22 = vpop.f32.mrf.mxu0  ;;  %v546_v24 = vrot.slane %v7320_v20, 2  ;;  %v675_v25 = vrot.slane %v7320_v20, 1  ;;  %v823_v26 = vrot.slane %v7320_v20, 3 }
  0xf3   : > { %v349_v23 = vadd.f32 %v7642_v45, %v348_v22 }
  0xf4   : > { %v547_v28 = vsel %vm538_vm5, %v544_v5, %v546_v24  ;;  %v676_v29 = vsel %vm667_vm6, %v673_v6, %v675_v25  ;;  %v824_v30 = vsel %vm815_vm7, %v821_v7, %v823_v26 }
  0xf5   : > { %vm374_vm15 = vcmp.gt.f32.partialorder %v349_v23, 0.0  ;;  %v390_v27 = vmul.f32 0.2, %v349_v23  ;;  %635 = vmatmul.bf16.gmra.mxu1 %v547_v28  ;;  %764 = vmatmul.bf16.gmra.mxu2 %v676_v29 }
  0xf6   : > { %912 = vmatmul.bf16.gmra.mxu3 %v824_v30 }
  0xf7   : > { %v406_v32 = vsel %vm374_vm15, %v349_v23, %v390_v27 }
  0xf8   : > { %v6778_v33 = vpack.c.bf16 %v406_v32, %v405_v31 }
  0xfa   : > { %7055 = vst [vmem:[#allocation2 + $0x40] sm:$0xff] %v6778_v33   ;;  %v351_v34 = vpop.f32.mrf.mxu0  ;;  %1071 = vmatmul.bf16.gmra.mxu0 %v6778_v33 }
  0xfb   : > { %v352_v35 = vadd.f32 %v7642_v45, %v351_v34 }
  0xfd   : > { %v391_v37 = vmul.f32 0.2, %v352_v35  ;;  %vm375_vm0 = vcmp.gt.f32.partialorder %v352_v35, 0.0 }
  0xff   : > { %v407_v51 = vsel %vm375_vm0, %v352_v35, %v391_v37  ;;  %v1104_v37 = vld [vmem:[#allocation2 + $0x1c] sm:$0xf] }
 0x101   : > { %v7322_v36 = vld [vmem:[#allocation2 + $0x3c] sm:$0xff]  }
 0x102   : > { %v354_v38 = vpop.f32.mrf.mxu0  ;;  %v548_v40 = vrot.slane %v7322_v36, 2  ;;  %v677_v41 = vrot.slane %v7322_v36, 1  ;;  %v825_v42 = vrot.slane %v7322_v36, 3  ;;  %v1103_v36 = vld [vmem:[#allocation2 + $0x18] sm:$0xe] }
 0x103   : > { %v355_v39 = vadd.f32 %v7642_v45, %v354_v38  ;;  %v1318_v38 = vld [vmem:[#allocation2 + $0x18] sm:$0xc] }
 0x104   : > { %v549_v48 = vsel %vm538_vm5, %v546_v24, %v548_v40  ;;  %v678_v49 = vsel %vm667_vm6, %v675_v25, %v677_v41  ;;  %v826_v50 = vsel %vm815_vm7, %v823_v26, %v825_v42 }
 0x105   : > { %vm376_vm1 = vcmp.gt.f32.partialorder %v355_v39, 0.0  ;;  %v392_v47 = vmul.f32 0.2, %v355_v39  ;;  %640 = vmatmul.bf16.gmra.mxu1 %v549_v48  ;;  %769 = vmatmul.bf16.gmra.mxu2 %v678_v49 }
 0x106   : > { %917 = vmatmul.bf16.gmra.mxu3 %v826_v50  ;;  %v1181_v50 = vrot.slane %v6503_v44, 1 }
 0x107   : > { %v408_v52 = vsel %vm376_vm1, %v355_v39, %v392_v47  ;;  %v1481_v39 = vld [vmem:[#allocation2 + $0x18] sm:$0x8] }
 0x108   : > { %v6783_v53 = vpack.c.bf16 %v408_v52, %v407_v51  ;;  %v1502_v43 = vunpack.c.l.b16 %v1481_v39  ;;  %v1344_v51 = vrot.slane %v6503_v44, 2  ;;  %v1507_v52 = vrot.slane %v6503_v44, 3 }
 0x10a   : > { %7056 = vst [vmem:[#allocation2 + $0x48] sm:$0xff] %v6783_v53   ;;  %v357_v54 = vpop.f32.mrf.mxu0  ;;  %1076 = vmatmul.bf16.gmra.mxu0 %v6783_v53  ;;  %v6817_v12 = vunpack.c.h.b16 %v6783_v53 }
 0x10b   : > { %v358_v58 = vadd.f32 %v7642_v45, %v357_v54 }
 0x10d   : > { %v393_v60 = vmul.f32 0.2, %v358_v58  ;;  %vm377_vm2 = vcmp.gt.f32.partialorder %v358_v58, 0.0 }
 0x10f   : > { %v409_v6 = vsel %vm377_vm2, %v358_v58, %v393_v60 }
 0x111   : > { %v7323_v59 = vld [vmem:[#allocation2 + $0x44] sm:$0xff]  }
 0x112   : > { %v360_v61 = vpop.f32.mrf.mxu0  ;;  %v550_v63 = vrot.slane %v7323_v59, 2  ;;  %v679_v0 = vrot.slane %v7323_v59, 1  ;;  %v827_v1 = vrot.slane %v7323_v59, 3 }
 0x113   : > { %v361_v62 = vadd.f32 %v7642_v45, %v360_v61  ;;  %v6518_v45 = vld [vmem:[#allocation3 + $0x140] sm:$0xff] }
 0x114   : > { %v551_v3 = vsel %vm538_vm5, %v548_v40, %v550_v63  ;;  %v680_v4 = vsel %vm667_vm6, %v677_v41, %v679_v0  ;;  %v828_v5 = vsel %vm815_vm7, %v825_v42, %v827_v1  ;;  %1423 = vmatpush.bf16.msrb.mxu2 %v6518_v45  ;;  %v1154_v40 = vunpack.c.l.b16 %v1103_v36  ;;  %v6556_v36 = vld [vmem:[#allocation3 + $0x270] sm:$0xff] }
 0x115   : > { %vm378_vm3 = vcmp.gt.f32.partialorder %v361_v62, 0.0  ;;  %v394_v2 = vmul.f32 0.2, %v361_v62  ;;  %645 = vmatmul.bf16.gmra.mxu1 %v551_v3  ;;  %774 = vmatmul.bf16.gmra.mxu2 %v680_v4  ;;  %v1155_v41 = vunpack.c.l.b16 %v1104_v37  ;;  %v1339_v42 = vunpack.c.l.b16 %v1318_v38  ;;  %v6548_v37 = vld [vmem:[#allocation3 + $0x230] sm:$0xff]  ;;  %v6506_v38 = vld [vmem:[#allocation2 + $0x38] sm:$0xff] }
 0x116   : > { %922 = vmatmul.bf16.gmra.mxu3 %v828_v5  ;;  %v1187_v44 = vrot.slane %v6506_v38, 1 }
 0x117   : > { %v410_v7 = vsel %vm378_vm3, %v361_v62, %v394_v2  ;;  %v1171_v46 = vpack.c.b16 %v1155_v41, %v1154_v40  ;;  %v1341_v47 = vpack.c.b16 %v1155_v41, %v1339_v42  ;;  %v1504_v49 = vpack.c.b16 %v1155_v41, %v1502_v43 }
 0x118   : > { %v6788_v8 = vpack.c.bf16 %v410_v7, %v409_v6 }
 0x119   : > { %v1180_v53 = vrot.slane %v1171_v46, 1  ;;  %v1343_v54 = vrot.slane %v1341_v47, 2  ;;  %v1506_v55 = vrot.slane %v1504_v49, 3  ;;  %v1350_v46 = vrot.slane %v6506_v38, 2  ;;  %v6540_v47 = vld [vmem:[#allocation3 + $0x1f0] sm:$0xff] }
 0x11a   : > { %7057 = vst [vmem:[#allocation2 + $0x50] sm:$0xff] %v6788_v8  }
 0x11b   : > { %v1182_v56 = vsel %vm667_vm6, %v1180_v53, %v1181_v50  ;;  %v1345_v57 = vsel %vm538_vm5, %v1343_v54, %v1344_v51  ;;  %v1508_v58 = vsel %vm815_vm7, %v1506_v55, %v1507_v52 }
 0x121   : > { %v458_v11 = vld [vmem:[#allocation2 + $0x50] sm:$0xff]  }
 0x122   : > { %v527_v13 = vunpack.c.l.b16 %v458_v11  ;;  %1081 = vmatmul.bf16.gmra.mxu0 %v458_v11  ;;  %v477_v21 = vld [vmem:[#allocation2 + $0x54] sm:$0x3] }
 0x123   : > { %v459_v22 = vld [vmem:[#allocation2 + $0x54] sm:$0x1]  ;;  %v528_v24 = vunpack.c.l.b16 %v477_v21 }
 0x124   : > { %v536_v14 = vpack.c.b16 %v527_v13, %v6817_v12  ;;  %v791_v23 = vld [vmem:[#allocation2 + $0x54] sm:$0x7]  ;;  %v664_v25 = vunpack.c.l.b16 %v459_v22 }
 0x125   : > { %v812_v26 = vunpack.c.l.b16 %v791_v23  ;;  %v537_v27 = vpack.c.b16 %v528_v24, %v528_v24 }
 0x126   : > { %v552_v15 = vrot.slane %v536_v14, 2  ;;  %v681_v16 = vrot.slane %v536_v14, 1  ;;  %v829_v17 = vrot.slane %v536_v14, 3  ;;  %v666_v28 = vpack.c.b16 %v664_v25, %v664_v25 }
 0x127   : > { %v814_v29 = vpack.c.b16 %v812_v26, %v812_v26  ;;  %v554_v30 = vrot.slane %v537_v27, 2  ;;  %v6541_v26 = vld [vmem:[#allocation3 + $0x1f8] sm:$0xff] }
 0x128   : > { %v553_v18 = vsel %vm538_vm5, %v550_v63, %v552_v15  ;;  %v682_v19 = vsel %vm667_vm6, %v679_v0, %v681_v16  ;;  %v830_v20 = vsel %vm815_vm7, %v827_v1, %v829_v17  ;;  %v683_v31 = vrot.slane %v666_v28, 1  ;;  %v6504_v0 = vld [vmem:[#allocation2 + $0x28] sm:$0xff]  ;;  %2028 = vmatpush.bf16.msra.mxu1 %v6541_v26 }
 0x129   : > { %650 = vmatmul.bf16.gmra.mxu1 %v553_v18  ;;  %779 = vmatmul.bf16.gmra.mxu2 %v682_v19  ;;  %v831_v32 = vrot.slane %v814_v29, 3  ;;  %v555_v33 = vsel %vm538_vm5, %v552_v15, %v554_v30  ;;  %v1183_v6 = vrot.slane %v6504_v0, 1  ;;  %v1346_v7 = vrot.slane %v6504_v0, 2  ;;  %v6505_v18 = vld [vmem:[#allocation2 + $0x30] sm:$0xff] }
 0x12a   : > { %927 = vmatmul.bf16.gmra.mxu3 %v830_v20  ;;  %v684_v34 = vsel %vm667_vm6, %v681_v16, %v683_v31  ;;  %v1509_v8 = vrot.slane %v6504_v0, 3  ;;  %v6557_v16 = vld [vmem:[#allocation3 + $0x278] sm:$0xff]  ;;  %v1185_v24 = vrot.slane %v6505_v18, 1  ;;  %v1348_v25 = vrot.slane %v6505_v18, 2 }
 0x12b   : > { %v832_v35 = vsel %vm815_vm7, %v829_v17, %v831_v32  ;;  %v1184_v45 = vsel %vm667_vm6, %v1181_v50, %v1183_v6  ;;  %v1347_v9 = vsel %vm538_vm5, %v1344_v51, %v1346_v7  ;;  %v6549_v17 = vld [vmem:[#allocation3 + $0x238] sm:$0xff]  ;;  %2227 = vmatpush.bf16.msra.mxu2 %v6557_v16  ;;  %v1511_v27 = vrot.slane %v6505_v18, 3  ;;  %v6546_v16 = vld [vmem:[#allocation3 + $0x220] sm:$0xff] }
 0x12c   : > { %v1510_v10 = vsel %vm815_vm7, %v1507_v52, %v1509_v8  ;;  %1893 = vmatpush.bf16.msra.mxu0 %v6549_v17  ;;  %v1186_v28 = vsel %vm667_vm6, %v1183_v6, %v1185_v24  ;;  %v1349_v29 = vsel %vm538_vm5, %v1346_v7, %v1348_v25  ;;  %2029 = vmatpush.bf16.msra.mxu1 %v6540_v47  ;;  %v6538_v17 = vld [vmem:[#allocation3 + $0x1e0] sm:$0xff]  ;;  %v6508_v18 = vld [vmem:[#allocation2 + $0x48] sm:$0xff] }
 0x12d   : > { %v1512_v30 = vsel %vm815_vm7, %v1509_v8, %v1511_v27  ;;  %v1188_v49 = vsel %vm667_vm6, %v1185_v24, %v1187_v44  ;;  %v1351_v50 = vsel %vm538_vm5, %v1348_v25, %v1350_v46  ;;  %v1354_v24 = vrot.slane %v6508_v18, 2 }
 0x12e   : > { %v1517_v25 = vrot.slane %v6508_v18, 3 }
 0x12f   : > { %2228 = vmatpush.bf16.msra.mxu2 %v6556_v36  ;;  %v6545_v36 = vld [vmem:[#allocation3 + $0x218] sm:$0xff] }
 0x130   : > { %1894 = vmatpush.bf16.msra.mxu0 %v6548_v37  ;;  %v6537_v37 = vld [vmem:[#allocation3 + $0x1d8] sm:$0xff] }
 0x139   : > { %655 = vmatmul.bf16.gmra.mxu1 %v555_v33  ;;  %784 = vmatmul.bf16.gmra.mxu2 %v684_v34 }
 0x13a   : > { %932 = vmatmul.bf16.gmra.mxu3 %v832_v35 }
 0x142   : > { %v621_v48 = vpop.f32.mrf.mxu1 }
 0x148   : > { %v750_v59 = vpop.f32.mrf.mxu2 }
 0x149   : > { %1261 = vmatmul.bf16.vlgmr.msrb.gmra.mxu1 %v1182_v56  ;;  %1424 = vmatmul.bf16.vlgmr.msrb.gmra.mxu2 %v1345_v57  ;;  %v751_v60 = vadd.f32 %v750_v59, %v621_v48  ;;  %v898_v61 = vpop.f32.mrf.mxu3  ;;  %v1513_v48 = vrot.slane %v6506_v38, 3  ;;  %v6555_v57 = vld [vmem:[#allocation3 + $0x268] sm:$0xff]  ;;  %v6507_v59 = vld [vmem:[#allocation2 + $0x40] sm:$0xff]  ;;  %v6509_v38 = vld [vmem:[#allocation2 + $0x50] sm:$0xff] }
 0x14a   : > { %1587 = vmatmul.bf16.vlgmr.msrb.gmra.mxu3 %v1508_v58  ;;  %v623_v62 = vpop.f32.mrf.mxu1  ;;  %v6547_v58 = vld [vmem:[#allocation3 + $0x228] sm:$0xff]  ;;  %2229 = vmatpush.bf16.msra.mxu2 %v6555_v57  ;;  %v1515_v6 = vrot.slane %v6507_v59, 3 }
 0x14b   : > { %v7687_v63 = vadd.f32 %v898_v61, %v751_v60  ;;  %v1514_v51 = vsel %vm815_vm7, %v1511_v27, %v1513_v48  ;;  %1895 = vmatpush.bf16.msra.mxu0 %v6547_v58 }
 0x14f   : > { %1896 = vmatpush.bf16.msra.mxu0 %v6546_v16 }
 0x150   : > { %v752_v1 = vpop.f32.mrf.mxu2 }
 0x151   : > { %v753_v2 = vadd.f32 %v752_v1, %v623_v62  ;;  %v900_v3 = vpop.f32.mrf.mxu3 }
 0x152   : > { %v626_v4 = vpop.f32.mrf.mxu1 }
 0x153   : > { %v7689_v5 = vadd.f32 %v900_v3, %v753_v2  ;;  %v1189_v2 = vrot.slane %v6507_v59, 1  ;;  %v1352_v3 = vrot.slane %v6507_v59, 2  ;;  %1897 = vmatpush.bf16.msra.mxu0 %v6545_v36 }
 0x155   : > { %v1190_v7 = vsel %vm667_vm6, %v1187_v44, %v1189_v2  ;;  %v1353_v8 = vsel %vm538_vm5, %v1350_v46, %v1352_v3  ;;  %v1355_v27 = vsel %vm538_vm5, %v1352_v3, %v1354_v24  ;;  %v1519_v46 = vrot.slane %v6509_v38, 3 }
 0x158   : > { %v755_v11 = vpop.f32.mrf.mxu2 }
 0x159   : > { %1266 = vmatmul.bf16.gmra.mxu1 %v1184_v45  ;;  %1429 = vmatmul.bf16.gmra.mxu2 %v1347_v9  ;;  %v756_v12 = vadd.f32 %v755_v11, %v626_v4  ;;  %v903_v13 = vpop.f32.mrf.mxu3  ;;  %v6539_v4 = vld [vmem:[#allocation3 + $0x1e8] sm:$0xff]  ;;  %v1516_v45 = vsel %vm815_vm7, %v1513_v48, %v1515_v6 }
 0x15a   : > { %1592 = vmatmul.bf16.gmra.mxu3 %v1510_v10  ;;  %v628_v14 = vpop.f32.mrf.mxu1  ;;  %2030 = vmatpush.bf16.msra.mxu1 %v6539_v4 }
 0x15b   : > { %v7694_v15 = vadd.f32 %v903_v13, %v756_v12 }
 0x15e   : > { %2031 = vmatpush.bf16.msra.mxu1 %v6538_v17  ;;  %v6552_v17 = vld [vmem:[#allocation3 + $0x250] sm:$0xff] }
 0x160   : > { %v757_v19 = vpop.f32.mrf.mxu2 }
 0x161   : > { %v758_v20 = vadd.f32 %v757_v19, %v628_v14  ;;  %v905_v21 = vpop.f32.mrf.mxu3  ;;  %v6554_v14 = vld [vmem:[#allocation3 + $0x260] sm:$0xff] }
 0x162   : > { %v631_v22 = vpop.f32.mrf.mxu1  ;;  %2230 = vmatpush.bf16.msra.mxu2 %v6554_v14  ;;  %2032 = vmatpush.bf16.msra.mxu1 %v6537_v37 }
 0x163   : > { %v7696_v23 = vadd.f32 %v905_v21, %v758_v20 }
 0x168   : > { %v760_v31 = vpop.f32.mrf.mxu2 }
 0x169   : > { %1271 = vmatmul.bf16.gmra.mxu1 %v1186_v28  ;;  %1434 = vmatmul.bf16.gmra.mxu2 %v1349_v29  ;;  %v761_v32 = vadd.f32 %v760_v31, %v631_v22  ;;  %v908_v33 = vpop.f32.mrf.mxu3  ;;  %v1191_v22 = vrot.slane %v6508_v18, 1  ;;  %v1518_v28 = vsel %vm815_vm7, %v1515_v6, %v1517_v25  ;;  %v6544_v18 = vld [vmem:[#allocation3 + $0x210] sm:$0xff] }
 0x16a   : > { %1597 = vmatmul.bf16.gmra.mxu3 %v1512_v30  ;;  %v633_v34 = vpop.f32.mrf.mxu1  ;;  %1898 = vmatpush.bf16.msra.mxu0 %v6544_v18 }
 0x16b   : > { %v7701_v35 = vadd.f32 %v908_v33, %v761_v32  ;;  %v1192_v26 = vsel %vm667_vm6, %v1189_v2, %v1191_v22 }
 0x170   : > { %v762_v39 = vpop.f32.mrf.mxu2 }
 0x171   : > { %v763_v40 = vadd.f32 %v762_v39, %v633_v34  ;;  %v910_v41 = vpop.f32.mrf.mxu3  ;;  %v6553_v34 = vld [vmem:[#allocation3 + $0x258] sm:$0xff] }
 0x172   : > { %v636_v42 = vpop.f32.mrf.mxu1  ;;  %2231 = vmatpush.bf16.msra.mxu2 %v6553_v34 }
 0x173   : > { %v7703_v43 = vadd.f32 %v910_v41, %v763_v40  ;;  %v1193_v40 = vrot.slane %v6509_v38, 1  ;;  %v1356_v41 = vrot.slane %v6509_v38, 2  ;;  %v6535_v38 = vld [vmem:[#allocation3 + $0x1c8] sm:$0xff] }
 0x175   : > { %v1194_v48 = vsel %vm667_vm6, %v1191_v22, %v1193_v40 }
 0x176   : > { %2232 = vmatpush.bf16.msra.mxu2 %v6552_v17 }
 0x178   : > { %v765_v52 = vpop.f32.mrf.mxu2 }
 0x179   : > { %1276 = vmatmul.bf16.gmra.mxu1 %v1188_v49  ;;  %1439 = vmatmul.bf16.gmra.mxu2 %v1351_v50  ;;  %v766_v53 = vadd.f32 %v765_v52, %v636_v42  ;;  %v913_v54 = vpop.f32.mrf.mxu3  ;;  %v6565_v42 = vld [vmem:[#allocation3 + $0x2b8] sm:$0xff]  ;;  %v1357_v49 = vsel %vm538_vm5, %v1354_v24, %v1356_v41  ;;  %v6564_v50 = vld [vmem:[#allocation3 + $0x2b0] sm:$0xff]  ;;  %v1119_v52 = vld [vmem:[#allocation2 + $0x58] sm:$0x1] }
 0x17a   : > { %1602 = vmatmul.bf16.gmra.mxu3 %v1514_v51  ;;  %v638_v55 = vpop.f32.mrf.mxu1  ;;  %v1520_v51 = vsel %vm815_vm7, %v1517_v25, %v1519_v46  ;;  %v1170_v58 = vunpack.c.l.b16 %v1119_v52 }
 0x17b   : > { %v7708_v56 = vadd.f32 %v913_v54, %v766_v53  ;;  %2376 = vmatpush.bf16.msra.mxu3 %v6565_v42  ;;  %v1319_v53 = vld [vmem:[#allocation2 + $0x58] sm:$0x3]  ;;  %v6558_v42 = vld [vmem:[#allocation3 + $0x280] sm:$0xff] }
 0x17c   : > { %v1482_v54 = vld [vmem:[#allocation2 + $0x58] sm:$0x7]  ;;  %v1340_v59 = vunpack.c.l.b16 %v1319_v53  ;;  %v1179_v4 = vpack.c.b16 %v1170_v58, %v1170_v58 }
 0x17e   : > { %v1342_v6 = vpack.c.b16 %v1340_v59, %v1340_v59 }
 0x17f   : > { %2377 = vmatpush.bf16.msra.mxu3 %v6564_v50  ;;  %v6551_v50 = vld [vmem:[#allocation3 + $0x248] sm:$0xff] }
 0x180   : > { %v767_v60 = vpop.f32.mrf.mxu2  ;;  %2233 = vmatpush.bf16.msra.mxu2 %v6551_v50 }
 0x181   : > { %v768_v61 = vadd.f32 %v767_v60, %v638_v55  ;;  %v915_v62 = vpop.f32.mrf.mxu3  ;;  %v1047_v55 = vpop.f32.mrf.mxu0  ;;  %v6563_v60 = vld [vmem:[#allocation3 + $0x2a8] sm:$0xff] }
 0x182   : > { %v641_v0 = vpop.f32.mrf.mxu1  ;;  %v1087_v52 = vadd.f32 %v1047_v55, %v7687_v63 }
 0x183   : > { %v7710_v1 = vadd.f32 %v915_v62, %v768_v61  ;;  %2378 = vmatpush.bf16.msra.mxu3 %v6563_v60 }
 0x188   : > { %v770_v9 = vpop.f32.mrf.mxu2 }
 0x189   : > { %1281 = vmatmul.bf16.gmra.mxu1 %v1190_v7  ;;  %1444 = vmatmul.bf16.gmra.mxu2 %v1353_v8  ;;  %v771_v10 = vadd.f32 %v770_v9, %v641_v0  ;;  %v918_v11 = vpop.f32.mrf.mxu3  ;;  %v1503_v0 = vunpack.c.l.b16 %v1482_v54  ;;  %v6562_v7 = vld [vmem:[#allocation3 + $0x2a0] sm:$0xff]  ;;  %v1195_v9 = vrot.slane %v1179_v4, 1  ;;  %v1049_v22 = vpop.f32.mrf.mxu0 }
 0x18a   : > { %1607 = vmatmul.bf16.gmra.mxu3 %v1516_v45  ;;  %v7715_v12 = vpop.f32.mrf.mxu1 }
 0x18b   : > { %v7717_v13 = vadd.f32 %v918_v11, %v771_v10  ;;  %v1505_v8 = vpack.c.b16 %v1503_v0, %v1503_v0  ;;  %2379 = vmatpush.bf16.msra.mxu3 %v6562_v7  ;;  %v1358_v10 = vrot.slane %v1342_v6, 2  ;;  %v6561_v11 = vld [vmem:[#allocation3 + $0x298] sm:$0xff]  ;;  %v1196_v25 = vsel %vm667_vm6, %v1193_v40, %v1195_v9  ;;  %v1745_v6 = vld [vmem:[#allocation2 + $0x10] sm:$0xc]  ;;  %v1746_v7 = vld [vmem:[#allocation2 + $0x14] sm:$0xf] }
 0x18c   : > { %v1088_v0 = vadd.f32 %v1049_v22, %v7689_v5  ;;  %v1813_v17 = vunpack.c.l.b16 %v1746_v7  ;;  %v1944_v18 = vunpack.c.l.b16 %v1745_v6 }
 0x18d   : > { %v1521_v16 = vrot.slane %v1505_v8, 3 }
 0x18e   : > { %v1946_v22 = vpack.c.b16 %v1813_v17, %v1944_v18 }
 0x18f   : > { %2380 = vmatpush.bf16.msra.mxu3 %v6561_v11  ;;  %v6550_v11 = vld [vmem:[#allocation3 + $0x240] sm:$0xff] }
 0x190   : > { %v7719_v19 = vpop.f32.mrf.mxu2  ;;  %2234 = vmatpush.bf16.msra.mxu2 %v6550_v11 }
 0x191   : > { %v7721_v20 = vpop.f32.mrf.mxu3  ;;  %v1052_v40 = vpop.f32.mrf.mxu0 }
 0x192   : > { %v646_v21 = vpop.f32.mrf.mxu1  ;;  %v1089_v5 = vadd.f32 %v1052_v40, %v7694_v15 }
 0x198   : > { %v775_v29 = vpop.f32.mrf.mxu2 }
 0x199   : > { %1286 = vmatmul.bf16.gmra.mxu1 %v1192_v26  ;;  %1449 = vmatmul.bf16.gmra.mxu2 %v1355_v27  ;;  %v776_v30 = vadd.f32 %v775_v29, %v646_v21  ;;  %v923_v31 = vpop.f32.mrf.mxu3  ;;  %v6536_v21 = vld [vmem:[#allocation3 + $0x1d0] sm:$0xff]  ;;  %v1359_v26 = vsel %vm538_vm5, %v1356_v41, %v1358_v10  ;;  %v6543_v41 = vld [vmem:[#allocation3 + $0x208] sm:$0xff]  ;;  %v1054_v53 = vpop.f32.mrf.mxu0 }
 0x19a   : > { %1612 = vmatmul.bf16.gmra.mxu3 %v1518_v28  ;;  %v7728_v33 = vpop.f32.mrf.mxu1  ;;  %2033 = vmatpush.bf16.msra.mxu1 %v6536_v21  ;;  %v6560_v27 = vld [vmem:[#allocation3 + $0x290] sm:$0xff]  ;;  %v1522_v28 = vsel %vm815_vm7, %v1519_v46, %v1521_v16  ;;  %v6542_v46 = vld [vmem:[#allocation3 + $0x200] sm:$0xff]  ;;  %v1090_v15 = vadd.f32 %v1054_v53, %v7696_v23 }
 0x19b   : > { %v7726_v32 = vadd.f32 %v923_v31, %v776_v30  ;;  %2381 = vmatpush.bf16.msra.mxu3 %v6560_v27  ;;  %v6559_v30 = vld [vmem:[#allocation3 + $0x288] sm:$0xff]  ;;  %1899 = vmatpush.bf16.msra.mxu0 %v6543_v41 }
 0x19e   : > { %2034 = vmatpush.bf16.msra.mxu1 %v6535_v38 }
 0x19f   : > { %2382 = vmatpush.bf16.msra.mxu3 %v6559_v30  ;;  %1900 = vmatpush.bf16.msra.mxu0 %v6542_v46 }
 0x1a0   : > { %v7730_v39 = vpop.f32.mrf.mxu2 }
 0x1a1   : > { %v7732_v44 = vpop.f32.mrf.mxu3  ;;  %v1057_v8 = vpop.f32.mrf.mxu0 }
 0x1a3   : > { %2383 = vmatpush.bf16.msra.mxu3 %v6558_v42 }
 0x1a6   : > { %v651_v47 = vpop.f32.mrf.mxu1 }
 0x1a9   : > { %1291 = vmatmul.bf16.gmra.mxu1 %v1194_v48  ;;  %1454 = vmatmul.bf16.gmra.mxu2 %v1357_v49  ;;  %v1059_v38 = vpop.f32.mrf.mxu0 }
 0x1aa   : > { %1617 = vmatmul.bf16.gmra.mxu3 %v1520_v51 }
 0x1ac   : > { %v780_v57 = vpop.f32.mrf.mxu2 }
 0x1ad   : > { %v781_v61 = vadd.f32 %v780_v57, %v651_v47  ;;  %v928_v62 = vpop.f32.mrf.mxu3  ;;  %v6534_v47 = vld [vmem:[#allocation3 + $0x1c0] sm:$0xff] }
 0x1ae   : > { %v7737_v2 = vpop.f32.mrf.mxu1  ;;  %2035 = vmatpush.bf16.msra.mxu1 %v6534_v47  ;;  %v1955_v47 = vrot.slane %v1946_v22, 2 }
 0x1af   : > { %v7739_v3 = vadd.f32 %v928_v62, %v781_v61  ;;  %v7760_v62 = vld [vmem:[%s8212_s3 + $0x1] ss:$0 sm:$0xff] }
 0x1b4   : > { %v7741_v45 = vpop.f32.mrf.mxu2 }
 0x1b5   : > { %v7743_v14 = vpop.f32.mrf.mxu3 }
 0x1b6   : > { %v656_v24 = vpop.f32.mrf.mxu1 }
 0x1b9   : > { %1296 = vmatmul.bf16.gmra.mxu1 %v1196_v25  ;;  %1459 = vmatmul.bf16.gmra.mxu2 %v1359_v26 }
 0x1ba   : > { %1622 = vmatmul.bf16.gmra.mxu3 %v1522_v28 }
 0x1bc   : > { %v785_v29 = vpop.f32.mrf.mxu2 }
 0x1bd   : > { %v786_v31 = vadd.f32 %v785_v29, %v656_v24  ;;  %v933_v34 = vpop.f32.mrf.mxu3 }
 0x1be   : > { %v7748_v36 = vpop.f32.mrf.mxu1 }
 0x1bf   : > { %v7750_v37 = vadd.f32 %v933_v34, %v786_v31 }
 0x1c4   : > { %v7752_v48 = vpop.f32.mrf.mxu2 }
 0x1c5   : > { %v7754_v49 = vpop.f32.mrf.mxu3 }
 0x1c6   : > { %v1262_v51 = vpop.f32.mrf.mxu1 }
 0x1c7   : > { %v1302_v54 = vadd.f32 %v1262_v51, %v1087_v52 }
 0x1cc   : > { %v1425_v57 = vpop.f32.mrf.mxu2 }
 0x1cd   : > { %v1465_v58 = vadd.f32 %v1425_v57, %v1302_v54  ;;  %v1588_v59 = vpop.f32.mrf.mxu3 }
 0x1ce   : > { %v1264_v60 = vpop.f32.mrf.mxu1 }
 0x1cf   : > { %v1628_v61 = vadd.f32 %v1588_v59, %v1465_v58  ;;  %v1303_v4 = vadd.f32 %v1264_v60, %v1088_v0  ;;  %v6573_v0 = vld [vmem:[#allocation3 + $0x2f8] sm:$0xff] }
 0x1d0   : > { %2591 = vmatpush.bf16.msrb.mxu0 %v6573_v0 }
 0x1d1   : > { %v1649_v63 = vadd.f32 %v7760_v62, %v1628_v61  ;;  %v6597_v61 = vld [vmem:[#allocation3 + $0x378] sm:$0xff] }
 0x1d2   : > { %2955 = vmatpush.bf16.msrb.mxu2 %v6597_v61 }
 0x1d3   : > { %v1681_v24 = vmul.f32 0.2, %v1649_v63  ;;  %vm1665_vm4 = vcmp.gt.f32.partialorder %v1649_v63, 0.0 }
 0x1d4   : > { %v1427_v9 = vpop.f32.mrf.mxu2 }
 0x1d5   : > { %v1466_v55 = vadd.f32 %v1427_v9, %v1303_v4  ;;  %v1590_v10 = vpop.f32.mrf.mxu3  ;;  %v1697_v29 = vsel %vm1665_vm4, %v1649_v63, %v1681_v24  ;;  %v6581_v4 = vld [vmem:[#allocation3 + $0x338] sm:$0xff]  ;;  %v1062_v9 = vpop.f32.mrf.mxu0  ;;  %v1091_v63 = vadd.f32 %v1057_v8, %v7701_v35  ;;  %v1092_v8 = vadd.f32 %v1059_v38, %v7703_v43 }
 0x1d6   : > { %v1267_v16 = vpop.f32.mrf.mxu1  ;;  %2740 = vmatpush.bf16.msrb.mxu1 %v6581_v4 }
 0x1d7   : > { %v1629_v21 = vadd.f32 %v1590_v10, %v1466_v55  ;;  %v1304_v27 = vadd.f32 %v1267_v16, %v1089_v5 }
 0x1d9   : > { %v1650_v25 = vadd.f32 %v7760_v62, %v1629_v21 }
 0x1db   : > { %vm1666_vm6 = vcmp.gt.f32.partialorder %v1650_v25, 0.0  ;;  %v1682_v26 = vmul.f32 0.2, %v1650_v25 }
 0x1dc   : > { %v1430_v28 = vpop.f32.mrf.mxu2 }
 0x1dd   : > { %v1698_v30 = vsel %vm1666_vm6, %v1650_v25, %v1682_v26  ;;  %v1467_v31 = vadd.f32 %v1430_v28, %v1304_v27  ;;  %v1593_v34 = vpop.f32.mrf.mxu3  ;;  %v1064_v22 = vpop.f32.mrf.mxu0  ;;  %v7253_v27 = vld [vmem:[#allocation2 + $0x14] sm:$0xc] }
 0x1de   : > { %v6821_v41 = vpack.c.bf16 %v1698_v30, %v1697_v29  ;;  %v1269_v42 = vpop.f32.mrf.mxu1 }
 0x1df   : > { %v1630_v51 = vadd.f32 %v1593_v34, %v1467_v31  ;;  %v1305_v54 = vadd.f32 %v1269_v42, %v1090_v15 }
 0x1e0   : > { %7065 = vst [vmem:[#allocation2 + $0x18] sm:$0xff] %v6821_v41   ;;  %2384 = vmatmul.bf16.vlgmr.msra.gmra.mxu3 %v6821_v41  ;;  %v1956_v46 = vrot.slane %v6821_v41, 2  ;;  %v6860_v50 = vunpack.c.l.b16 %v6821_v41 }
 0x1e1   : > { %v1651_v58 = vadd.f32 %v7760_v62, %v1630_v51  ;;  %v6580_v51 = vld [vmem:[#allocation3 + $0x330] sm:$0xff] }
 0x1e2   : > { %v1957_v40 = vsel %vm538_vm5, %v1955_v47, %v1956_v46  ;;  %v1829_v52 = vpack.c.b16 %v6860_v50, %v1813_v17  ;;  %v6596_v47 = vld [vmem:[#allocation3 + $0x370] sm:$0xff]  ;;  %2741 = vmatpush.bf16.msrb.mxu1 %v6580_v51 }
 0x1e3   : > { %2036 = vmatmul.bf16.vlgmr.msra.gmra.mxu1 %v1957_v40  ;;  %v1683_v23 = vmul.f32 0.2, %v1651_v58  ;;  %vm1667_vm7 = vcmp.gt.f32.partialorder %v1651_v58, 0.0  ;;  %v6572_v50 = vld [vmem:[#allocation3 + $0x2f0] sm:$0xff]  ;;  %2956 = vmatpush.bf16.msrb.mxu2 %v6596_v47 }
 0x1e4   : > { %v1432_v57 = vpop.f32.mrf.mxu2  ;;  %1901 = vmatmul.bf16.vlgmr.msra.gmra.mxu0 %v1829_v52 }
 0x1e5   : > { %v1468_v59 = vadd.f32 %v1432_v57, %v1305_v54  ;;  %v1595_v60 = vpop.f32.mrf.mxu3  ;;  %v1699_v16 = vsel %vm1667_vm7, %v1651_v58, %v1683_v23  ;;  %2592 = vmatpush.bf16.msrb.mxu0 %v6572_v50  ;;  %v1067_v0 = vpop.f32.mrf.mxu0 }
 0x1e6   : > { %v1272_v6 = vpop.f32.mrf.mxu1 }
 0x1e7   : > { %v1631_v7 = vadd.f32 %v1595_v60, %v1468_v59  ;;  %v1306_v10 = vadd.f32 %v1272_v6, %v1091_v63  ;;  %v7339_v28 = vld [vmem:[#allocation2 + $0x14] sm:$0xf0]  }
 0x1e8   : > { %v7254_v42 = vor.u32 %v7339_v28, %v7253_v27 }
 0x1e9   : > { %v1652_v53 = vadd.f32 %v7760_v62, %v1631_v7 }
 0x1ea   : > { %v2154_v57 = vrot.slane %v7254_v42, 2 }
 0x1eb   : > { %vm1668_vm8 = vcmp.gt.f32.partialorder %v1652_v53, 0.0  ;;  %v1684_v55 = vmul.f32 0.2, %v1652_v53 }
 0x1ec   : > { %v1435_v11 = vpop.f32.mrf.mxu2 }
 0x1ed   : > { %v1700_v17 = vsel %vm1668_vm8, %v1652_v53, %v1684_v55  ;;  %v1469_v18 = vadd.f32 %v1435_v11, %v1306_v10  ;;  %v1598_v21 = vpop.f32.mrf.mxu3  ;;  %v1094_v10 = vadd.f32 %v1064_v22, %v7710_v1  ;;  %v1069_v27 = vpop.f32.mrf.mxu0  ;;  %v1095_v22 = vadd.f32 %v1067_v0, %v7717_v13 }
 0x1ee   : > { %v7771_v24 = vpack.c.bf16 %v1700_v17, %v1699_v16  ;;  %v1274_v25 = vpop.f32.mrf.mxu1 }
 0x1ef   : > { %v1632_v35 = vadd.f32 %v1598_v21, %v1469_v18  ;;  %v1307_v29 = vadd.f32 %v1274_v25, %v1092_v8  ;;  %v6571_v8 = vld [vmem:[#allocation3 + $0x2e8] sm:$0xff] }
 0x1f0   : > { %7066 = vst [vmem:[#allocation2 + $0x20] sm:$0xff] %v7771_v24   ;;  %2389 = vmatmul.bf16.gmra.mxu3 %v7771_v24  ;;  %v7776_v5 = vrot.slane %v7771_v24, 2  ;;  %2593 = vmatpush.bf16.msrb.mxu0 %v6571_v8 }
 0x1f1   : > { %v1653_v31 = vadd.f32 %v7760_v62, %v1632_v35  ;;  %v6595_v35 = vld [vmem:[#allocation3 + $0x368] sm:$0xff] }
 0x1f2   : > { %v1959_v26 = vsel %vm538_vm5, %v1956_v46, %v7776_v5  ;;  %v1093_v46 = vadd.f32 %v1062_v9, %v7708_v56  ;;  %2957 = vmatpush.bf16.msrb.mxu2 %v6595_v35 }
 0x1f3   : > { %2041 = vmatmul.bf16.gmra.mxu1 %v1959_v26  ;;  %v1685_v52 = vmul.f32 0.2, %v1653_v31  ;;  %vm1669_vm9 = vcmp.gt.f32.partialorder %v1653_v31, 0.0  ;;  %v6579_v26 = vld [vmem:[#allocation3 + $0x328] sm:$0xff] }
 0x1f4   : > { %v1437_v30 = vpop.f32.mrf.mxu2  ;;  %2742 = vmatpush.bf16.msrb.mxu1 %v6579_v26 }
 0x1f5   : > { %v1470_v34 = vadd.f32 %v1437_v30, %v1307_v29  ;;  %v1600_v41 = vpop.f32.mrf.mxu3  ;;  %v1701_v6 = vsel %vm1669_vm9, %v1653_v31, %v1685_v52  ;;  %v773_v31 = vadd.f32 %v7719_v19, %v7715_v12  ;;  %v1072_v52 = vpop.f32.mrf.mxu0 }
 0x1f6   : > { %v1277_v15 = vpop.f32.mrf.mxu1 }
 0x1f7   : > { %v1633_v40 = vadd.f32 %v1600_v41, %v1470_v34  ;;  %v7326_v43 = vld [vmem:[#allocation2 + $0x1c] sm:$0xff]   ;;  %v1308_v60 = vadd.f32 %v1277_v15, %v1093_v46 }
 0x1f8   : > { %v7341_v38 = vld [vmem:[#allocation2 + $0x1c] sm:$0xff]   ;;  %1906 = vmatmul.bf16.gmra.mxu0 %v7326_v43 }
 0x1f9   : > { %v1654_v54 = vadd.f32 %v7760_v62, %v1633_v40  ;;  %v2155_v58 = vrot.slane %v7341_v38, 2  ;;  %v947_v40 = vadd.f32 %v7721_v20, %v773_v31 }
 0x1fb   : > { %vm1670_vm10 = vcmp.gt.f32.partialorder %v1654_v54, 0.0  ;;  %v1686_v59 = vmul.f32 0.2, %v1654_v54  ;;  %v2156_v61 = vsel %vm538_vm5, %v2154_v57, %v2155_v58 }
 0x1fc   : > { %v1440_v4 = vpop.f32.mrf.mxu2  ;;  %2235 = vmatmul.bf16.vlgmr.msra.gmra.mxu2 %v2156_v61 }
 0x1fd   : > { %v1702_v7 = vsel %vm1670_vm10, %v1654_v54, %v1686_v59  ;;  %v1471_v23 = vadd.f32 %v1440_v4, %v1308_v60  ;;  %v1603_v56 = vpop.f32.mrf.mxu3  ;;  %v1096_v59 = vadd.f32 %v1069_v27, %v947_v40  ;;  %v6569_v40 = vld [vmem:[#allocation3 + $0x2d8] sm:$0xff] }
 0x1fe   : > { %v6831_v9 = vpack.c.bf16 %v1702_v7, %v1701_v6  ;;  %v1279_v53 = vpop.f32.mrf.mxu1  ;;  %v6594_v6 = vld [vmem:[#allocation3 + $0x360] sm:$0xff] }
 0x1ff   : > { %v1634_v55 = vadd.f32 %v1603_v56, %v1471_v23  ;;  %v1309_v16 = vadd.f32 %v1279_v53, %v1094_v10  ;;  %v6570_v7 = vld [vmem:[#allocation3 + $0x2e0] sm:$0xff]  ;;  %2958 = vmatpush.bf16.msrb.mxu2 %v6594_v6  ;;  %v778_v10 = vadd.f32 %v7730_v39, %v7728_v33 }
 0x200   : > { %7067 = vst [vmem:[#allocation2 + $0x28] sm:$0xff] %v6831_v9   ;;  %2394 = vmatmul.bf16.gmra.mxu3 %v6831_v9  ;;  %v1960_v63 = vrot.slane %v6831_v9, 2  ;;  %v6578_v23 = vld [vmem:[#allocation3 + $0x320] sm:$0xff]  ;;  %2594 = vmatpush.bf16.msrb.mxu0 %v6570_v7 }
 0x201   : > { %v1655_v18 = vadd.f32 %v7760_v62, %v1634_v55  ;;  %2743 = vmatpush.bf16.msrb.mxu1 %v6578_v23 }
 0x202   : > { %v7788_v11 = vsel %vm538_vm5, %v7776_v5, %v1960_v63 }
 0x203   : > { %2046 = vmatmul.bf16.gmra.mxu1 %v7788_v11  ;;  %v1687_v34 = vmul.f32 0.2, %v1655_v18  ;;  %vm1671_vm11 = vcmp.gt.f32.partialorder %v1655_v18, 0.0 }
 0x204   : > { %v1442_v17 = vpop.f32.mrf.mxu2  ;;  %2595 = vmatpush.bf16.msrb.mxu0 %v6569_v40  ;;  %v6575_v40 = vld [vmem:[#allocation3 + $0x308] sm:$0xff] }
 0x205   : > { %v1472_v21 = vadd.f32 %v1442_v17, %v1309_v16  ;;  %v1605_v25 = vpop.f32.mrf.mxu3  ;;  %v1703_v13 = vsel %vm1671_vm11, %v1655_v18, %v1687_v34 }
 0x206   : > { %v1282_v28 = vpop.f32.mrf.mxu1 }
 0x207   : > { %v1635_v29 = vadd.f32 %v1605_v25, %v1472_v21  ;;  %v7328_v30 = vld [vmem:[#allocation2 + $0x24] sm:$0xff]   ;;  %v1310_v50 = vadd.f32 %v1282_v28, %v1095_v22  ;;  %v1074_v21 = vpop.f32.mrf.mxu0 }
 0x208   : > { %v7343_v1 = vld [vmem:[#allocation2 + $0x24] sm:$0xff]   ;;  %1911 = vmatmul.bf16.gmra.mxu0 %v7328_v30 }
 0x209   : > { %v1656_v41 = vadd.f32 %v7760_v62, %v1635_v29  ;;  %v2157_v42 = vrot.slane %v7343_v1, 2 }
 0x20b   : > { %vm1672_vm12 = vcmp.gt.f32.partialorder %v1656_v41, 0.0  ;;  %v1688_v47 = vmul.f32 0.2, %v1656_v41  ;;  %v2158_v51 = vsel %vm538_vm5, %v2155_v58, %v2157_v42 }
 0x20c   : > { %v1445_v15 = vpop.f32.mrf.mxu2  ;;  %2240 = vmatmul.bf16.gmra.mxu2 %v2158_v51 }
 0x20d   : > { %v1704_v43 = vsel %vm1672_vm12, %v1656_v41, %v1688_v47  ;;  %v1473_v38 = vadd.f32 %v1445_v15, %v1310_v50  ;;  %v1608_v46 = vpop.f32.mrf.mxu3  ;;  %v6593_v15 = vld [vmem:[#allocation3 + $0x358] sm:$0xff] }
 0x20e   : > { %v6836_v12 = vpack.c.bf16 %v1704_v43, %v1703_v13  ;;  %v1284_v19 = vpop.f32.mrf.mxu1  ;;  %v6577_v13 = vld [vmem:[#allocation3 + $0x318] sm:$0xff]  ;;  %2959 = vmatpush.bf16.msrb.mxu2 %v6593_v15  ;;  %v6567_v15 = vld [vmem:[#allocation3 + $0x2c8] sm:$0xff] }
 0x20f   : > { %v1636_v57 = vadd.f32 %v1608_v46, %v1473_v38  ;;  %v1311_v58 = vadd.f32 %v1284_v19, %v1096_v59  ;;  %2744 = vmatpush.bf16.msrb.mxu1 %v6577_v13 }
 0x210   : > { %7068 = vst [vmem:[#allocation2 + $0x30] sm:$0xff] %v6836_v12   ;;  %2399 = vmatmul.bf16.gmra.mxu3 %v6836_v12  ;;  %v1962_v54 = vrot.slane %v6836_v12, 2 }
 0x211   : > { %v1657_v20 = vadd.f32 %v7760_v62, %v1636_v57 }
 0x212   : > { %v7799_v60 = vsel %vm538_vm5, %v1960_v63, %v1962_v54  ;;  %v1097_v63 = vadd.f32 %v1072_v52, %v7726_v32  ;;  %v949_v32 = vadd.f32 %v7732_v44, %v778_v10  ;;  %v783_v52 = vadd.f32 %v7741_v45, %v7737_v2 }
 0x213   : > { %2051 = vmatmul.bf16.gmra.mxu1 %v7799_v60  ;;  %v1689_v16 = vmul.f32 0.2, %v1657_v20  ;;  %vm1673_vm13 = vcmp.gt.f32.partialorder %v1657_v20, 0.0 }
 0x214   : > { %v1447_v61 = vpop.f32.mrf.mxu2  ;;  %v1098_v31 = vadd.f32 %v1074_v21, %v949_v32  ;;  %v788_v32 = vadd.f32 %v7752_v48, %v7748_v36 }
 0x215   : > { %v1474_v0 = vadd.f32 %v1447_v61, %v1311_v58  ;;  %v1610_v4 = vpop.f32.mrf.mxu3  ;;  %v1705_v27 = vsel %vm1673_vm13, %v1657_v20, %v1689_v16 }
 0x216   : > { %v1287_v56 = vpop.f32.mrf.mxu1 }
 0x217   : > { %v1637_v9 = vadd.f32 %v1610_v4, %v1474_v0  ;;  %v7330_v53 = vld [vmem:[#allocation2 + $0x2c] sm:$0xff]   ;;  %v1312_v35 = vadd.f32 %v1287_v56, %v1097_v63  ;;  %v951_v4 = vadd.f32 %v7743_v14, %v783_v52 }
 0x218   : > { %v7345_v55 = vld [vmem:[#allocation2 + $0x2c] sm:$0xff]   ;;  %1916 = vmatmul.bf16.gmra.mxu0 %v7330_v53 }
 0x219   : > { %v1658_v17 = vadd.f32 %v7760_v62, %v1637_v9  ;;  %v2159_v18 = vrot.slane %v7345_v55, 2 }
 0x21b   : > { %vm1674_vm14 = vcmp.gt.f32.partialorder %v1658_v17, 0.0  ;;  %v1690_v25 = vmul.f32 0.2, %v1658_v17  ;;  %v2160_v8 = vsel %vm538_vm5, %v2157_v42, %v2159_v18  ;;  %v1077_v42 = vpop.f32.mrf.mxu0 }
 0x21c   : > { %v1450_v26 = vpop.f32.mrf.mxu2  ;;  %2245 = vmatmul.bf16.gmra.mxu2 %v2160_v8  ;;  %v1099_v19 = vadd.f32 %v1077_v42, %v7739_v3  ;;  %v953_v42 = vadd.f32 %v7754_v49, %v788_v32 }
 0x21d   : > { %v1706_v28 = vsel %vm1674_vm14, %v1658_v17, %v1690_v25  ;;  %v1475_v29 = vadd.f32 %v1450_v26, %v1312_v35  ;;  %v1613_v33 = vpop.f32.mrf.mxu3 }
 0x21e   : > { %v6841_v39 = vpack.c.bf16 %v1706_v28, %v1705_v27  ;;  %v1289_v30 = vpop.f32.mrf.mxu1 }
 0x21f   : > { %v1638_v22 = vadd.f32 %v1613_v33, %v1475_v29  ;;  %v1313_v41 = vadd.f32 %v1289_v30, %v1098_v31  ;;  %v6568_v30 = vld [vmem:[#allocation3 + $0x2d0] sm:$0xff] }
 0x220   : > { %7069 = vst [vmem:[#allocation2 + $0x38] sm:$0xff] %v6841_v39   ;;  %2404 = vmatmul.bf16.gmra.mxu3 %v6841_v39  ;;  %v1964_v1 = vrot.slane %v6841_v39, 2  ;;  %v6592_v39 = vld [vmem:[#allocation3 + $0x350] sm:$0xff]  ;;  %2596 = vmatpush.bf16.msrb.mxu0 %v6568_v30 }
 0x221   : > { %v1659_v44 = vadd.f32 %v7760_v62, %v1638_v22  ;;  %2960 = vmatpush.bf16.msrb.mxu2 %v6592_v39 }
 0x222   : > { %v7810_v34 = vsel %vm538_vm5, %v1962_v54, %v1964_v1 }
 0x223   : > { %2056 = vmatmul.bf16.gmra.mxu1 %v7810_v34  ;;  %v1691_v54 = vmul.f32 0.2, %v1659_v44  ;;  %vm1675_vm15 = vcmp.gt.f32.partialorder %v1659_v44, 0.0  ;;  %v1079_v2 = vpop.f32.mrf.mxu0 }
 0x224   : > { %v1452_v47 = vpop.f32.mrf.mxu2  ;;  %v1100_v55 = vadd.f32 %v1079_v2, %v951_v4  ;;  %2597 = vmatpush.bf16.msrb.mxu0 %v6567_v15 }
 0x225   : > { %v1476_v50 = vadd.f32 %v1452_v47, %v1313_v41  ;;  %v1615_v51 = vpop.f32.mrf.mxu3  ;;  %v1707_v3 = vsel %vm1675_vm15, %v1659_v44, %v1691_v54 }
 0x226   : > { %v1292_v43 = vpop.f32.mrf.mxu1 }
 0x227   : > { %v1639_v38 = vadd.f32 %v1615_v51, %v1476_v50  ;;  %v7332_v46 = vld [vmem:[#allocation2 + $0x34] sm:$0xff]   ;;  %v1314_v61 = vadd.f32 %v1292_v43, %v1099_v19 }
 0x228   : > { %v7347_v12 = vld [vmem:[#allocation2 + $0x34] sm:$0xff]   ;;  %1921 = vmatmul.bf16.gmra.mxu0 %v7332_v46 }
 0x229   : > { %v1660_v57 = vadd.f32 %v7760_v62, %v1639_v38  ;;  %v2161_v59 = vrot.slane %v7347_v12, 2  ;;  %v6591_v51 = vld [vmem:[#allocation3 + $0x348] sm:$0xff]  ;;  %v6566_v19 = vld [vmem:[#allocation3 + $0x2c0] sm:$0xff] }
 0x22a   : > { %2961 = vmatpush.bf16.msrb.mxu2 %v6591_v51  ;;  %2598 = vmatpush.bf16.msrb.mxu0 %v6566_v19 }
 0x22b   : > { %vm1676_vm0 = vcmp.gt.f32.partialorder %v1660_v57, 0.0  ;;  %v1692_v58 = vmul.f32 0.2, %v1660_v57  ;;  %v2162_v20 = vsel %vm538_vm5, %v2159_v18, %v2161_v59  ;;  %v1082_v21 = vpop.f32.mrf.mxu0 }
 0x22c   : > { %v1455_v0 = vpop.f32.mrf.mxu2  ;;  %2250 = vmatmul.bf16.gmra.mxu2 %v2162_v20  ;;  %v1101_v29 = vadd.f32 %v1082_v21, %v7750_v37 }
 0x22d   : > { %v1708_v6 = vsel %vm1676_vm0, %v1660_v57, %v1692_v58  ;;  %v1477_v7 = vadd.f32 %v1455_v0, %v1314_v61  ;;  %v1618_v23 = vpop.f32.mrf.mxu3 }
 0x22e   : > { %v6846_v45 = vpack.c.bf16 %v1708_v6, %v1707_v3  ;;  %v1294_v56 = vpop.f32.mrf.mxu1 }
 0x22f   : > { %v1640_v53 = vadd.f32 %v1618_v23, %v1477_v7  ;;  %v1315_v10 = vadd.f32 %v1294_v56, %v1100_v55  ;;  %v6574_v7 = vld [vmem:[#allocation3 + $0x300] sm:$0xff] }
 0x230   : > { %7070 = vst [vmem:[#allocation2 + $0x40] sm:$0xff] %v6846_v45   ;;  %2409 = vmatmul.bf16.gmra.mxu3 %v6846_v45  ;;  %v1966_v9 = vrot.slane %v6846_v45, 2 }
 0x231   : > { %v1661_v14 = vadd.f32 %v7760_v62, %v1640_v53  ;;  %v6590_v53 = vld [vmem:[#allocation3 + $0x340] sm:$0xff] }
 0x232   : > { %v7821_v63 = vsel %vm538_vm5, %v1964_v1, %v1966_v9  ;;  %v6576_v1 = vld [vmem:[#allocation3 + $0x310] sm:$0xff]  ;;  %2962 = vmatpush.bf16.msrb.mxu2 %v6590_v53 }
 0x233   : > { %2061 = vmatmul.bf16.gmra.mxu1 %v7821_v63  ;;  %v1693_v27 = vmul.f32 0.2, %v1661_v14  ;;  %vm1677_vm1 = vcmp.gt.f32.partialorder %v1661_v14, 0.0  ;;  %v1084_v13 = vpop.f32.mrf.mxu0 }
 0x234   : > { %v1457_v16 = vpop.f32.mrf.mxu2  ;;  %2745 = vmatpush.bf16.msrb.mxu1 %v6576_v1  ;;  %v1102_v49 = vadd.f32 %v1084_v13, %v953_v42 }
 0x235   : > { %v1478_v17 = vadd.f32 %v1457_v16, %v1315_v10  ;;  %v1620_v18 = vpop.f32.mrf.mxu3  ;;  %v1709_v36 = vsel %vm1677_vm1, %v1661_v14, %v1693_v27 }
 0x236   : > { %v1297_v25 = vpop.f32.mrf.mxu1 }
 0x237   : > { %v1641_v35 = vadd.f32 %v1620_v18, %v1478_v17  ;;  %v7334_v8 = vld [vmem:[#allocation2 + $0x3c] sm:$0xff]   ;;  %v1316_v31 = vadd.f32 %v1297_v25, %v1101_v29 }
 0x238   : > { %v7349_v26 = vld [vmem:[#allocation2 + $0x3c] sm:$0xff]   ;;  %1926 = vmatmul.bf16.gmra.mxu0 %v7334_v8  ;;  %2746 = vmatpush.bf16.msrb.mxu1 %v6575_v40  ;;  %v2441_v8 = vld [vmem:[#allocation2 + $0x18] sm:$0xc] }
 0x239   : > { %v1662_v28 = vadd.f32 %v7760_v62, %v1641_v35  ;;  %v2163_v33 = vrot.slane %v7349_v26, 2  ;;  %v2442_v26 = vld [vmem:[#allocation2 + $0x1c] sm:$0xf] }
 0x23a   : > { %v2493_v39 = vunpack.c.l.b16 %v2442_v26 }
 0x23b   : > { %vm1678_vm2 = vcmp.gt.f32.partialorder %v1662_v28, 0.0  ;;  %v1694_v22 = vmul.f32 0.2, %v1662_v28  ;;  %v2164_v41 = vsel %vm538_vm5, %v2161_v59, %v2163_v33 }
 0x23c   : > { %v1460_v47 = vpop.f32.mrf.mxu2  ;;  %2255 = vmatmul.bf16.gmra.mxu2 %v2164_v41  ;;  %2747 = vmatpush.bf16.msrb.mxu1 %v6574_v7 }
 0x23d   : > { %v1710_v48 = vsel %vm1678_vm2, %v1662_v28, %v1694_v22  ;;  %v1479_v44 = vadd.f32 %v1460_v47, %v1316_v31  ;;  %v1623_v37 = vpop.f32.mrf.mxu3 }
 0x23e   : > { %v6851_v50 = vpack.c.bf16 %v1710_v48, %v1709_v36  ;;  %v1299_v43 = vpop.f32.mrf.mxu1 }
 0x23f   : > { %v1642_v46 = vadd.f32 %v1623_v37, %v1479_v44  ;;  %v1317_v52 = vadd.f32 %v1299_v43, %v1102_v49  ;;  %v6916_v37 = vunpack.c.l.b16 %v7771_v24  ;;  %v6613_v43 = vld [vmem:[#allocation3 + $0x3f8] sm:$0xff] }
 0x240   : > { %7071 = vst [vmem:[#allocation2 + $0x48] sm:$0xff] %v6851_v50   ;;  %2414 = vmatmul.bf16.gmra.mxu3 %v6851_v50  ;;  %v1968_v38 = vrot.slane %v6851_v50, 2  ;;  %v6913_v17 = vunpack.c.h.b16 %v6851_v50  ;;  %v6583_v49 = vld [vmem:[#allocation2 + $0x24] sm:$0xff] }
 0x241   : > { %v1663_v57 = vadd.f32 %v7760_v62, %v1642_v46  ;;  %v2676_v51 = vpack.c.b16 %v6916_v37, %v2493_v39  ;;  %3268 = vmatpush.bf16.msrb.mxu3 %v6613_v43  ;;  %v6605_v24 = vld [vmem:[#allocation3 + $0x3b8] sm:$0xff] }
 0x242   : > { %v7832_v12 = vsel %vm538_vm5, %v1966_v9, %v1968_v38  ;;  %3383 = vmatpush.bf16.msra.mxu0 %v6605_v24 }
 0x243   : > { %2066 = vmatmul.bf16.gmra.mxu1 %v7832_v12  ;;  %v1695_v4 = vmul.f32 0.2, %v1663_v57  ;;  %vm1679_vm3 = vcmp.gt.f32.partialorder %v1663_v57, 0.0 }
 0x244   : > { %v1462_v54 = vpop.f32.mrf.mxu2 }
 0x245   : > { %v1480_v59 = vadd.f32 %v1462_v54, %v1317_v52  ;;  %v1625_v58 = vpop.f32.mrf.mxu3  ;;  %v1711_v45 = vsel %vm1679_vm3, %v1663_v57, %v1695_v4  ;;  %v5794_v52 = vld [vmem:[#allocation2 + $0x1c] sm:$0xc]  ;;  %v6629_v57 = vld [vmem:[#allocation3 + $0x438] sm:$0xff] }
 0x246   : > { %3561 = vmatpush.bf16.msra.mxu1 %v6629_v57 }
 0x247   : > { %v1643_v61 = vadd.f32 %v1625_v58, %v1480_v59  ;;  %v7336_v20 = vld [vmem:[#allocation2 + $0x44] sm:$0xff]   ;;  %v2883_v59 = vrot.slane %v6583_v49, 2  ;;  %v6626_v49 = vld [vmem:[#allocation3 + $0x420] sm:$0xff] }
 0x248   : > { %v7350_v0 = vld [vmem:[#allocation2 + $0x44] sm:$0xff]   ;;  %1931 = vmatmul.bf16.gmra.mxu0 %v7336_v20 }
 0x249   : > { %v1664_v3 = vadd.f32 %v7760_v62, %v1643_v61  ;;  %v2165_v6 = vrot.slane %v7350_v0, 2  ;;  %v7287_v61 = vld [vmem:[#allocation2 + $0x24] sm:$0xff]  }
 0x24b   : > { %vm1680_vm4 = vcmp.gt.f32.partialorder %v1664_v3, 0.0  ;;  %v1696_v23 = vmul.f32 0.2, %v1664_v3  ;;  %v2166_v2 = vsel %vm538_vm5, %v2163_v33, %v2165_v6  ;;  %v2492_v33 = vunpack.c.l.b16 %v2441_v8 }
 0x24c   : > { %2260 = vmatmul.bf16.gmra.mxu2 %v2166_v2 }
 0x24d   : > { %v1712_v56 = vsel %vm1680_vm4, %v1664_v3, %v1696_v23  ;;  %v2509_v41 = vpack.c.b16 %v2493_v39, %v2492_v33  ;;  %v6612_v23 = vld [vmem:[#allocation3 + $0x3f0] sm:$0xff] }
 0x24e   : > { %v7838_v9 = vpack.c.bf16 %v1712_v56, %v1711_v45  ;;  %3269 = vmatpush.bf16.msrb.mxu3 %v6612_v23  ;;  %v6584_v45 = vld [vmem:[#allocation2 + $0x2c] sm:$0xff]  ;;  %v7295_v23 = vld [vmem:[#allocation2 + $0x44] sm:$0xff]  }
 0x24f   : > { %v2518_v47 = vrot.slane %v2509_v41, 2 }
 0x250   : > { %7072 = vst [vmem:[#allocation2 + $0x50] sm:$0xff] %v7838_v9   ;;  %v2531_v55 = vrot.slane %v7838_v9, 2  ;;  %v2821_v9 = vld [vmem:[#allocation2 + $0x5c] sm:$0x3] }
 0x251   : > { %v2520_v48 = vsel %vm538_vm5, %v2518_v47, %v7776_v5 }
 0x252   : > { %v7845_v62 = vsel %vm538_vm5, %v1968_v38, %v2531_v55 }
 0x257   : > { %v2092_v10 = vld [vmem:[#allocation2 + $0x50] sm:$0xff]  }
 0x258   : > { %v7337_v16 = vld [vmem:[#allocation2 + $0x4c] sm:$0xff]  ;;  %v2143_v18 = vunpack.c.l.b16 %v2092_v10  ;;  %2419 = vmatmul.bf16.gmra.mxu3 %v2092_v10  ;;  %v2093_v30 = vld [vmem:[#allocation2 + $0x54] sm:$0x3] }
 0x259   : > { %v1761_v14 = vld [vmem:[#allocation2 + $0x50] sm:$0x3]  ;;  %1936 = vmatmul.bf16.gmra.mxu0 %v7337_v16  ;;  %v2144_v42 = vunpack.c.l.b16 %v2093_v30 }
 0x25a   : > { %v1945_v21 = vunpack.c.l.b16 %v1761_v14  ;;  %v2152_v25 = vpack.c.b16 %v2143_v18, %v6913_v17  ;;  %v6604_v14 = vld [vmem:[#allocation3 + $0x3b0] sm:$0xff]  ;;  %v2885_v18 = vrot.slane %v6584_v45, 2 }
 0x25b   : > { %v2153_v36 = vpack.c.b16 %v2144_v42, %v2144_v42  ;;  %v6628_v17 = vld [vmem:[#allocation3 + $0x430] sm:$0xff]  ;;  %3384 = vmatpush.bf16.msra.mxu0 %v6604_v14  ;;  %v7291_v42 = vld [vmem:[#allocation2 + $0x34] sm:$0xff]  }
 0x25c   : > { %v1954_v35 = vpack.c.b16 %v1945_v21, %v1945_v21  ;;  %v2167_v27 = vrot.slane %v2152_v25, 2  ;;  %3562 = vmatpush.bf16.msra.mxu1 %v6628_v17  ;;  %v7289_v21 = vld [vmem:[#allocation2 + $0x2c] sm:$0xff]   ;;  %v2886_v25 = vsel %vm538_vm5, %v2883_v59, %v2885_v18  ;;  %v6608_v14 = vld [vmem:[#allocation3 + $0x3d0] sm:$0xff] }
 0x25d   : > { %v2169_v50 = vrot.slane %v2153_v36, 2 }
 0x25e   : > { %v1970_v32 = vrot.slane %v1954_v35, 2  ;;  %v2168_v29 = vsel %vm538_vm5, %v2165_v6, %v2167_v27 }
 0x25f   : > { %2265 = vmatmul.bf16.gmra.mxu2 %v2168_v29  ;;  %v2170_v15 = vsel %vm538_vm5, %v2167_v27, %v2169_v50 }
 0x260   : > { %v1971_v28 = vsel %vm538_vm5, %v1968_v38, %v1970_v32  ;;  %v2037_v1 = vpop.f32.mrf.mxu1  ;;  %v6582_v38 = vld [vmem:[#allocation2 + $0x1c] sm:$0xf0] }
 0x261   : > { %2071 = vmatmul.bf16.gmra.mxu1 %v1971_v28  ;;  %v1902_v22 = vpop.f32.mrf.mxu0  ;;  %v5795_v5 = vor.u32 %v6582_v38, %v5794_v52  ;;  %v6611_v28 = vld [vmem:[#allocation3 + $0x3e8] sm:$0xff] }
 0x262   : > { %v2038_v31 = vadd.f32 %v2037_v1, %v1902_v22  ;;  %3270 = vmatpush.bf16.msrb.mxu3 %v6611_v28  ;;  %v6603_v22 = vld [vmem:[#allocation3 + $0x3a8] sm:$0xff]  ;;  %v6600_v28 = vld [vmem:[#allocation3 + $0x390] sm:$0xff] }
 0x263   : > { %v2882_v58 = vrot.slane %v5795_v5, 2  ;;  %3385 = vmatpush.bf16.msra.mxu0 %v6603_v22  ;;  %v7293_v52 = vld [vmem:[#allocation2 + $0x3c] sm:$0xff]  }
 0x265   : > { %v2884_v20 = vsel %vm538_vm5, %v2882_v58, %v2883_v59  ;;  %v6609_v59 = vld [vmem:[#allocation3 + $0x3d8] sm:$0xff] }
 0x268   : > { %v2039_v44 = vpop.f32.mrf.mxu1 }
 0x269   : > { %2599 = vmatmul.bf16.vlgmr.msrb.gmra.mxu0 %v2520_v48  ;;  %v1904_v40 = vpop.f32.mrf.mxu0 }
 0x26f   : > { %2270 = vmatmul.bf16.gmra.mxu2 %v2170_v15 }
 0x270   : > { %v2042_v13 = vpop.f32.mrf.mxu1 }
 0x271   : > { %2748 = vmatmul.bf16.vlgmr.msrb.gmra.mxu1 %v2676_v51  ;;  %v6610_v51 = vld [vmem:[#allocation3 + $0x3e0] sm:$0xff] }
 0x272   : > { %3271 = vmatpush.bf16.msrb.mxu3 %v6610_v51 }
 0x275   : > { %v1907_v46 = vpop.f32.mrf.mxu0 }
 0x276   : > { %v2043_v19 = vadd.f32 %v2042_v13, %v1907_v46  ;;  %v6602_v46 = vld [vmem:[#allocation3 + $0x3a0] sm:$0xff]  ;;  %3272 = vmatpush.bf16.msrb.mxu3 %v6609_v59 }
 0x277   : > { %3386 = vmatpush.bf16.msra.mxu0 %v6602_v46  ;;  %v6623_v46 = vld [vmem:[#allocation3 + $0x408] sm:$0xff] }
 0x278   : > { %v2044_v54 = vpop.f32.mrf.mxu1 }
 0x279   : > { %2604 = vmatmul.bf16.gmra.mxu0 %v7788_v11  ;;  %v2040_v11 = vadd.f32 %v2039_v44, %v1904_v40 }
 0x27a   : > { %3273 = vmatpush.bf16.msrb.mxu3 %v6608_v14  ;;  %v6642_v14 = vld [vmem:[#allocation3 + $0x460] sm:$0xff] }
 0x27d   : > { %v1909_v0 = vpop.f32.mrf.mxu0 }
 0x27e   : > { %v2045_v3 = vadd.f32 %v2044_v54, %v1909_v0 }
 0x27f   : > { %2963 = vmatmul.bf16.vlgmr.msrb.gmra.mxu2 %v2884_v20  ;;  %v2236_v4 = vpop.f32.mrf.mxu2 }
 0x280   : > { %v7855_v6 = vadd.f32 %v2236_v4, %v2038_v31  ;;  %v2047_v7 = vpop.f32.mrf.mxu1  ;;  %v6627_v31 = vld [vmem:[#allocation3 + $0x428] sm:$0xff] }
 0x281   : > { %2753 = vmatmul.bf16.gmra.mxu1 %v7287_v61 }
 0x282   : > { %3563 = vmatpush.bf16.msra.mxu1 %v6627_v31  ;;  %v7897_v31 = vpop.f32.mrf.mxu3 }
 0x285   : > { %v1912_v2 = vpop.f32.mrf.mxu0 }
 0x286   : > { %v2048_v53 = vadd.f32 %v2047_v7, %v1912_v2  ;;  %3564 = vmatpush.bf16.msra.mxu1 %v6626_v49  ;;  %v6625_v2 = vld [vmem:[#allocation3 + $0x418] sm:$0xff] }
 0x287   : > { %v2238_v56 = vpop.f32.mrf.mxu2  ;;  %v6645_v49 = vld [vmem:[#allocation3 + $0x478] sm:$0xff] }
 0x288   : > { %v7857_v10 = vadd.f32 %v2238_v56, %v2040_v11  ;;  %v2049_v16 = vpop.f32.mrf.mxu1  ;;  %v6601_v11 = vld [vmem:[#allocation3 + $0x398] sm:$0xff]  ;;  %3755 = vmatpush.bf16.msra.mxu2 %v6645_v49 }
 0x289   : > { %2609 = vmatmul.bf16.gmra.mxu0 %v7799_v60  ;;  %v6585_v60 = vld [vmem:[#allocation2 + $0x34] sm:$0xff]  ;;  %v6693_v49 = vld [vmem:[#allocation3 + $0x538] sm:$0xff] }
 0x28a   : > { %v2887_v41 = vrot.slane %v6585_v60, 2  ;;  %3387 = vmatpush.bf16.msra.mxu0 %v6601_v11  ;;  %3565 = vmatpush.bf16.msra.mxu1 %v6625_v2 }
 0x28c   : > { %v2888_v47 = vsel %vm538_vm5, %v2885_v18, %v2887_v41  ;;  %v6588_v18 = vld [vmem:[#allocation2 + $0x4c] sm:$0xff] }
 0x28d   : > { %v1914_v35 = vpop.f32.mrf.mxu0 }
 0x28e   : > { %v2050_v26 = vadd.f32 %v2049_v16, %v1914_v35  ;;  %v2457_v35 = vld [vmem:[#allocation2 + $0x58] sm:$0x3]  ;;  %3388 = vmatpush.bf16.msra.mxu0 %v6600_v28  ;;  %v6622_v28 = vld [vmem:[#allocation3 + $0x400] sm:$0xff] }
 0x28f   : > { %2968 = vmatmul.bf16.gmra.mxu2 %v2886_v25  ;;  %v2241_v8 = vpop.f32.mrf.mxu2 }
 0x290   : > { %v7861_v32 = vadd.f32 %v2241_v8, %v2043_v19  ;;  %v2052_v27 = vpop.f32.mrf.mxu1  ;;  %v2893_v8 = vrot.slane %v6588_v18, 2  ;;  %v7300_v18 = vld [vmem:[#allocation2 + $0xc] sm:$0xff]  }
 0x291   : > { %2758 = vmatmul.bf16.gmra.mxu1 %v7289_v21 }
 0x295   : > { %v1917_v29 = vpop.f32.mrf.mxu0 }
 0x296   : > { %v2053_v39 = vadd.f32 %v2052_v27, %v1917_v29  ;;  %v7297_v27 = vld [vmem:[#allocation2 + $0x4c] sm:$0xff]   ;;  %v6624_v29 = vld [vmem:[#allocation3 + $0x410] sm:$0xff] }
 0x297   : > { %v2243_v33 = vpop.f32.mrf.mxu2  ;;  %3566 = vmatpush.bf16.msra.mxu1 %v6624_v29  ;;  %v6640_v29 = vld [vmem:[#allocation3 + $0x450] sm:$0xff] }
 0x298   : > { %v7863_v30 = vadd.f32 %v2243_v33, %v2045_v3  ;;  %v2054_v1 = vpop.f32.mrf.mxu1 }
 0x299   : > { %2614 = vmatmul.bf16.gmra.mxu0 %v7810_v34  ;;  %v6586_v34 = vld [vmem:[#allocation2 + $0x3c] sm:$0xff] }
 0x29a   : > { %v2889_v19 = vrot.slane %v6586_v34, 2  ;;  %v7906_v34 = vpop.f32.mrf.mxu3 }
 0x29b   : > { %3567 = vmatpush.bf16.msra.mxu1 %v6623_v46  ;;  %v6677_v46 = vld [vmem:[#allocation3 + $0x4f8] sm:$0xff] }
 0x29c   : > { %v2890_v5 = vsel %vm538_vm5, %v2887_v41, %v2889_v19 }
 0x29d   : > { %v1919_v36 = vpop.f32.mrf.mxu0 }
 0x29e   : > { %v2055_v44 = vadd.f32 %v2054_v1, %v1919_v36  ;;  %v6589_v36 = vld [vmem:[#allocation2 + $0x54] sm:$0xff] }
 0x29f   : > { %2973 = vmatmul.bf16.gmra.mxu2 %v2888_v47  ;;  %v2246_v48 = vpop.f32.mrf.mxu2  ;;  %3568 = vmatpush.bf16.msra.mxu1 %v6622_v28 }
 0x2a0   : > { %v7867_v37 = vadd.f32 %v2246_v48, %v2048_v53  ;;  %v2057_v50 = vpop.f32.mrf.mxu1 }
 0x2a1   : > { %2763 = vmatmul.bf16.gmra.mxu1 %v7291_v42  ;;  %v6607_v42 = vld [vmem:[#allocation3 + $0x3c8] sm:$0xff] }
 0x2a2   : > { %3274 = vmatpush.bf16.msrb.mxu3 %v6607_v42 }
 0x2a3   : > { %4337 = vmatpush.bf16.msrb.mxu1 %v6693_v49 }
 0x2a5   : > { %v1922_v15 = vpop.f32.mrf.mxu0 }
 0x2a6   : > { %v2058_v13 = vadd.f32 %v2057_v50, %v1922_v15  ;;  %v2895_v50 = vrot.slane %v6589_v36, 2  ;;  %v7298_v15 = vld [vmem:[#allocation2 + $0x54] sm:$0xff] }
 0x2a7   : > { %v2248_v40 = vpop.f32.mrf.mxu2  ;;  %v6638_v36 = vld [vmem:[#allocation3 + $0x440] sm:$0xff] }
 0x2a8   : > { %v7869_v43 = vadd.f32 %v2248_v40, %v2050_v26  ;;  %v7871_v38 = vpop.f32.mrf.mxu1  ;;  %v2508_v26 = vunpack.c.l.b16 %v2457_v35  ;;  %v6641_v35 = vld [vmem:[#allocation3 + $0x458] sm:$0xff] }
 0x2a9   : > { %2619 = vmatmul.bf16.gmra.mxu0 %v7821_v63  ;;  %v6587_v63 = vld [vmem:[#allocation2 + $0x44] sm:$0xff] }
 0x2aa   : > { %v2891_v3 = vrot.slane %v6587_v63, 2  ;;  %v2517_v22 = vpack.c.b16 %v2508_v26, %v2508_v26 }
 0x2ac   : > { %v2892_v45 = vsel %vm538_vm5, %v2889_v19, %v2891_v3  ;;  %v2894_v60 = vsel %vm538_vm5, %v2891_v3, %v2893_v8  ;;  %v2533_v41 = vrot.slane %v2517_v22, 2  ;;  %v2896_v19 = vsel %vm538_vm5, %v2893_v8, %v2895_v50  ;;  %v7137_v3 = vld [vmem:[#allocation2 + $0x10] sm:$0xff]   ;;  %v6639_v22 = vld [vmem:[#allocation3 + $0x448] sm:$0xff] }
 0x2ad   : > { %v7875_v54 = vpop.f32.mrf.mxu0 }
 0x2ae   : > { %v2534_v48 = vsel %vm538_vm5, %v2531_v55, %v2533_v41 }
 0x2af   : > { %2978 = vmatmul.bf16.gmra.mxu2 %v2890_v5  ;;  %v2251_v24 = vpop.f32.mrf.mxu2  ;;  %v2872_v5 = vunpack.c.l.b16 %v2821_v9  ;;  %v2426_v9 = vadd.f32 %v7906_v34, %v7857_v10 }
 0x2b0   : > { %v7877_v57 = vadd.f32 %v2251_v24, %v2053_v39  ;;  %v2062_v58 = vpop.f32.mrf.mxu1 }
 0x2b1   : > { %2768 = vmatmul.bf16.gmra.mxu1 %v7293_v52 }
 0x2b5   : > { %v1927_v61 = vpop.f32.mrf.mxu0 }
 0x2b6   : > { %v2063_v0 = vadd.f32 %v2062_v58, %v1927_v61  ;;  %v6606_v58 = vld [vmem:[#allocation3 + $0x3c0] sm:$0xff]  ;;  %v6644_v61 = vld [vmem:[#allocation3 + $0x470] sm:$0xff] }
 0x2b7   : > { %v2253_v20 = vpop.f32.mrf.mxu2  ;;  %3275 = vmatpush.bf16.msrb.mxu3 %v6606_v58  ;;  %3756 = vmatpush.bf16.msra.mxu2 %v6644_v61 }
 0x2b8   : > { %v7879_v4 = vadd.f32 %v2253_v20, %v2055_v44  ;;  %v7882_v7 = vpop.f32.mrf.mxu1  ;;  %v2881_v20 = vpack.c.b16 %v2872_v5, %v2872_v5  ;;  %v7937_v5 = vld [vmem:[%s8212_s3 + $0x2] ss:$0 sm:$0xff] }
 0x2b9   : > { %2624 = vmatmul.bf16.gmra.mxu0 %v7832_v12 }
 0x2ba   : > { %3276 = vmatmul.bf16.vlgmr.msrb.gmra.mxu3 %v7137_v3  ;;  %v2897_v2 = vrot.slane %v2881_v20, 2 }
 0x2bd   : > { %v7885_v56 = vpop.f32.mrf.mxu0 }
 0x2bf   : > { %2983 = vmatmul.bf16.gmra.mxu2 %v2892_v45  ;;  %v2256_v53 = vpop.f32.mrf.mxu2 }
 0x2c0   : > { %v7887_v16 = vadd.f32 %v2256_v53, %v2058_v13  ;;  %v2067_v17 = vpop.f32.mrf.mxu1  ;;  %v6599_v13 = vld [vmem:[#allocation3 + $0x388] sm:$0xff]  ;;  %v6598_v53 = vld [vmem:[#allocation3 + $0x380] sm:$0xff] }
 0x2c1   : > { %2773 = vmatmul.bf16.gmra.mxu1 %v7295_v23  ;;  %3389 = vmatpush.bf16.msra.mxu0 %v6599_v13  ;;  %v6643_v23 = vld [vmem:[#allocation3 + $0x468] sm:$0xff] }
 0x2c2   : > { %3757 = vmatpush.bf16.msra.mxu2 %v6643_v23 }
 0x2c5   : > { %v1932_v12 = vpop.f32.mrf.mxu0  ;;  %3390 = vmatpush.bf16.msra.mxu0 %v6598_v53 }
 0x2c6   : > { %v2068_v25 = vadd.f32 %v2067_v17, %v1932_v12  ;;  %v2898_v17 = vsel %vm538_vm5, %v2895_v50, %v2897_v2  ;;  %3758 = vmatpush.bf16.msra.mxu2 %v6642_v14  ;;  %v2425_v50 = vadd.f32 %v7897_v31, %v7855_v6 }
 0x2c7   : > { %v7889_v21 = vpop.f32.mrf.mxu2 }
 0x2c9   : > { %2629 = vmatmul.bf16.gmra.mxu0 %v7845_v62  ;;  %v7899_v62 = vpop.f32.mrf.mxu1 }
 0x2ca   : > { %3759 = vmatpush.bf16.msra.mxu2 %v6641_v35  ;;  %4143 = vmatpush.bf16.msrb.mxu0 %v6677_v46 }
 0x2cd   : > { %v7893_v33 = vpop.f32.mrf.mxu0 }
 0x2ce   : > { %3760 = vmatpush.bf16.msra.mxu2 %v6640_v29  ;;  %v6676_v29 = vld [vmem:[#allocation3 + $0x4f0] sm:$0xff] }
 0x2cf   : > { %2988 = vmatmul.bf16.gmra.mxu2 %v2894_v60  ;;  %v2261_v39 = vpop.f32.mrf.mxu2  ;;  %4144 = vmatpush.bf16.msrb.mxu0 %v6676_v29 }
 0x2d0   : > { %v7895_v1 = vadd.f32 %v2261_v39, %v2063_v0  ;;  %v7915_v0 = vpop.f32.mrf.mxu3  ;;  %v6661_v39 = vld [vmem:[#allocation3 + $0x4b8] sm:$0xff] }
 0x2d1   : > { %2778 = vmatmul.bf16.gmra.mxu1 %v7297_v27  ;;  %3949 = vmatpush.bf16.msra.mxu3 %v6661_v39  ;;  %v2427_v53 = vadd.f32 %v7915_v0, %v7861_v32  ;;  %v6692_v39 = vld [vmem:[#allocation3 + $0x530] sm:$0xff] }
 0x2d2   : > { %3761 = vmatpush.bf16.msra.mxu2 %v6639_v22  ;;  %4338 = vmatpush.bf16.msrb.mxu1 %v6692_v39 }
 0x2d6   : > { %v1937_v47 = vpop.f32.mrf.mxu0  ;;  %3762 = vmatpush.bf16.msra.mxu2 %v6638_v36 }
 0x2d7   : > { %v7904_v44 = vpop.f32.mrf.mxu2 }
 0x2d9   : > { %2634 = vmatmul.bf16.gmra.mxu0 %v2534_v48 }
 0x2de   : > { %v2072_v51 = vpop.f32.mrf.mxu1  ;;  %v7909_v52 = vpop.f32.mrf.mxu0 }
 0x2df   : > { %v2073_v40 = vadd.f32 %v2072_v51, %v1937_v47  ;;  %2993 = vmatmul.bf16.gmra.mxu2 %v2896_v19 }
 0x2e1   : > { %2783 = vmatmul.bf16.gmra.mxu1 %v7298_v15 }
 0x2e2   : > { %v2266_v55 = vpop.f32.mrf.mxu2 }
 0x2e3   : > { %v7911_v24 = vadd.f32 %v2266_v55, %v2068_v25  ;;  %v7920_v25 = vpop.f32.mrf.mxu3 }
 0x2e4   : > { %v2428_v22 = vadd.f32 %v7920_v25, %v7863_v30 }
 0x2e6   : > { %v7913_v59 = vpop.f32.mrf.mxu1  ;;  %v2600_v63 = vpop.f32.mrf.mxu0 }
 0x2e7   : > { %v2640_v51 = vadd.f32 %v2600_v63, %v2425_v50  ;;  %v6660_v63 = vld [vmem:[#allocation3 + $0x4b0] sm:$0xff] }
 0x2e8   : > { %3950 = vmatpush.bf16.msra.mxu3 %v6660_v63 }
 0x2e9   : > { %3391 = vmatmul.bf16.vlgmr.msra.gmra.mxu0 %v7300_v18 }
 0x2ea   : > { %v7917_v11 = vpop.f32.mrf.mxu2 }
 0x2eb   : > { %v7926_v42 = vpop.f32.mrf.mxu3 }
 0x2ee   : > { %v2749_v45 = vpop.f32.mrf.mxu1  ;;  %v2602_v12 = vpop.f32.mrf.mxu0 }
 0x2ef   : > { %2998 = vmatmul.bf16.gmra.mxu2 %v2898_v17  ;;  %v2641_v6 = vadd.f32 %v2602_v12, %v2426_v9 }
 0x2f2   : > { %v2271_v8 = vpop.f32.mrf.mxu2 }
 0x2f3   : > { %v7922_v26 = vadd.f32 %v2271_v8, %v2073_v40  ;;  %v2789_v40 = vadd.f32 %v2749_v45, %v2640_v51  ;;  %v7930_v19 = vpop.f32.mrf.mxu3 }
 0x2f6   : > { %v2751_v27 = vpop.f32.mrf.mxu1  ;;  %v2605_v60 = vpop.f32.mrf.mxu0 }
 0x2f7   : > { %v2790_v31 = vadd.f32 %v2751_v27, %v2641_v6  ;;  %v2642_v17 = vadd.f32 %v2605_v60, %v2427_v53  ;;  %v6675_v53 = vld [vmem:[#allocation3 + $0x4e8] sm:$0xff] }
 0x2f8   : > { %4145 = vmatpush.bf16.msrb.mxu0 %v6675_v53 }
 0x2fa   : > { %v7924_v41 = vpop.f32.mrf.mxu2 }
 0x2fb   : > { %v7941_v45 = vpop.f32.mrf.mxu3 }
 0x2fe   : > { %v2754_v47 = vpop.f32.mrf.mxu1  ;;  %v2607_v48 = vpop.f32.mrf.mxu0 }
 0x2ff   : > { %v2791_v27 = vadd.f32 %v2754_v47, %v2642_v17  ;;  %v2643_v32 = vadd.f32 %v2607_v48, %v2428_v22  ;;  %v6659_v47 = vld [vmem:[#allocation3 + $0x4a8] sm:$0xff]  ;;  %v2430_v17 = vadd.f32 %v7930_v19, %v7869_v43 }
 0x300   : > { %3951 = vmatpush.bf16.msra.mxu3 %v6659_v47 }
 0x302   : > { %v2964_v15 = vpop.f32.mrf.mxu2 }
 0x303   : > { %v3004_v55 = vadd.f32 %v2964_v15, %v2789_v40  ;;  %v7949_v0 = vpop.f32.mrf.mxu3 }
 0x305   : > { %v3025_v61 = vadd.f32 %v7937_v5, %v3004_v55 }
 0x306   : > { %v2756_v13 = vpop.f32.mrf.mxu1  ;;  %v2610_v58 = vpop.f32.mrf.mxu0 }
 0x307   : > { %v3057_v2 = vmul.f32 0.2, %v3025_v61  ;;  %vm3041_vm5 = vcmp.gt.f32.partialorder %v3025_v61, 0.0  ;;  %v2792_v60 = vadd.f32 %v2756_v13, %v2643_v32  ;;  %v2429_v13 = vadd.f32 %v7926_v42, %v7867_v37 }
 0x309   : > { %v3073_v12 = vsel %vm3041_vm5, %v3025_v61, %v3057_v2 }
 0x30a   : > { %v2966_v20 = vpop.f32.mrf.mxu2 }
 0x30b   : > { %v3005_v3 = vadd.f32 %v2966_v20, %v2790_v31  ;;  %v2644_v31 = vadd.f32 %v2610_v58, %v2429_v13  ;;  %v7955_v2 = vpop.f32.mrf.mxu3 }
 0x30d   : > { %v3026_v10 = vadd.f32 %v7937_v5, %v3005_v3 }
 0x30e   : > { %v2759_v23 = vpop.f32.mrf.mxu1  ;;  %v2612_v34 = vpop.f32.mrf.mxu0 }
 0x30f   : > { %vm3042_vm6 = vcmp.gt.f32.partialorder %v3026_v10, 0.0  ;;  %v3058_v14 = vmul.f32 0.2, %v3026_v10  ;;  %v2645_v42 = vadd.f32 %v2612_v34, %v2430_v17 }
 0x311   : > { %v3074_v18 = vsel %vm3042_vm6, %v3026_v10, %v3058_v14  ;;  %v2793_v10 = vadd.f32 %v2759_v23, %v2644_v31  ;;  %v6691_v14 = vld [vmem:[#allocation3 + $0x528] sm:$0xff] }
 0x312   : > { %v6945_v35 = vpack.c.bf16 %v3074_v18, %v3073_v12  ;;  %v2969_v8 = vpop.f32.mrf.mxu2  ;;  %4339 = vmatpush.bf16.msrb.mxu1 %v6691_v14 }
 0x313   : > { %v3006_v36 = vadd.f32 %v2969_v8, %v2791_v27  ;;  %v6658_v8 = vld [vmem:[#allocation3 + $0x4a0] sm:$0xff] }
 0x314   : > { %7129 = vst [vmem:[#allocation2 + $0x18] sm:$0xff] %v6945_v35   ;;  %3281 = vmatmul.bf16.gmra.mxu3 %v6945_v35 }
 0x315   : > { %v3027_v51 = vadd.f32 %v7937_v5, %v3006_v36  ;;  %3952 = vmatpush.bf16.msra.mxu3 %v6658_v8  ;;  %v7962_v36 = vpop.f32.mrf.mxu3 }
 0x316   : > { %v2761_v28 = vpop.f32.mrf.mxu1  ;;  %v7947_v50 = vpop.f32.mrf.mxu0 }
 0x317   : > { %v3059_v30 = vmul.f32 0.2, %v3027_v51  ;;  %vm3043_vm7 = vcmp.gt.f32.partialorder %v3027_v51, 0.0  ;;  %v2794_v58 = vadd.f32 %v2761_v28, %v2645_v42  ;;  %v2431_v28 = vadd.f32 %v7941_v45, %v7877_v57 }
 0x319   : > { %v3075_v61 = vsel %vm3043_vm7, %v3027_v51, %v3059_v30  ;;  %v2646_v51 = vadd.f32 %v7947_v50, %v2431_v28  ;;  %v6690_v30 = vld [vmem:[#allocation3 + $0x520] sm:$0xff] }
 0x31a   : > { %v2971_v15 = vpop.f32.mrf.mxu2  ;;  %4340 = vmatpush.bf16.msrb.mxu1 %v6690_v30 }
 0x31b   : > { %v3007_v40 = vadd.f32 %v2971_v15, %v2792_v60  ;;  %v7302_v46 = vld [vmem:[#allocation2 + $0x14] sm:$0xff]  }
 0x31c   : > { %v6614_v49 = vld [vmem:[#allocation2 + $0x14] sm:$0xff]  ;;  %3396 = vmatmul.bf16.gmra.mxu0 %v7302_v46 }
 0x31d   : > { %v6630_v9 = vld [vmem:[#allocation2 + $0x18] sm:$0xff]  ;;  %v3028_v25 = vadd.f32 %v7937_v5, %v3007_v40  ;;  %3569 = vmatmul.bf16.vlgmr.msra.gmra.mxu1 %v6614_v49  ;;  %v2410_v57 = vpop.f32.mrf.mxu3 }
 0x31e   : > { %v2764_v55 = vpop.f32.mrf.mxu1  ;;  %3763 = vmatmul.bf16.vlgmr.msra.gmra.mxu2 %v6630_v9  ;;  %v2617_v48 = vpop.f32.mrf.mxu0  ;;  %v6674_v9 = vld [vmem:[#allocation3 + $0x4e0] sm:$0xff] }
 0x31f   : > { %vm3044_vm8 = vcmp.gt.f32.partialorder %v3028_v25, 0.0  ;;  %v3060_v6 = vmul.f32 0.2, %v3028_v25  ;;  %v2795_v49 = vadd.f32 %v2764_v55, %v2646_v51  ;;  %4146 = vmatpush.bf16.msrb.mxu0 %v6674_v9 }
 0x321   : > { %v3076_v63 = vsel %vm3044_vm8, %v3028_v25, %v3060_v6  ;;  %v2432_v25 = vadd.f32 %v7949_v0, %v7879_v4  ;;  %v2060_v0 = vadd.f32 %v7871_v38, %v7875_v54  ;;  %v6673_v38 = vld [vmem:[#allocation3 + $0x4d8] sm:$0xff] }
 0x322   : > { %v6950_v20 = vpack.c.bf16 %v3076_v63, %v3075_v61  ;;  %v2974_v3 = vpop.f32.mrf.mxu2  ;;  %v6657_v61 = vld [vmem:[#allocation3 + $0x498] sm:$0xff] }
 0x323   : > { %v3008_v12 = vadd.f32 %v2974_v3, %v2793_v10  ;;  %v2647_v45 = vadd.f32 %v2617_v48, %v2432_v25  ;;  %3953 = vmatpush.bf16.msra.mxu3 %v6657_v61  ;;  %v2433_v48 = vadd.f32 %v7955_v2, %v7887_v16  ;;  %v2285_v42 = vadd.f32 %v7889_v21, %v2060_v0  ;;  %v6689_v54 = vld [vmem:[#allocation3 + $0x518] sm:$0xff] }
 0x324   : > { %7130 = vst [vmem:[#allocation2 + $0x20] sm:$0xff] %v6950_v20   ;;  %3286 = vmatmul.bf16.gmra.mxu3 %v6950_v20  ;;  %4147 = vmatpush.bf16.msrb.mxu0 %v6673_v38 }
 0x325   : > { %v3029_v35 = vadd.f32 %v7937_v5, %v3008_v12  ;;  %v2434_v16 = vadd.f32 %v7962_v36, %v2285_v42  ;;  %4341 = vmatpush.bf16.msrb.mxu1 %v6689_v54 }
 0x326   : > { %v2766_v18 = vpop.f32.mrf.mxu1  ;;  %v7959_v37 = vpop.f32.mrf.mxu0 }
 0x327   : > { %v3061_v43 = vmul.f32 0.2, %v3029_v35  ;;  %vm3045_vm9 = vcmp.gt.f32.partialorder %v3029_v35, 0.0  ;;  %v2796_v50 = vadd.f32 %v2766_v18, %v2647_v45  ;;  %v2412_v18 = vpop.f32.mrf.mxu3 }
 0x329   : > { %v3077_v47 = vsel %vm3045_vm9, %v3029_v35, %v3061_v43 }
 0x32a   : > { %v2976_v27 = vpop.f32.mrf.mxu2 }
 0x32b   : > { %v3009_v23 = vadd.f32 %v2976_v27, %v2794_v58  ;;  %v7304_v29 = vld [vmem:[#allocation2 + $0x1c] sm:$0xff]   ;;  %v2648_v58 = vadd.f32 %v7959_v37, %v2433_v48 }
 0x32c   : > { %v6615_v39 = vld [vmem:[#allocation2 + $0x1c] sm:$0xff]  ;;  %3401 = vmatmul.bf16.gmra.mxu0 %v7304_v29 }
 0x32d   : > { %v6631_v22 = vld [vmem:[#allocation2 + $0x20] sm:$0xff]  ;;  %v3030_v19 = vadd.f32 %v7937_v5, %v3009_v23  ;;  %3574 = vmatmul.bf16.gmra.mxu1 %v6615_v39 }
 0x32e   : > { %3768 = vmatmul.bf16.gmra.mxu2 %v6631_v22  ;;  %v2622_v34 = vpop.f32.mrf.mxu0  ;;  %v2769_v60 = vpop.f32.mrf.mxu1 }
 0x32f   : > { %vm3046_vm10 = vcmp.gt.f32.partialorder %v3030_v19, 0.0  ;;  %v3062_v32 = vmul.f32 0.2, %v3030_v19  ;;  %v2797_v29 = vadd.f32 %v2769_v60, %v2648_v58  ;;  %v2649_v22 = vadd.f32 %v2622_v34, %v2434_v16 }
 0x330   : > { %v2065_v34 = vadd.f32 %v7882_v7, %v7885_v56 }
 0x331   : > { %v3078_v15 = vsel %vm3046_vm10, %v3030_v19, %v3062_v32  ;;  %v6656_v19 = vld [vmem:[#allocation3 + $0x490] sm:$0xff]  ;;  %v2415_v32 = vpop.f32.mrf.mxu3 }
 0x332   : > { %v6955_v40 = vpack.c.bf16 %v3078_v15, %v3077_v47  ;;  %v2979_v46 = vpop.f32.mrf.mxu2  ;;  %3954 = vmatpush.bf16.msra.mxu3 %v6656_v19  ;;  %v2287_v30 = vadd.f32 %v7904_v44, %v2065_v34 }
 0x333   : > { %v3010_v13 = vadd.f32 %v2979_v46, %v2795_v49  ;;  %v2435_v49 = vadd.f32 %v2410_v57, %v7895_v1 }
 0x334   : > { %7131 = vst [vmem:[#allocation2 + $0x28] sm:$0xff] %v6955_v40   ;;  %3291 = vmatmul.bf16.gmra.mxu3 %v6955_v40  ;;  %v2436_v7 = vadd.f32 %v2412_v18, %v2287_v30 }
 0x335   : > { %v3031_v31 = vadd.f32 %v7937_v5, %v3010_v13 }
 0x336   : > { %v7970_v6 = vpop.f32.mrf.mxu0  ;;  %v2771_v63 = vpop.f32.mrf.mxu1 }
 0x337   : > { %v3063_v14 = vmul.f32 0.2, %v3031_v31  ;;  %vm3047_vm11 = vcmp.gt.f32.partialorder %v3031_v31, 0.0  ;;  %v2798_v43 = vadd.f32 %v2771_v63, %v2649_v22  ;;  %v2650_v25 = vadd.f32 %v7970_v6, %v2435_v49  ;;  %v6671_v22 = vld [vmem:[#allocation3 + $0x4c8] sm:$0xff]  ;;  %v6686_v49 = vld [vmem:[#allocation3 + $0x500] sm:$0xff] }
 0x339   : > { %v3079_v35 = vsel %vm3047_vm11, %v3031_v31, %v3063_v14 }
 0x33a   : > { %v2981_v55 = vpop.f32.mrf.mxu2 }
 0x33b   : > { %v3011_v20 = vadd.f32 %v2981_v55, %v2796_v50  ;;  %v7306_v3 = vld [vmem:[#allocation2 + $0x24] sm:$0xff]  }
 0x33c   : > { %v6616_v10 = vld [vmem:[#allocation2 + $0x24] sm:$0xff]  ;;  %3406 = vmatmul.bf16.gmra.mxu0 %v7306_v3  ;;  %v2417_v3 = vpop.f32.mrf.mxu3 }
 0x33d   : > { %v6632_v53 = vld [vmem:[#allocation2 + $0x28] sm:$0xff]  ;;  %v3032_v4 = vadd.f32 %v7937_v5, %v3011_v20  ;;  %3579 = vmatmul.bf16.gmra.mxu1 %v6616_v10  ;;  %v6672_v55 = vld [vmem:[#allocation3 + $0x4d0] sm:$0xff]  ;;  %v6655_v10 = vld [vmem:[#allocation3 + $0x488] sm:$0xff] }
 0x33e   : > { %3773 = vmatmul.bf16.gmra.mxu2 %v6632_v53  ;;  %v2627_v12 = vpop.f32.mrf.mxu0  ;;  %v2774_v39 = vpop.f32.mrf.mxu1  ;;  %v6688_v20 = vld [vmem:[#allocation3 + $0x510] sm:$0xff]  ;;  %4148 = vmatpush.bf16.msrb.mxu0 %v6672_v55 }
 0x33f   : > { %vm3048_vm12 = vcmp.gt.f32.partialorder %v3032_v4, 0.0  ;;  %v3064_v17 = vmul.f32 0.2, %v3032_v4  ;;  %v2799_v61 = vadd.f32 %v2774_v39, %v2650_v25  ;;  %4342 = vmatpush.bf16.msrb.mxu1 %v6688_v20  ;;  %v2651_v1 = vadd.f32 %v2627_v12, %v2436_v7  ;;  %3955 = vmatpush.bf16.msra.mxu3 %v6655_v10 }
 0x340   : > { %v2070_v12 = vadd.f32 %v7899_v62, %v7893_v33  ;;  %v6687_v33 = vld [vmem:[#allocation3 + $0x508] sm:$0xff]  ;;  %v6654_v62 = vld [vmem:[#allocation3 + $0x480] sm:$0xff] }
 0x341   : > { %v3080_v8 = vsel %vm3048_vm12, %v3032_v4, %v3064_v17 }
 0x342   : > { %v6960_v27 = vpack.c.bf16 %v3080_v8, %v3079_v35  ;;  %v2984_v23 = vpop.f32.mrf.mxu2  ;;  %v2437_v35 = vadd.f32 %v2415_v32, %v7911_v24  ;;  %4149 = vmatpush.bf16.msrb.mxu0 %v6671_v22 }
 0x343   : > { %v3012_v2 = vadd.f32 %v2984_v23, %v2797_v29  ;;  %4343 = vmatpush.bf16.msrb.mxu1 %v6687_v33  ;;  %3956 = vmatpush.bf16.msra.mxu3 %v6654_v62  ;;  %v6647_v33 = vld [vmem:[#allocation2 + $0x24] sm:$0xff] }
 0x344   : > { %7132 = vst [vmem:[#allocation2 + $0x30] sm:$0xff] %v6960_v27   ;;  %3296 = vmatmul.bf16.gmra.mxu3 %v6960_v27  ;;  %v2420_v17 = vpop.f32.mrf.mxu3  ;;  %v2289_v27 = vadd.f32 %v7917_v11, %v2070_v12  ;;  %v6670_v11 = vld [vmem:[#allocation3 + $0x4c0] sm:$0xff]  ;;  %v6663_v62 = vld [vmem:[#allocation2 + $0x28] sm:$0xff] }
 0x345   : > { %v3033_v21 = vadd.f32 %v7937_v5, %v3012_v2  ;;  %v2439_v30 = vadd.f32 %v2420_v17, %v7922_v26 }
 0x346   : > { %v2630_v37 = vpop.f32.mrf.mxu0  ;;  %v2776_v36 = vpop.f32.mrf.mxu1  ;;  %v2438_v24 = vadd.f32 %v2417_v3, %v2289_v27  ;;  %4150 = vmatpush.bf16.msrb.mxu0 %v6670_v11 }
 0x347   : > { %v3065_v40 = vmul.f32 0.2, %v3033_v21  ;;  %vm3049_vm13 = vcmp.gt.f32.partialorder %v3033_v21, 0.0  ;;  %v2800_v44 = vadd.f32 %v2776_v36, %v2651_v1  ;;  %v2652_v23 = vadd.f32 %v2630_v37, %v2437_v35  ;;  %4344 = vmatpush.bf16.msrb.mxu1 %v6686_v49 }
 0x349   : > { %v3081_v13 = vsel %vm3049_vm13, %v3033_v21, %v3065_v40  ;;  %vm4526_vm13 = vcmask 1040384  }
 0x34a   : > { %v2986_v28 = vpop.f32.mrf.mxu2 }
 0x34b   : > { %v3013_v51 = vadd.f32 %v2986_v28, %v2798_v43  ;;  %v7308_v60 = vld [vmem:[#allocation2 + $0x2c] sm:$0xff]  }
 0x34c   : > { %v6617_v47 = vld [vmem:[#allocation2 + $0x2c] sm:$0xff]  ;;  %3411 = vmatmul.bf16.gmra.mxu0 %v7308_v60  ;;  %v2422_v21 = vpop.f32.mrf.mxu3 }
 0x34d   : > { %v6633_v15 = vld [vmem:[#allocation2 + $0x30] sm:$0xff]  ;;  %v3034_v46 = vadd.f32 %v7937_v5, %v3013_v51  ;;  %3584 = vmatmul.bf16.gmra.mxu1 %v6617_v47 }
 0x34e   : > { %3778 = vmatmul.bf16.gmra.mxu2 %v6633_v15  ;;  %v2632_v63 = vpop.f32.mrf.mxu0  ;;  %v2779_v57 = vpop.f32.mrf.mxu1 }
 0x34f   : > { %vm3050_vm14 = vcmp.gt.f32.partialorder %v3034_v46, 0.0  ;;  %v3066_v9 = vmul.f32 0.2, %v3034_v46  ;;  %v2801_v2 = vadd.f32 %v2779_v57, %v2652_v23  ;;  %v2653_v37 = vadd.f32 %v2632_v63, %v2438_v24  ;;  %v6646_v23 = vld [vmem:[#allocation2 + $0x1c] sm:$0xff] }
 0x351   : > { %v3082_v45 = vsel %vm3050_vm14, %v3034_v46, %v3066_v9  ;;  %v2075_v9 = vadd.f32 %v7913_v59, %v7909_v52  ;;  %vm4527_vm14 = vsmask.f32 256 }
 0x352   : > { %v6965_v50 = vpack.c.bf16 %v3082_v45, %v3081_v13  ;;  %v2989_v31 = vpop.f32.mrf.mxu2 }
 0x353   : > { %v3014_v56 = vadd.f32 %v2989_v31, %v2799_v61  ;;  %v2291_v31 = vadd.f32 %v7924_v41, %v2075_v9 }
 0x354   : > { %7133 = vst [vmem:[#allocation2 + $0x38] sm:$0xff] %v6965_v50   ;;  %3301 = vmatmul.bf16.gmra.mxu3 %v6965_v50  ;;  %v3277_v45 = vpop.f32.mrf.mxu3 }
 0x355   : > { %v3035_v6 = vadd.f32 %v7937_v5, %v3014_v56  ;;  %v2440_v56 = vadd.f32 %v2422_v21, %v2291_v31 }
 0x356   : > { %v2635_v58 = vpop.f32.mrf.mxu0  ;;  %v2781_v38 = vpop.f32.mrf.mxu1 }
 0x357   : > { %v3067_v42 = vmul.f32 0.2, %v3035_v6  ;;  %vm3051_vm15 = vcmp.gt.f32.partialorder %v3035_v6, 0.0  ;;  %v2802_v28 = vadd.f32 %v2781_v38, %v2653_v37  ;;  %v2654_v61 = vadd.f32 %v2635_v58, %v2439_v30 }
 0x359   : > { %v3083_v29 = vsel %vm3051_vm15, %v3035_v6, %v3067_v42 }
 0x35a   : > { %v2991_v53 = vpop.f32.mrf.mxu2 }
 0x35b   : > { %v3015_v14 = vadd.f32 %v2991_v53, %v2800_v44  ;;  %v7310_v4 = vld [vmem:[#allocation2 + $0x34] sm:$0xff]  }
 0x35c   : > { %v6618_v0 = vld [vmem:[#allocation2 + $0x34] sm:$0xff]  ;;  %3416 = vmatmul.bf16.gmra.mxu0 %v7310_v4  ;;  %v8007_v27 = vpop.f32.mrf.mxu3 }
 0x35d   : > { %v6634_v48 = vld [vmem:[#allocation2 + $0x38] sm:$0xff]  ;;  %v3036_v18 = vadd.f32 %v7937_v5, %v3015_v14  ;;  %3589 = vmatmul.bf16.gmra.mxu1 %v6618_v0 }
 0x35e   : > { %3783 = vmatmul.bf16.gmra.mxu2 %v6634_v48  ;;  %v2637_v19 = vpop.f32.mrf.mxu0  ;;  %v2784_v46 = vpop.f32.mrf.mxu1  ;;  %v6649_v31 = vld [vmem:[#allocation2 + $0x34] sm:$0xff] }
 0x35f   : > { %vm3052_vm0 = vcmp.gt.f32.partialorder %v3036_v18, 0.0  ;;  %v3068_v8 = vmul.f32 0.2, %v3036_v18  ;;  %v2803_v7 = vadd.f32 %v2784_v46, %v2654_v61  ;;  %v2655_v59 = vadd.f32 %v2637_v19, %v2440_v56  ;;  %v6665_v61 = vld [vmem:[#allocation2 + $0x38] sm:$0xff] }
 0x361   : > { %v3084_v39 = vsel %vm3052_vm0, %v3036_v18, %v3068_v8  ;;  %vm4535_vm0 = vcmask 1041408  }
 0x362   : > { %v7994_v54 = vpack.c.bf16 %v3084_v39, %v3083_v29  ;;  %v2994_v16 = vpop.f32.mrf.mxu2 }
 0x363   : > { %v3016_v43 = vadd.f32 %v2994_v16, %v2801_v2  ;;  %v6678_v2 = vld [vmem:[#allocation2 + $0x24] sm:$0xff] }
 0x364   : > { %7134 = vst [vmem:[#allocation2 + $0x40] sm:$0xff] %v7994_v54   ;;  %3306 = vmatmul.bf16.gmra.mxu3 %v7994_v54  ;;  %v7009_v41 = vunpack.c.h.b16 %v7994_v54 }
 0x365   : > { %v3037_v32 = vadd.f32 %v7937_v5, %v3016_v43 }
 0x366   : > { %v3392_v13 = vpop.f32.mrf.mxu0  ;;  %v2786_v52 = vpop.f32.mrf.mxu1 }
 0x367   : > { %v3069_v36 = vmul.f32 0.2, %v3037_v32  ;;  %vm3053_vm1 = vcmp.gt.f32.partialorder %v3037_v32, 0.0  ;;  %v3393_v50 = vadd.f32 %v3392_v13, %v3277_v45  ;;  %v2804_v26 = vadd.f32 %v2786_v52, %v2655_v59  ;;  %v6680_v45 = vld [vmem:[#allocation2 + $0x34] sm:$0xff] }
 0x369   : > { %v3085_v63 = vsel %vm3053_vm1, %v3037_v32, %v3069_v36  ;;  %vm4536_vm1 = vsmask.f32 1280 }
 0x36a   : > { %v2996_v51 = vpop.f32.mrf.mxu2 }
 0x36b   : > { %v3017_v60 = vadd.f32 %v2996_v51, %v2802_v28  ;;  %v7311_v47 = vld [vmem:[#allocation2 + $0x3c] sm:$0xff]   ;;  %v6679_v51 = vld [vmem:[#allocation2 + $0x2c] sm:$0xff] }
 0x36c   : > { %v6619_v15 = vld [vmem:[#allocation2 + $0x3c] sm:$0xff]  ;;  %3421 = vmatmul.bf16.gmra.mxu0 %v7311_v47  ;;  %v6648_v47 = vld [vmem:[#allocation2 + $0x2c] sm:$0xff] }
 0x36d   : > { %v6635_v40 = vld [vmem:[#allocation2 + $0x40] sm:$0xff]  ;;  %v3038_v34 = vadd.f32 %v7937_v5, %v3017_v60  ;;  %3594 = vmatmul.bf16.gmra.mxu1 %v6619_v15  ;;  %v6664_v15 = vld [vmem:[#allocation2 + $0x30] sm:$0xff] }
 0x36e   : > { %3788 = vmatmul.bf16.gmra.mxu2 %v6635_v40  ;;  %v8009_v29 = vpop.f32.mrf.mxu0 }
 0x36f   : > { %vm3054_vm2 = vcmp.gt.f32.partialorder %v3038_v34, 0.0  ;;  %v3070_v25 = vmul.f32 0.2, %v3038_v34 }
 0x371   : > { %v3086_v55 = vsel %vm3054_vm2, %v3038_v34, %v3070_v25 }
 0x372   : > { %v6975_v20 = vpack.c.bf16 %v3086_v55, %v3085_v63  ;;  %v2999_v3 = vpop.f32.mrf.mxu2 }
 0x373   : > { %v3018_v1 = vadd.f32 %v2999_v3, %v2803_v7 }
 0x374   : > { %7135 = vst [vmem:[#allocation2 + $0x48] sm:$0xff] %v6975_v20  }
 0x375   : > { %v3039_v57 = vadd.f32 %v7937_v5, %v3018_v1 }
 0x377   : > { %v3071_v0 = vmul.f32 0.2, %v3039_v57  ;;  %vm3055_vm3 = vcmp.gt.f32.partialorder %v3039_v57, 0.0 }
 0x379   : > { %v3087_v58 = vsel %vm3055_vm3, %v3039_v57, %v3071_v0  ;;  %vm8084_vm3 = vmand %vm4526_vm13, %vm4527_vm14 }
 0x37a   : > { %v3001_v44 = vpop.f32.mrf.mxu2 }
 0x37b   : > { %v3019_v6 = vadd.f32 %v3001_v44, %v2804_v26  ;;  %v6620_v10 = vld [vmem:[#allocation2 + $0x44] sm:$0xff]  ;;  %v6681_v26 = vld [vmem:[#allocation2 + $0x3c] sm:$0xff] }
 0x37c   : > { %v6636_v53 = vld [vmem:[#allocation2 + $0x48] sm:$0xff]  ;;  %v6650_v44 = vld [vmem:[#allocation2 + $0x3c] sm:$0xff] }
 0x37d   : > { %v3136_v14 = vld [vmem:[#allocation2 + $0x48] sm:$0xff]   ;;  %v3040_v48 = vadd.f32 %v7937_v5, %v3019_v6  ;;  %3599 = vmatmul.bf16.gmra.mxu1 %v6620_v10  ;;  %v6662_v5 = vld [vmem:[#allocation2 + $0x20] sm:$0xff] }
 0x37e   : > { %v3202_v4 = vunpack.c.l.b16 %v3136_v14  ;;  %3793 = vmatmul.bf16.gmra.mxu2 %v6636_v53  ;;  %3311 = vmatmul.bf16.gmra.mxu3 %v3136_v14  ;;  %v6666_v6 = vld [vmem:[#allocation2 + $0x40] sm:$0xff] }
 0x37f   : > { %vm3056_vm4 = vcmp.gt.f32.partialorder %v3040_v48, 0.0  ;;  %v3072_v42 = vmul.f32 0.2, %v3040_v48 }
 0x380   : > { %v3326_v17 = vpack.c.b16 %v3202_v4, %v7009_v41 }
 0x381   : > { %v3088_v18 = vsel %vm3056_vm4, %v3040_v48, %v3072_v42  ;;  %v6682_v42 = vld [vmem:[#allocation2 + $0x44] sm:$0xff]  ;;  %vm8091_vm4 = vmand %vm4535_vm0, %vm4536_vm1 }
 0x382   : > { %3426 = vmatmul.bf16.gmra.mxu0 %v3326_v17  ;;  %v6980_v12 = vpack.c.bf16 %v3088_v18, %v3087_v58  ;;  %v6651_v18 = vld [vmem:[#allocation2 + $0x44] sm:$0xff] }
 0x384   : > { %7136 = vst [vmem:[#allocation2 + $0x50] sm:$0xff] %v6980_v12   ;;  %v6667_v12 = vld [vmem:[#allocation2 + $0x48] sm:$0xff] }
 0x38b   : > { %v6621_v35 = vld [vmem:[#allocation2 + $0x4c] sm:$0xff] }
 0x38c   : > { %v6637_v8 = vld [vmem:[#allocation2 + $0x50] sm:$0xff] }
 0x38d   : > { %3604 = vmatmul.bf16.gmra.mxu1 %v6621_v35 }
 0x38e   : > { %3798 = vmatmul.bf16.gmra.mxu2 %v6637_v8  ;;  %3957 = vmatmul.bf16.vlgmr.msra.gmra.mxu3 %v6646_v23 }
 0x392   : > { %4151 = vmatmul.bf16.vlgmr.msrb.gmra.mxu0 %v6662_v5 }
 0x397   : > { %v3282_v39 = vpop.f32.mrf.mxu3 }
 0x399   : > { %v3397_v38 = vpop.f32.mrf.mxu0 }
 0x39a   : > { %v3570_v54 = vpop.f32.mrf.mxu1  ;;  %v3398_v22 = vadd.f32 %v3397_v38, %v3282_v39 }
 0x39b   : > { %v8011_v16 = vadd.f32 %v3570_v54, %v3393_v50 }
 0x39d   : > { %4345 = vmatmul.bf16.vlgmr.msrb.gmra.mxu1 %v6678_v2 }
 0x39e   : > { %3962 = vmatmul.bf16.gmra.mxu3 %v6647_v33  ;;  %v6683_v33 = vld [vmem:[#allocation2 + $0x4c] sm:$0xff] }
 0x39f   : > { %v3284_v24 = vpop.f32.mrf.mxu3 }
 0x3a1   : > { %v3399_v43 = vpop.f32.mrf.mxu0 }
 0x3a2   : > { %4156 = vmatmul.bf16.gmra.mxu0 %v6663_v62  ;;  %v8013_v11 = vpop.f32.mrf.mxu1  ;;  %v3400_v21 = vadd.f32 %v3399_v43, %v3284_v24  ;;  %v6709_v24 = vld [vmem:[#allocation3 + $0x5b8] sm:$0xff] }
 0x3a3   : > { %v6652_v43 = vld [vmem:[#allocation2 + $0x4c] sm:$0xff]  ;;  %4650 = vmatpush.bf16.msrb.mxu2 %v6709_v24 }
 0x3a7   : > { %v3287_v37 = vpop.f32.mrf.mxu3 }
 0x3a9   : > { %v3402_v19 = vpop.f32.mrf.mxu0 }
 0x3aa   : > { %v3575_v28 = vpop.f32.mrf.mxu1  ;;  %v3403_v60 = vadd.f32 %v3402_v19, %v3287_v37  ;;  %v3764_v37 = vpop.f32.mrf.mxu2 }
 0x3ab   : > { %v8015_v32 = vadd.f32 %v3575_v28, %v3398_v22 }
 0x3ad   : > { %4350 = vmatmul.bf16.gmra.mxu1 %v6679_v51 }
 0x3ae   : > { %3967 = vmatmul.bf16.gmra.mxu3 %v6648_v47 }
 0x3af   : > { %v3289_v40 = vpop.f32.mrf.mxu3 }
 0x3b1   : > { %v3404_v46 = vpop.f32.mrf.mxu0 }
 0x3b2   : > { %4161 = vmatmul.bf16.gmra.mxu0 %v6664_v15  ;;  %v3577_v36 = vpop.f32.mrf.mxu1  ;;  %v3405_v49 = vadd.f32 %v3404_v46, %v3289_v40  ;;  %v3766_v15 = vpop.f32.mrf.mxu2 }
 0x3b3   : > { %v8017_v34 = vadd.f32 %v3577_v36, %v3400_v21  ;;  %v6668_v21 = vld [vmem:[#allocation2 + $0x50] sm:$0xff] }
 0x3b4   : > { %v6684_v36 = vld [vmem:[#allocation2 + $0x54] sm:$0xff] }
 0x3b7   : > { %v3292_v9 = vpop.f32.mrf.mxu3 }
 0x3b9   : > { %v3407_v30 = vpop.f32.mrf.mxu0 }
 0x3ba   : > { %v3580_v25 = vpop.f32.mrf.mxu1  ;;  %v3408_v50 = vadd.f32 %v3407_v30, %v3292_v9  ;;  %v6653_v30 = vld [vmem:[#allocation2 + $0x54] sm:$0xff] }
 0x3bb   : > { %v8019_v13 = vadd.f32 %v3580_v25, %v3403_v60 }
 0x3bd   : > { %4355 = vmatmul.bf16.gmra.mxu1 %v6680_v45  ;;  %v6701_v45 = vld [vmem:[#allocation3 + $0x578] sm:$0xff] }
 0x3be   : > { %3972 = vmatmul.bf16.gmra.mxu3 %v6649_v31 }
 0x3bf   : > { %v3294_v63 = vpop.f32.mrf.mxu3  ;;  %4711 = vmatpush.bf16.msrb.mxu3 %v6701_v45 }
 0x3c1   : > { %v3409_v55 = vpop.f32.mrf.mxu0 }
 0x3c2   : > { %4166 = vmatmul.bf16.gmra.mxu0 %v6665_v61  ;;  %v3582_v20 = vpop.f32.mrf.mxu1  ;;  %v3410_v7 = vadd.f32 %v3409_v55, %v3294_v63 }
 0x3c3   : > { %v8021_v3 = vadd.f32 %v3582_v20, %v3405_v49  ;;  %v6669_v49 = vld [vmem:[#allocation2 + $0x58] sm:$0xff]  ;;  %v3769_v20 = vpop.f32.mrf.mxu2 }
 0x3c7   : > { %v3297_v56 = vpop.f32.mrf.mxu3 }
 0x3c9   : > { %v3412_v1 = vpop.f32.mrf.mxu0 }
 0x3ca   : > { %v3585_v52 = vpop.f32.mrf.mxu1  ;;  %v3413_v57 = vadd.f32 %v3412_v1, %v3297_v56  ;;  %v6685_v56 = vld [vmem:[#allocation2 + $0x5c] sm:$0xff] }
 0x3cb   : > { %v8023_v59 = vadd.f32 %v3585_v52, %v3408_v50  ;;  %v6708_v50 = vld [vmem:[#allocation3 + $0x5b0] sm:$0xff] }
 0x3cc   : > { %4651 = vmatpush.bf16.msrb.mxu2 %v6708_v50 }
 0x3cd   : > { %4360 = vmatmul.bf16.gmra.mxu1 %v6681_v26 }
 0x3ce   : > { %3977 = vmatmul.bf16.gmra.mxu3 %v6650_v44 }
 0x3cf   : > { %v3299_v10 = vpop.f32.mrf.mxu3 }
 0x3d1   : > { %v3414_v53 = vpop.f32.mrf.mxu0 }
 0x3d2   : > { %4171 = vmatmul.bf16.gmra.mxu0 %v6666_v6  ;;  %v3587_v14 = vpop.f32.mrf.mxu1  ;;  %v3415_v8 = vadd.f32 %v3414_v53, %v3299_v10  ;;  %v3771_v6 = vpop.f32.mrf.mxu2  ;;  %v6700_v10 = vld [vmem:[#allocation3 + $0x570] sm:$0xff]  ;;  %v6707_v53 = vld [vmem:[#allocation3 + $0x5a8] sm:$0xff] }
 0x3d3   : > { %v8025_v41 = vadd.f32 %v3587_v14, %v3410_v7  ;;  %4712 = vmatpush.bf16.msrb.mxu3 %v6700_v10  ;;  %4652 = vmatpush.bf16.msrb.mxu2 %v6707_v53 }
 0x3d7   : > { %v3302_v4 = vpop.f32.mrf.mxu3 }
 0x3d9   : > { %v3417_v0 = vpop.f32.mrf.mxu0 }
 0x3da   : > { %v3590_v48 = vpop.f32.mrf.mxu1  ;;  %v3418_v58 = vadd.f32 %v3417_v0, %v3302_v4 }
 0x3db   : > { %v8027_v17 = vadd.f32 %v3590_v48, %v3413_v57  ;;  %v3804_v48 = vadd.f32 %v3764_v37, %v8011_v16 }
 0x3dd   : > { %4365 = vmatmul.bf16.gmra.mxu1 %v6682_v42 }
 0x3de   : > { %3982 = vmatmul.bf16.gmra.mxu3 %v6651_v18 }
 0x3df   : > { %v3304_v35 = vpop.f32.mrf.mxu3 }
 0x3e1   : > { %v3419_v23 = vpop.f32.mrf.mxu0 }
 0x3e2   : > { %4176 = vmatmul.bf16.gmra.mxu0 %v6667_v12  ;;  %v3592_v5 = vpop.f32.mrf.mxu1  ;;  %v3420_v19 = vadd.f32 %v3419_v23, %v3304_v35  ;;  %v3774_v35 = vpop.f32.mrf.mxu2 }
 0x3e3   : > { %v8029_v39 = vadd.f32 %v3592_v5, %v3415_v8  ;;  %v3808_v10 = vadd.f32 %v3774_v35, %v8019_v13 }
 0x3e7   : > { %v3307_v38 = vpop.f32.mrf.mxu3 }
 0x3e9   : > { %v3422_v54 = vpop.f32.mrf.mxu0 }
 0x3ea   : > { %v3595_v2 = vpop.f32.mrf.mxu1  ;;  %v3423_v62 = vadd.f32 %v3422_v54, %v3307_v38 }
 0x3eb   : > { %v8031_v22 = vadd.f32 %v3595_v2, %v3418_v58  ;;  %v3395_v58 = vadd.f32 %v8009_v29, %v8007_v27  ;;  %v6699_v27 = vld [vmem:[#allocation3 + $0x568] sm:$0xff]  ;;  %v6706_v29 = vld [vmem:[#allocation3 + $0x5a0] sm:$0xff] }
 0x3ec   : > { %4713 = vmatpush.bf16.msrb.mxu3 %v6699_v27  ;;  %4653 = vmatpush.bf16.msrb.mxu2 %v6706_v29  ;;  %v6703_v27 = vld [vmem:[#allocation3 + $0x588] sm:$0xff] }
 0x3ed   : > { %4370 = vmatmul.bf16.gmra.mxu1 %v6683_v33  ;;  %v3611_v12 = vadd.f32 %v8013_v11, %v3395_v58  ;;  %v8050_v33 = vld [vmem:[%s8212_s3 + $0x3] ss:$0 sm:$0xff]  ;;  %v3776_v11 = vpop.f32.mrf.mxu2 }
 0x3ee   : > { %3987 = vmatmul.bf16.gmra.mxu3 %v6652_v43 }
 0x3ef   : > { %v3309_v40 = vpop.f32.mrf.mxu3  ;;  %v3805_v23 = vadd.f32 %v3766_v15, %v3611_v12 }
 0x3f1   : > { %v3424_v60 = vpop.f32.mrf.mxu0 }
 0x3f2   : > { %4181 = vmatmul.bf16.gmra.mxu0 %v6668_v21  ;;  %v3597_v28 = vpop.f32.mrf.mxu1  ;;  %v3425_v25 = vadd.f32 %v3424_v60, %v3309_v40 }
 0x3f3   : > { %v8033_v51 = vadd.f32 %v3597_v28, %v3420_v19  ;;  %v3806_v19 = vadd.f32 %v3769_v20, %v8015_v32 }
 0x3fa   : > { %v3600_v47 = vpop.f32.mrf.mxu1 }
 0x3fb   : > { %v8035_v46 = vadd.f32 %v3600_v47, %v3423_v62 }
 0x3fd   : > { %4375 = vmatmul.bf16.gmra.mxu1 %v6684_v36 }
 0x3fe   : > { %3992 = vmatmul.bf16.gmra.mxu3 %v6653_v30 }
 0x3ff   : > { %v3427_v9 = vpop.f32.mrf.mxu0 }
 0x401   : > { %v3312_v61 = vpop.f32.mrf.mxu3 }
 0x402   : > { %4186 = vmatmul.bf16.gmra.mxu0 %v6669_v49  ;;  %v3602_v31 = vpop.f32.mrf.mxu1  ;;  %v3428_v55 = vadd.f32 %v3427_v9, %v3312_v61 }
 0x403   : > { %v8037_v63 = vadd.f32 %v3602_v31, %v3425_v25  ;;  %v3807_v25 = vadd.f32 %v3771_v6, %v8017_v34  ;;  %v3779_v31 = vpop.f32.mrf.mxu2 }
 0x407   : > { %v3429_v7 = vpop.f32.mrf.mxu0 }
 0x409   : > { %v3314_v52 = vpop.f32.mrf.mxu3 }
 0x40a   : > { %v3605_v1 = vpop.f32.mrf.mxu1  ;;  %v3430_v57 = vadd.f32 %v3429_v7, %v3314_v52 }
 0x40b   : > { %v8039_v26 = vadd.f32 %v3605_v1, %v3428_v55  ;;  %v6705_v1 = vld [vmem:[#allocation3 + $0x598] sm:$0xff] }
 0x40c   : > { %4654 = vmatpush.bf16.msrb.mxu2 %v6705_v1 }
 0x40d   : > { %4380 = vmatmul.bf16.gmra.mxu1 %v6685_v56  ;;  %v6698_v56 = vld [vmem:[#allocation3 + $0x560] sm:$0xff] }
 0x40e   : > { %4714 = vmatpush.bf16.msrb.mxu3 %v6698_v56  ;;  %v6715_v56 = vld [vmem:[#allocation3 + $0x5e8] sm:$0xff] }
 0x40f   : > { %v4152_v44 = vpop.f32.mrf.mxu0 }
 0x411   : > { %v3958_v0 = vpop.f32.mrf.mxu3 }
 0x412   : > { %v3607_v14 = vpop.f32.mrf.mxu1  ;;  %v3998_v18 = vadd.f32 %v3958_v0, %v3804_v48 }
 0x413   : > { %v8041_v4 = vadd.f32 %v3607_v14, %v3430_v57  ;;  %v3781_v14 = vpop.f32.mrf.mxu2 }
 0x414   : > { %v4192_v38 = vadd.f32 %v4152_v44, %v3998_v18 }
 0x417   : > { %v4154_v42 = vpop.f32.mrf.mxu0 }
 0x419   : > { %v3960_v5 = vpop.f32.mrf.mxu3 }
 0x41a   : > { %v4346_v8 = vpop.f32.mrf.mxu1  ;;  %v3999_v54 = vadd.f32 %v3960_v5, %v3805_v23 }
 0x41b   : > { %v4386_v2 = vadd.f32 %v4346_v8, %v4192_v38  ;;  %v3809_v8 = vadd.f32 %v3776_v11, %v8021_v3  ;;  %v3810_v3 = vadd.f32 %v3779_v31, %v8023_v59  ;;  %v3811_v59 = vadd.f32 %v3781_v14, %v8025_v41 }
 0x41c   : > { %v4193_v24 = vadd.f32 %v4154_v42, %v3999_v54  ;;  %v6704_v54 = vld [vmem:[#allocation3 + $0x590] sm:$0xff] }
 0x41d   : > { %v4407_v62 = vadd.f32 %v8050_v33, %v4386_v2  ;;  %4655 = vmatpush.bf16.msrb.mxu2 %v6704_v54  ;;  %v3784_v2 = vpop.f32.mrf.mxu2 }
 0x41f   : > { %v4157_v16 = vpop.f32.mrf.mxu0  ;;  %v4439_v28 = vmul.f32 0.2, %v4407_v62  ;;  %vm4423_vm5 = vcmp.gt.f32.partialorder %v4407_v62, 0.0 }
 0x421   : > { %v3963_v21 = vpop.f32.mrf.mxu3  ;;  %v4455_v36 = vsel %vm4423_vm5, %v4407_v62, %v4439_v28  ;;  %4656 = vmatpush.bf16.msrb.mxu2 %v6703_v27  ;;  %v6696_v28 = vld [vmem:[#allocation3 + $0x550] sm:$0xff] }
 0x422   : > { %v4348_v43 = vpop.f32.mrf.mxu1  ;;  %v4000_v15 = vadd.f32 %v3963_v21, %v3806_v19 }
 0x423   : > { %v4387_v37 = vadd.f32 %v4348_v43, %v4193_v24  ;;  %v6697_v24 = vld [vmem:[#allocation3 + $0x558] sm:$0xff] }
 0x424   : > { %v4194_v50 = vadd.f32 %v4157_v16, %v4000_v15  ;;  %4715 = vmatpush.bf16.msrb.mxu3 %v6697_v24  ;;  %v6723_v24 = vld [vmem:[#allocation3 + $0x628] sm:$0xff] }
 0x425   : > { %v4408_v60 = vadd.f32 %v8050_v33, %v4387_v37 }
 0x427   : > { %v4159_v47 = vpop.f32.mrf.mxu0  ;;  %vm4424_vm6 = vcmp.gt.f32.partialorder %v4408_v60, 0.0  ;;  %v4440_v40 = vmul.f32 0.2, %v4408_v60 }
 0x428   : > { %4716 = vmatpush.bf16.msrb.mxu3 %v6696_v28 }
 0x429   : > { %v4456_v49 = vsel %vm4424_vm6, %v4408_v60, %v4440_v40  ;;  %v3965_v45 = vpop.f32.mrf.mxu3  ;;  %v6702_v60 = vld [vmem:[#allocation3 + $0x580] sm:$0xff]  ;;  %v6717_v40 = vld [vmem:[#allocation3 + $0x5f8] sm:$0xff] }
 0x42a   : > { %v7013_v9 = vpack.c.bf16 %v4456_v49, %v4455_v36  ;;  %v4351_v30 = vpop.f32.mrf.mxu1  ;;  %v4001_v61 = vadd.f32 %v3965_v45, %v3807_v25  ;;  %4657 = vmatpush.bf16.msrb.mxu2 %v6702_v60  ;;  %v3786_v45 = vpop.f32.mrf.mxu2  ;;  %v6710_v60 = vld [vmem:[#allocation3 + $0x5c0] sm:$0xff] }
 0x42b   : > { %v4388_v32 = vadd.f32 %v4351_v30, %v4194_v50 }
 0x42c   : > { %7178 = vst [vmem:[#allocation2 + $0x18] sm:$0xff] %v7013_v9   ;;  %v4195_v7 = vadd.f32 %v4159_v47, %v4001_v61  ;;  %v6695_v9 = vld [vmem:[#allocation3 + $0x548] sm:$0xff]  ;;  %v6716_v61 = vld [vmem:[#allocation3 + $0x5f0] sm:$0xff] }
 0x42d   : > { %v4409_v20 = vadd.f32 %v8050_v33, %v4388_v32  ;;  %4717 = vmatpush.bf16.msrb.mxu3 %v6695_v9 }
 0x42e   : > { %4809 = vmatpush.bf16.msra.mxu2 %v6717_v40 }
 0x42f   : > { %v4162_v55 = vpop.f32.mrf.mxu0  ;;  %v4441_v34 = vmul.f32 0.2, %v4409_v20  ;;  %vm4425_vm7 = vcmp.gt.f32.partialorder %v4409_v20, 0.0 }
 0x431   : > { %v3968_v57 = vpop.f32.mrf.mxu3  ;;  %v4457_v42 = vsel %vm4425_vm7, %v4409_v20, %v4441_v34 }
 0x432   : > { %v4353_v52 = vpop.f32.mrf.mxu1  ;;  %v4002_v0 = vadd.f32 %v3968_v57, %v3808_v10  ;;  %4810 = vmatpush.bf16.msra.mxu2 %v6716_v61  ;;  %v6714_v57 = vld [vmem:[#allocation3 + $0x5e0] sm:$0xff] }
 0x433   : > { %v4389_v44 = vadd.f32 %v4353_v52, %v4195_v7  ;;  %v6694_v7 = vld [vmem:[#allocation3 + $0x540] sm:$0xff] }
 0x434   : > { %v4196_v5 = vadd.f32 %v4162_v55, %v4002_v0  ;;  %4718 = vmatpush.bf16.msrb.mxu3 %v6694_v7 }
 0x435   : > { %v4410_v6 = vadd.f32 %v8050_v33, %v4389_v44  ;;  %v6725_v44 = vld [vmem:[#allocation3 + $0x638] sm:$0xff] }
 0x436   : > { %4811 = vmatpush.bf16.msra.mxu2 %v6715_v56 }
 0x437   : > { %v4164_v53 = vpop.f32.mrf.mxu0  ;;  %vm4426_vm8 = vcmp.gt.f32.partialorder %v4410_v6, 0.0  ;;  %v4442_v48 = vmul.f32 0.2, %v4410_v6 }
 0x438   : > { %4908 = vmatpush.bf16.msra.mxu3 %v6725_v44 }
 0x439   : > { %v4458_v58 = vsel %vm4426_vm8, %v4410_v6, %v4442_v48  ;;  %v3970_v23 = vpop.f32.mrf.mxu3  ;;  %v3812_v6 = vadd.f32 %v3784_v2, %v8027_v17  ;;  %v3813_v17 = vadd.f32 %v3786_v45, %v8029_v39  ;;  %v6712_v2 = vld [vmem:[#allocation3 + $0x5d0] sm:$0xff] }
 0x43a   : > { %v7018_v18 = vpack.c.bf16 %v4458_v58, %v4457_v42  ;;  %v4356_v12 = vpop.f32.mrf.mxu1  ;;  %v4003_v38 = vadd.f32 %v3970_v23, %v3809_v8  ;;  %4812 = vmatpush.bf16.msra.mxu2 %v6714_v57 }
 0x43b   : > { %v4390_v13 = vadd.f32 %v4356_v12, %v4196_v5  ;;  %v6724_v12 = vld [vmem:[#allocation3 + $0x630] sm:$0xff]  ;;  %v8067_v5 = vld [vmem:[#allocation2 + $0x10] sm:$0x1] }
 0x43c   : > { %7179 = vst [vmem:[#allocation2 + $0x20] sm:$0xff] %v7018_v18   ;;  %v4197_v62 = vadd.f32 %v4164_v53, %v4003_v38  ;;  %v3789_v53 = vpop.f32.mrf.mxu2  ;;  %v6713_v18 = vld [vmem:[#allocation3 + $0x5d8] sm:$0xff]  ;;  %4909 = vmatpush.bf16.msra.mxu3 %v6724_v12 }
 0x43d   : > { %v4411_v16 = vadd.f32 %v8050_v33, %v4390_v13 }
 0x43e   : > { %4813 = vmatpush.bf16.msra.mxu2 %v6713_v18  ;;  %v8101_v18 = vld [vmem:[#allocation2 + $0x18] sm:$0x1] }
 0x43f   : > { %v4167_v35 = vpop.f32.mrf.mxu0  ;;  %v4443_v11 = vmul.f32 0.2, %v4411_v16  ;;  %vm4427_vm9 = vcmp.gt.f32.partialorder %v4411_v16, 0.0 }
 0x440   : > { %4910 = vmatpush.bf16.msra.mxu3 %v6723_v24 }
 0x441   : > { %v3973_v43 = vpop.f32.mrf.mxu3  ;;  %v4459_v36 = vsel %vm4427_vm9, %v4411_v16, %v4443_v11 }
 0x442   : > { %v4358_v29 = vpop.f32.mrf.mxu1  ;;  %v4004_v47 = vadd.f32 %v3973_v43, %v3810_v3  ;;  %4814 = vmatpush.bf16.msra.mxu2 %v6712_v2  ;;  %v6711_v3 = vld [vmem:[#allocation3 + $0x5c8] sm:$0xff] }
 0x443   : > { %v4391_v21 = vadd.f32 %v4358_v29, %v4197_v62  ;;  %v4505_v16 = vld [vmem:[#allocation2 + $0x20] sm:$0x1]  ;;  %v4508_v62 = vunpack.c.l.b16 %v8067_v5 }
 0x444   : > { %v4198_v31 = vadd.f32 %v4167_v35, %v4004_v47  ;;  %v3791_v43 = vpop.f32.mrf.mxu2 }
 0x445   : > { %v4412_v37 = vadd.f32 %v8050_v33, %v4391_v21  ;;  %v4515_v21 = vunpack.c.l.b16 %v4505_v16 }
 0x446   : > { %4815 = vmatpush.bf16.msra.mxu2 %v6711_v3 }
 0x447   : > { %v4169_v19 = vpop.f32.mrf.mxu0  ;;  %vm4428_vm10 = vcmp.gt.f32.partialorder %v4412_v37, 0.0  ;;  %v4444_v15 = vmul.f32 0.2, %v4412_v37  ;;  %v8074_v9 = vpack.c.b16 %v4515_v21, %v4515_v21 }
 0x449   : > { %v4460_v49 = vsel %vm4428_vm10, %v4412_v37, %v4444_v15  ;;  %v3975_v50 = vpop.f32.mrf.mxu3  ;;  %v4509_v37 = vpack.c.b16 %v4508_v62, %v4508_v62  ;;  %v6721_v15 = vld [vmem:[#allocation3 + $0x618] sm:$0xff] }
 0x44a   : > { %v7023_v30 = vpack.c.bf16 %v4460_v49, %v4459_v36  ;;  %v4361_v25 = vpop.f32.mrf.mxu1  ;;  %v4005_v32 = vadd.f32 %v3975_v50, %v3811_v59  ;;  %v3814_v59 = vadd.f32 %v3789_v53, %v8031_v22  ;;  %4816 = vmatpush.bf16.msra.mxu2 %v6710_v60  ;;  %v6740_v60 = vld [vmem:[#allocation3 + $0x6b0] sm:$0xff]  ;;  %v6742_v22 = vld [vmem:[#allocation3 + $0x6c0] sm:$0xff] }
 0x44b   : > { %v4392_v55 = vadd.f32 %v4361_v25, %v4198_v31  ;;  %v4503_v31 = vld [vmem:[#allocation2] sm:$0x1] }
 0x44c   : > { %7180 = vst [vmem:[#allocation2 + $0x28] sm:$0xff] %v7023_v30   ;;  %v4199_v52 = vadd.f32 %v4169_v19, %v4005_v32  ;;  %v6722_v19 = vld [vmem:[#allocation3 + $0x620] sm:$0xff]  ;;  %v4511_v30 = vshll.u32 %v4509_v37, 16 }
 0x44d   : > { %v4413_v1 = vadd.f32 %v8050_v33, %v4392_v55  ;;  %4911 = vmatpush.bf16.msra.mxu3 %v6722_v19 }
 0x44e   : > { %v4529_v56 = vsel %vm8084_vm3, %v4503_v31, %v4511_v30  ;;  %v4556_v30 = vld [vmem:[#allocation2 + $0x8] sm:$0x1] }
 0x44f   : > { %v4172_v20 = vpop.f32.mrf.mxu0  ;;  %v4445_v14 = vmul.f32 0.2, %v4413_v1  ;;  %vm4429_vm11 = vcmp.gt.f32.partialorder %v4413_v1, 0.0 }
 0x451   : > { %v3978_v10 = vpop.f32.mrf.mxu3  ;;  %v4461_v8 = vsel %vm4429_vm11, %v4413_v1, %v4445_v14  ;;  %4912 = vmatpush.bf16.msra.mxu3 %v6721_v15  ;;  %v6720_v1 = vld [vmem:[#allocation3 + $0x610] sm:$0xff] }
 0x452   : > { %v4363_v41 = vpop.f32.mrf.mxu1  ;;  %v4006_v42 = vadd.f32 %v3978_v10, %v3812_v6 }
 0x453   : > { %v4393_v34 = vadd.f32 %v4363_v41, %v4199_v52  ;;  %v3794_v52 = vpop.f32.mrf.mxu2 }
 0x454   : > { %v4200_v54 = vadd.f32 %v4172_v20, %v4006_v42  ;;  %v4517_v20 = vrot.slane %v8074_v9, 7  ;;  %v3816_v19 = vadd.f32 %v3794_v52, %v8035_v46  ;;  %v6739_v46 = vld [vmem:[#allocation3 + $0x6a8] sm:$0xff] }
 0x455   : > { %v4414_v0 = vadd.f32 %v8050_v33, %v4393_v34  ;;  %4913 = vmatpush.bf16.msra.mxu3 %v6720_v1 }
 0x457   : > { %v4174_v48 = vpop.f32.mrf.mxu0  ;;  %vm4430_vm12 = vcmp.gt.f32.partialorder %v4414_v0, 0.0  ;;  %v4446_v58 = vmul.f32 0.2, %v4414_v0 }
 0x459   : > { %v4462_v23 = vsel %vm4430_vm12, %v4414_v0, %v4446_v58  ;;  %v3980_v35 = vpop.f32.mrf.mxu3  ;;  %v3815_v0 = vadd.f32 %v3791_v43, %v8033_v51  ;;  %v4533_v58 = vsel %vm4526_vm13, %v4529_v56, %v4517_v20 }
 0x45a   : > { %v7028_v38 = vpack.c.bf16 %v4462_v23, %v4461_v8  ;;  %v4366_v13 = vpop.f32.mrf.mxu1  ;;  %v4007_v27 = vadd.f32 %v3980_v35, %v3813_v17  ;;  %v8105_v8 = vld [vmem:[#allocation2 + $0x28] sm:$0x1]  ;;  %v6719_v23 = vld [vmem:[#allocation3 + $0x608] sm:$0xff]  ;;  %v4561_v17 = vunpack.c.l.b16 %v8101_v18  ;;  %v6718_v35 = vld [vmem:[#allocation3 + $0x600] sm:$0xff] }
 0x45b   : > { %v4394_v29 = vadd.f32 %v4366_v13, %v4200_v54  ;;  %4914 = vmatpush.bf16.msra.mxu3 %v6719_v23  ;;  %v4568_v51 = vunpack.c.l.b16 %v8105_v8  ;;  %v3796_v3 = vpop.f32.mrf.mxu2  ;;  %v6731_v23 = vld [vmem:[#allocation3 + $0x668] sm:$0xff] }
 0x45c   : > { %7181 = vst [vmem:[#allocation2 + $0x30] sm:$0xff] %v7028_v38   ;;  %v4201_v28 = vadd.f32 %v4174_v48, %v4007_v27  ;;  %v4562_v24 = vpack.c.b16 %v4561_v17, %v4561_v17  ;;  %v3817_v56 = vadd.f32 %v3796_v3, %v8037_v63 }
 0x45d   : > { %v4415_v39 = vadd.f32 %v8050_v33, %v4394_v29  ;;  %v8110_v21 = vpack.c.b16 %v4568_v51, %v4568_v51  ;;  %v6736_v51 = vld [vmem:[#allocation3 + $0x690] sm:$0xff] }
 0x45f   : > { %v4177_v11 = vpop.f32.mrf.mxu0  ;;  %v4447_v45 = vmul.f32 0.2, %v4415_v39  ;;  %vm4431_vm15 = vcmp.gt.f32.partialorder %v4415_v39, 0.0  ;;  %4915 = vmatpush.bf16.msra.mxu3 %v6718_v35 }
 0x461   : > { %v3983_v40 = vpop.f32.mrf.mxu3  ;;  %v4463_v57 = vsel %vm4431_vm15, %v4415_v39, %v4447_v45 }
 0x462   : > { %v4368_v47 = vpop.f32.mrf.mxu1  ;;  %v4008_v32 = vadd.f32 %v3983_v40, %v3814_v59 }
 0x463   : > { %v4395_v36 = vadd.f32 %v4368_v47, %v4201_v28  ;;  %v8072_v49 = vld [vmem:[#allocation2 + $0x30] sm:$0x1]  ;;  %v4564_v47 = vshll.u32 %v4562_v24, 16  ;;  %v4726_v24 = vshll.u32 %v8074_v9, 16 }
 0x464   : > { %v4519_v25 = vunpack.c.l.b16 %v8072_v49  ;;  %v4202_v42 = vadd.f32 %v4177_v11, %v4008_v32 }
 0x465   : > { %v4416_v50 = vadd.f32 %v8050_v33, %v4395_v36  ;;  %v4579_v20 = vsel %vm8084_vm3, %v4556_v30, %v4564_v47 }
 0x466   : > { %v8079_v61 = vpack.c.b16 %v4519_v25, %v4519_v25  ;;  %v4570_v25 = vrot.slane %v8110_v21, 7 }
 0x467   : > { %vm4432_vm2 = vcmp.gt.f32.partialorder %v4416_v50, 0.0  ;;  %v4448_v55 = vmul.f32 0.2, %v4416_v50  ;;  %v4179_v34 = vpop.f32.mrf.mxu0 }
 0x468   : > { %v4522_v7 = vshll.u32 %v8079_v61, 16 }
 0x469   : > { %v4464_v44 = vsel %vm4432_vm2, %v4416_v50, %v4448_v55  ;;  %v3985_v48 = vpop.f32.mrf.mxu3 }
 0x46a   : > { %v7033_v10 = vpack.c.bf16 %v4464_v44, %v4463_v57  ;;  %v4371_v6 = vpop.f32.mrf.mxu1  ;;  %v4524_v53 = vrot.slane %v4522_v7, 7  ;;  %v8097_v14 = vsel %vm8084_vm3, %v4505_v16, %v4522_v7  ;;  %v4009_v38 = vadd.f32 %v3985_v48, %v3815_v0  ;;  %v6741_v16 = vld [vmem:[#allocation3 + $0x6b8] sm:$0xff]  ;;  %v6732_v48 = vld [vmem:[#allocation3 + $0x670] sm:$0xff] }
 0x46b   : > { %v4396_v13 = vadd.f32 %v4371_v6, %v4202_v42  ;;  %v6733_v7 = vld [vmem:[#allocation3 + $0x678] sm:$0xff]  ;;  %v4582_v57 = vsel %vm4526_vm13, %v4579_v20, %v4570_v25 }
 0x46c   : > { %7182 = vst [vmem:[#allocation2 + $0x38] sm:$0xff] %v7033_v10   ;;  %v4538_v12 = vsel %vm8091_vm4, %v4533_v58, %v4524_v53  ;;  %v4203_v2 = vadd.f32 %v4179_v34, %v4009_v38  ;;  %v6738_v10 = vld [vmem:[#allocation3 + $0x6a0] sm:$0xff]  ;;  %v3799_v53 = vpop.f32.mrf.mxu2  ;;  %v6737_v42 = vld [vmem:[#allocation3 + $0x698] sm:$0xff] }
 0x46d   : > { %4719 = vmatmul.bf16.vlgmr.msrb.gmra.mxu3 %v4538_v12  ;;  %v4417_v54 = vadd.f32 %v8050_v33, %v4396_v13 }
 0x46e   : > { %5100 = vmatpush.bf16.msrb.mxu3 %v6741_v16 }
 0x46f   : > { %v4182_v11 = vpop.f32.mrf.mxu0  ;;  %v4449_v39 = vmul.f32 0.2, %v4417_v54  ;;  %vm4433_vm5 = vcmp.gt.f32.partialorder %v4417_v54, 0.0 }
 0x471   : > { %v3988_v27 = vpop.f32.mrf.mxu3  ;;  %v4465_v45 = vsel %vm4433_vm5, %v4417_v54, %v4449_v39  ;;  %v3818_v54 = vadd.f32 %v3799_v53, %v8039_v26  ;;  %v6726_v53 = vld [vmem:[#allocation3 + $0x640] sm:$0xff] }
 0x472   : > { %v4373_v62 = vpop.f32.mrf.mxu1  ;;  %v4010_v40 = vadd.f32 %v3988_v27, %v3816_v19  ;;  %5101 = vmatpush.bf16.msrb.mxu3 %v6740_v60 }
 0x473   : > { %v4397_v29 = vadd.f32 %v4373_v62, %v4203_v2  ;;  %v4559_v43 = vld [vmem:[#allocation2 + $0x38] sm:$0x1] }
 0x474   : > { %v4572_v37 = vunpack.c.l.b16 %v4559_v43  ;;  %v4204_v52 = vadd.f32 %v4182_v11, %v4010_v40  ;;  %v4729_v11 = vrot.slane %v8079_v61, 7  ;;  %v3801_v19 = vpop.f32.mrf.mxu2  ;;  %v4738_v40 = vsel %vm8084_vm3, %v8067_v5, %v4726_v24 }
 0x475   : > { %v4418_v28 = vadd.f32 %v8050_v33, %v4397_v29  ;;  %v6730_v29 = vld [vmem:[#allocation3 + $0x660] sm:$0xff]  ;;  %v3819_v61 = vadd.f32 %v3801_v19, %v8041_v4 }
 0x476   : > { %v8114_v15 = vpack.c.b16 %v4572_v37, %v4572_v37  ;;  %5102 = vmatpush.bf16.msrb.mxu3 %v6739_v46  ;;  %v6735_v37 = vld [vmem:[#allocation3 + $0x688] sm:$0xff] }
 0x477   : > { %vm4434_vm6 = vcmp.gt.f32.partialorder %v4418_v28, 0.0  ;;  %v4450_v36 = vmul.f32 0.2, %v4418_v28  ;;  %v4184_v0 = vpop.f32.mrf.mxu0 }
 0x478   : > { %v4575_v59 = vshll.u32 %v8114_v15, 16 }
 0x479   : > { %v4466_v50 = vsel %vm4434_vm6, %v4418_v28, %v4450_v36  ;;  %v3990_v1 = vpop.f32.mrf.mxu3  ;;  %v6729_v36 = vld [vmem:[#allocation3 + $0x658] sm:$0xff] }
 0x47a   : > { %v7038_v31 = vpack.c.bf16 %v4466_v50, %v4465_v45  ;;  %v4376_v32 = vpop.f32.mrf.mxu1  ;;  %v4577_v55 = vrot.slane %v4575_v59, 7  ;;  %v4011_v34 = vadd.f32 %v3990_v1, %v3817_v56  ;;  %5103 = vmatpush.bf16.msrb.mxu3 %v6738_v10  ;;  %v4741_v45 = vsel %vm4526_vm13, %v4738_v40, %v4729_v11  ;;  %v6734_v50 = vld [vmem:[#allocation3 + $0x680] sm:$0xff]  ;;  %v6727_v56 = vld [vmem:[#allocation3 + $0x648] sm:$0xff] }
 0x47b   : > { %v4398_v6 = vadd.f32 %v4376_v32, %v4204_v52  ;;  %v5029_v40 = vsel %vm8084_vm3, %v8105_v8, %v4575_v59 }
 0x47c   : > { %7183 = vst [vmem:[#allocation2 + $0x40] sm:$0xff] %v7038_v31   ;;  %v4584_v44 = vsel %vm8091_vm4, %v4582_v57, %v4577_v55  ;;  %v4205_v58 = vadd.f32 %v4184_v0, %v4011_v34  ;;  %v6728_v55 = vld [vmem:[#allocation3 + $0x650] sm:$0xff]  ;;  %v4825_v34 = vshll.u32 %v8110_v21, 16 }
 0x47d   : > { %4658 = vmatmul.bf16.vlgmr.msrb.gmra.mxu2 %v4584_v44  ;;  %v4419_v63 = vadd.f32 %v8050_v33, %v4398_v6 }
 0x47e   : > { %5004 = vmatpush.bf16.msrb.mxu2 %v6733_v7  ;;  %5104 = vmatpush.bf16.msrb.mxu3 %v6737_v42  ;;  %v6749_v42 = vld [vmem:[#allocation3 + $0x6f8] sm:$0xff] }
 0x47f   : > { %v4451_v2 = vmul.f32 0.2, %v4419_v63  ;;  %vm4435_vm7 = vcmp.gt.f32.partialorder %v4419_v63, 0.0  ;;  %v4187_v62 = vpop.f32.mrf.mxu0 }
 0x481   : > { %v3993_v38 = vpop.f32.mrf.mxu3  ;;  %v4467_v39 = vsel %vm4435_vm7, %v4419_v63, %v4451_v2 }
 0x482   : > { %v4378_v12 = vpop.f32.mrf.mxu1  ;;  %5005 = vmatpush.bf16.msrb.mxu2 %v6732_v48  ;;  %v4012_v43 = vadd.f32 %v3993_v38, %v3818_v54  ;;  %5105 = vmatpush.bf16.msrb.mxu3 %v6736_v51  ;;  %v4828_v48 = vrot.slane %v8114_v15, 7  ;;  %v5018_v38 = vld [vmem:[#allocation2 + $0x58] sm:$0x1]  ;;  %v6748_v51 = vld [vmem:[#allocation3 + $0x6f0] sm:$0xff] }
 0x483   : > { %v4399_v13 = vadd.f32 %v4378_v12, %v4205_v58  ;;  %v4724_v17 = vld [vmem:[#allocation2 + $0x40] sm:$0x1]  ;;  %v5022_v2 = vunpack.c.l.b16 %v5018_v38 }
 0x484   : > { %v4731_v35 = vunpack.c.l.b16 %v4724_v17  ;;  %v4206_v25 = vadd.f32 %v4187_v62, %v4012_v43  ;;  %v5114_v58 = vld [vmem:[#allocation2 + $0x60] sm:$0x1] }
 0x485   : > { %v4420_v16 = vadd.f32 %v8050_v33, %v4399_v13  ;;  %v5023_v24 = vpack.c.b16 %v5022_v2, %v5022_v2  ;;  %v6744_v15 = vld [vmem:[#allocation3 + $0x6d0] sm:$0xff] }
 0x486   : > { %5006 = vmatpush.bf16.msrb.mxu2 %v6731_v23  ;;  %v8130_v27 = vpack.c.b16 %v4731_v35, %v4731_v35  ;;  %5106 = vmatpush.bf16.msrb.mxu3 %v6735_v37  ;;  %v5118_v35 = vunpack.c.l.b16 %v5114_v58 }
 0x487   : > { %vm4436_vm8 = vcmp.gt.f32.partialorder %v4420_v16, 0.0  ;;  %v4452_v3 = vmul.f32 0.2, %v4420_v16  ;;  %v4189_v5 = vpop.f32.mrf.mxu0  ;;  %v5025_v11 = vshll.u32 %v5023_v24, 16 }
 0x488   : > { %v4734_v26 = vshll.u32 %v8130_v27, 16  ;;  %v5119_v62 = vpack.c.b16 %v5118_v35, %v5118_v35 }
 0x489   : > { %v4468_v28 = vsel %vm4436_vm8, %v4420_v16, %v4452_v3  ;;  %v3995_v30 = vpop.f32.mrf.mxu3  ;;  %v6747_v16 = vld [vmem:[#allocation3 + $0x6e8] sm:$0xff] }
 0x48a   : > { %v7043_v60 = vpack.c.bf16 %v4468_v28, %v4467_v39  ;;  %v4381_v47 = vpop.f32.mrf.mxu1  ;;  %v4736_v9 = vrot.slane %v4734_v26, 7  ;;  %5007 = vmatpush.bf16.msrb.mxu2 %v6730_v29  ;;  %v4013_v31 = vadd.f32 %v3995_v30, %v3819_v61  ;;  %5107 = vmatpush.bf16.msrb.mxu3 %v6734_v50  ;;  %v6746_v29 = vld [vmem:[#allocation3 + $0x6e0] sm:$0xff]  ;;  %v4924_v39 = vrot.slane %v8130_v27, 7  ;;  %v6745_v28 = vld [vmem:[#allocation3 + $0x6d8] sm:$0xff] }
 0x48b   : > { %v4400_v32 = vadd.f32 %v4381_v47, %v4206_v25  ;;  %v5125_v30 = vsel %vm8084_vm3, %v8072_v49, %v4734_v26  ;;  %v6743_v49 = vld [vmem:[#allocation3 + $0x6c8] sm:$0xff] }
 0x48c   : > { %7184 = vst [vmem:[#allocation2 + $0x48] sm:$0xff] %v7043_v60   ;;  %v4743_v46 = vsel %vm8091_vm4, %v4741_v45, %v4736_v9  ;;  %v4207_v4 = vadd.f32 %v4189_v5, %v4013_v31  ;;  %v5027_v9 = vrot.slane %v5025_v11, 7  ;;  %v4936_v50 = vsel %vm4526_vm13, %v8097_v14, %v4924_v39 }
 0x48d   : > { %4817 = vmatmul.bf16.vlgmr.msra.gmra.mxu2 %v4743_v46  ;;  %v4421_v20 = vadd.f32 %v8050_v33, %v4400_v32 }
 0x48e   : > { %5008 = vmatpush.bf16.msrb.mxu2 %v6729_v36 }
 0x48f   : > { %v4453_v44 = vmul.f32 0.2, %v4421_v20  ;;  %vm4437_vm9 = vcmp.gt.f32.partialorder %v4421_v20, 0.0 }
 0x491   : > { %v4469_v12 = vsel %vm4437_vm9, %v4421_v20, %v4453_v44 }
 0x492   : > { %v4383_v7 = vpop.f32.mrf.mxu1  ;;  %5009 = vmatpush.bf16.msrb.mxu2 %v6728_v55 }
 0x493   : > { %v4401_v1 = vadd.f32 %v4383_v7, %v4207_v4  ;;  %v4823_v52 = vld [vmem:[#allocation2 + $0x48] sm:$0x1] }
 0x494   : > { %v4830_v57 = vunpack.c.l.b16 %v4823_v52 }
 0x495   : > { %v4422_v10 = vadd.f32 %v8050_v33, %v4401_v1  ;;  %v4837_v33 = vsel %vm8084_vm3, %v8101_v18, %v4825_v34  ;;  %v5121_v18 = vshll.u32 %v5119_v62, 16  ;;  %v7408_v34 = vld [vmem:[%s8212_s3 + $0x4] ss:$0 sm:$0xff] }
 0x496   : > { %5010 = vmatpush.bf16.msrb.mxu2 %v6727_v56  ;;  %v4831_v6 = vpack.c.b16 %v4830_v57, %v4830_v57  ;;  %v4840_v21 = vsel %vm4526_vm13, %v4837_v33, %v4828_v48 }
 0x497   : > { %vm4438_vm10 = vcmp.gt.f32.partialorder %v4422_v10, 0.0  ;;  %v4454_v0 = vmul.f32 0.2, %v4422_v10  ;;  %v5123_v60 = vrot.slane %v5121_v18, 7 }
 0x498   : > { %v4833_v63 = vshll.u32 %v4831_v6, 16  ;;  %v5020_v37 = vrot.slane %v4831_v6, 7 }
 0x499   : > { %v4470_v23 = vsel %vm4438_vm10, %v4422_v10, %v4454_v0 }
 0x49a   : > { %v7048_v13 = vpack.c.bf16 %v4470_v23, %v4469_v12  ;;  %v4835_v17 = vrot.slane %v4833_v63, 7  ;;  %5011 = vmatpush.bf16.msrb.mxu2 %v6726_v53  ;;  %v5032_v61 = vsel %vm4526_vm13, %v5029_v40, %v5020_v37 }
 0x49b   : > { %v5034_v27 = vsel %vm8091_vm4, %v5032_v61, %v5027_v9 }
 0x49c   : > { %7185 = vst [vmem:[#allocation2 + $0x50] sm:$0xff] %v7048_v13   ;;  %v4842_v54 = vsel %vm8091_vm4, %v4840_v21, %v4835_v17 }
 0x49d   : > { %4916 = vmatmul.bf16.vlgmr.msra.gmra.mxu3 %v4842_v54 }
 0x49e   : > { %5196 = vmatpush.bf16.msra.mxu2 %v6749_v42 }
 0x4a2   : > { %5197 = vmatpush.bf16.msra.mxu2 %v6748_v51 }
 0x4a3   : > { %v4922_v43 = vld [vmem:[#allocation2 + $0x50] sm:$0x1] }
 0x4a4   : > { %v4926_v3 = vunpack.c.l.b16 %v4922_v43 }
 0x4a6   : > { %5198 = vmatpush.bf16.msra.mxu2 %v6747_v16  ;;  %v4927_v19 = vpack.c.b16 %v4926_v3, %v4926_v3 }
 0x4a8   : > { %v4929_v47 = vshll.u32 %v4927_v19, 16  ;;  %v5116_v36 = vrot.slane %v4927_v19, 7 }
 0x4aa   : > { %5199 = vmatpush.bf16.msra.mxu2 %v6746_v29  ;;  %v4931_v25 = vrot.slane %v4929_v47, 7  ;;  %v5128_v45 = vsel %vm4526_vm13, %v5125_v30, %v5116_v36 }
 0x4ab   : > { %v5130_v8 = vsel %vm8091_vm4, %v5128_v45, %v5123_v60 }
 0x4ac   : > { %v4938_v59 = vsel %vm8091_vm4, %v4936_v50, %v4931_v25 }
 0x4ad   : > { %5012 = vmatmul.bf16.vlgmr.msrb.gmra.mxu2 %v4938_v59  ;;  %5108 = vmatmul.bf16.vlgmr.msrb.gmra.mxu3 %v5034_v27 }
 0x4ae   : > { %5200 = vmatpush.bf16.msra.mxu2 %v6745_v28 }
 0x4b2   : > { %5201 = vmatpush.bf16.msra.mxu2 %v6744_v15 }
 0x4b6   : > { %5202 = vmatpush.bf16.msra.mxu2 %v6743_v49 }
 0x4ba   : > { %5203 = vmatpush.bf16.msra.mxu2 %v6742_v22 }
 0x4bd   : > { %5204 = vmatmul.bf16.vlgmr.msra.gmra.mxu2 %v5130_v8 }
 0x4f0   : > { %v4720_v14 = vpop.f32.mrf.mxu3 }
 0x4f8   : > { %v4722_v26 = vpop.f32.mrf.mxu3 }
 0x500   : > { %v4659_v46 = vpop.f32.mrf.mxu2 }
 0x501   : > { %v4721_v41 = vadd.f32 %v4720_v14, %v4659_v46 }
 0x508   : > { %v4661_v31 = vpop.f32.mrf.mxu2 }
 0x510   : > { %v4818_v32 = vpop.f32.mrf.mxu2 }
 0x511   : > { %v4822_v56 = vadd.f32 %v4818_v32, %v4721_v41 }
 0x518   : > { %v4820_v55 = vpop.f32.mrf.mxu2 }
 0x520   : > { %v4917_v5 = vpop.f32.mrf.mxu3 }
 0x521   : > { %v4921_v57 = vadd.f32 %v4917_v5, %v4822_v56 }
 0x528   : > { %v4919_v20 = vpop.f32.mrf.mxu3 }
 0x530   : > { %v5013_v4 = vpop.f32.mrf.mxu2  ;;  %v5109_v7 = vpop.f32.mrf.mxu3 }
 0x531   : > { %v5017_v44 = vadd.f32 %v5013_v4, %v4921_v57 }
 0x533   : > { %v5113_v10 = vadd.f32 %v5109_v7, %v5017_v44 }
 0x538   : > { %v5015_v1 = vpop.f32.mrf.mxu2  ;;  %v5111_v52 = vpop.f32.mrf.mxu3 }
 0x540   : > { %v5205_v6 = vpop.f32.mrf.mxu2 }
 0x541   : > { %v5209_v53 = vadd.f32 %v5205_v6, %v5113_v10 }
 0x543   : > { %v5215_v0 = vadd.f32 %v7408_v34, %v5209_v53 }
 0x545   : > { %v5216_v48 = vsub.f32 0.0, %v5215_v0 }
 0x547   : > { %v5217_v42 = vmul.f32 1.442695, %v5216_v48 }
 0x548   : > { %v5207_v63 = vpop.f32.mrf.mxu2 }
 0x549   : > { %7409 = vpow2.f32 %v5217_v42 }
 0x54f   : > { %v7410_v58 = vpop.eup %7409 }
 0x550   : > { %v5219_v12 = vadd.f32 1.0, %v7410_v58 }
 0x552   : > { %7411 = vrcp.f32 %v5219_v12  ;;  %v5231_v17 = vand.u32 2147483648, %v5219_v12  ;;  %v5229_v21 = vand.u32 2147483647, %v5219_v12  ;;  %vm5225_vm12 = vweird.f32 %v5219_v12 }
 0x554   : > { %v5232_v35 = vor.u32 1.1754944e-38, %v5231_v17  ;;  %vm5230_vm14 = vcmp.eq.f32.partialorder %v5229_v21, 8.507059e+37 }
 0x558   : > { %v7412_v23 = vpop.eup %7411 }
 0x559   : > { %v5221_v38 = vmul.f32 %v7412_v23, %v5219_v12  ;;  %vm5226_vm11 = vweird.f32 %v7412_v23 }
 0x55a   : > { %vm5227_vm13 = vmor %vm5225_vm12, %vm5226_vm11 }
 0x55b   : > { %v5222_v13 = vsub.f32 1.0, %v5221_v38 }
 0x55d   : > { %v5223_v33 = vmul.f32 %v7412_v23, %v5222_v13 }
 0x55f   : > { %v5224_v51 = vadd.f32 %v7412_v23, %v5223_v33 }
 0x561   : > { %v5228_v54 = vsel %vm5227_vm13, %v7412_v23, %v5224_v51 }
 0x562   : > { %v5233_v2 = vsel %vm5230_vm14, %v5232_v35, %v5228_v54 }
 0x563   : > { %5234 = vst [vmem:[%s208_s14] sm:$0xf] %v5233_v2 }
 0x564   : > { %7470 = shalt.err (!%p7467_p8)
}
 0x565   : > { %7355 = dma.vmem_to_hbm [thread:$0]  (%p7578_p5), %s5249_s20, 64, %s5251_s22, %s5236_s19  }
 0x566 PF: > { %p7367_p9 = scmp.ge.s32.totalorder %s7509_s18, 2  ;;  %s5262_s7 = sand.u32 1, %s7497_s15  }
 0x567   : > { %s5263_s8 = scalar_lea.sflag [#allocation5], %s5262_s7 }
 0x568   : > { %p7362_p10 = pnand %p7367_p9, %p7582_p6 }
 0x56a   : > { %p7363_p11 = pneg %p7362_p10 }
 0x56c   : > { %7492 = dma.done.wait (%p7363_p11), %s5263_s8, 64  }
 0x56d   : > { %7494 = vsyncadd (%p7363_p11), %s5263_s8, 4294967232  ;;  %p15_p12 = scmp.ge.s32.totalorder %s7565_s21, 4   ;;  %s8220_s15 = smov %s7501_s16 }
 0x56e   : > { %s8221_s16 = smov %s7505_s17  ;;  %s8222_s17 = smov %s7576_s24 }
 0x56f   : > { %s8223_s18 = smov %s7565_s21  ;;  %17 = sbr.rel (!%p15_p12) target bundleno = 4 (0x4), region = 107 }
 0x574   :  { %5269 = vsyncpa [#allocation4], 1 }
 0x575   :  { %5271 = vsyncpa [#allocation4 + $0x1], 1 }
 0x576   :  { %5272 = vsyncpa [#allocation5], 1 }
 0x577   :  { %5274 = vsyncpa [#allocation5 + $0x1], 1 }

</bundles_post_ra>
